<compile_context>
chip_gen: v6e
topology: v6e:2x2x1
jax: 0.10.0
libtpu: 0.0.40
codegen_flags: <defaults>
</compile_context>

<pallas_src>
import functools

import jax
import jax.numpy as jnp
from jax.experimental import pallas as pl
from jax.experimental.pallas import tpu as pltpu

BN_EPS = 1e-5


# ------------------------------ Pallas kernel -------------------------------


def _bottleneck_kernel(xp_ref, mask_ref, w1_ref, b1_ref, w9_ref, b3_ref,
                       w5_ref, wd_ref, bres_ref, o_ref, h1_ref, acc_ref,
                       *, wp, tile_rows):
    """Fused 1x1 -> 3x3 -> (1x1 + downsample + ReLU) for one row tile.

    xp_ref : (1, Lp, Cin) f32   zero-padded image, flattened row-major (Hp, Wp)
    mask_ref:(Lp, 1)     f32    1 at valid image positions, 0 at pad positions
    w*_ref : bf16 weights with BN scales folded in; b*_ref: f32 BN shifts
    o_ref  : (1, tile_rows*Wp, Cout) f32   (2 garbage cols/row cropped on host)
    h1_ref : VMEM f32 ((tile_rows+3)*Wp, Cin) stage-1 halo buffer
    acc_ref: VMEM f32 (tile_rows*Wp, Cin)     3x3 conv accumulator
    """
    lout = tile_rows * wp
    halo = (tile_rows + 3) * wp
    base = pl.multiple_of(pl.program_id(1) * lout, 8)   # lout is a multiple of 8

    # --- stage 1: 1x1 conv + BN + ReLU over the halo rows; zero the pads so
    #     the 3x3 below sees a correctly zero-padded h1 (relu(b1) != 0 at pads).
    xh = xp_ref[0, pl.ds(base, halo), :]                              # (halo, Cin)
    h1 = jnp.dot(xh.astype(jnp.bfloat16), w1_ref[...],
                 preferred_element_type=jnp.float32)
    h1 = jnp.maximum(h1 + b1_ref[...], 0.0) * mask_ref[pl.ds(base, halo), :]
    h1_ref[...] = h1

    # --- stage 2: 3x3 conv as 9 shifted matmuls accumulated into VMEM scratch.
    acc_ref[...] = jnp.dot(h1_ref[0:lout, :].astype(jnp.bfloat16), w9_ref[0],
                           preferred_element_type=jnp.float32)
    for t in range(1, 9):                                # statically unrolled
        off = (t // 3) * wp + (t % 3)
        acc_ref[...] += jnp.dot(h1_ref[off:off + lout, :].astype(jnp.bfloat16),
                                w9_ref[t], preferred_element_type=jnp.float32)
    h2 = jnp.maximum(acc_ref[...] + b3_ref[...], 0.0).astype(jnp.bfloat16)

    # --- stage 3 + residual: two accumulated dots (no concat), then ReLU.
    x_res = xp_ref[0, pl.ds(base + wp + 1, lout), :].astype(jnp.bfloat16)
    out = (jnp.dot(h2, w5_ref[...], preferred_element_type=jnp.float32)
           + jnp.dot(x_res, wd_ref[...], preferred_element_type=jnp.float32)
           + bres_ref[...])
    o_ref[0, :, :] = jnp.maximum(out, 0.0).astype(o_ref.dtype)


# ---------------------------- parameter helpers -----------------------------


def bn_fold(gamma, beta, mean, var, eps=BN_EPS):
    scale = gamma / jnp.sqrt(var + eps)
    shift = beta - mean * scale
    return scale.reshape(1, -1), shift.reshape(1, -1)


def init_params(key, in_d, out_d):
    ks = jax.random.split(key, 21)
    p = {}
    # Conv weights in PyTorch layout (out, in, kh, kw).
    p["w1"] = jax.random.normal(ks[0], (in_d, in_d, 1, 1), jnp.float32) * 0.3
    p["w3"] = jax.random.normal(ks[1], (in_d, in_d, 3, 3), jnp.float32) * 0.1
    p["w5"] = jax.random.normal(ks[2], (out_d, in_d, 1, 1), jnp.float32) * 0.3
    p["wd"] = jax.random.normal(ks[3], (out_d, in_d, 1, 1), jnp.float32) * 0.3
    p["bd"] = jax.random.normal(ks[4], (out_d,), jnp.float32) * 0.1

    def bn(kg, kb, km, kv, c):
        return (1.0 + 0.1 * jax.random.normal(kg, (c,), jnp.float32),
                0.1 * jax.random.normal(kb, (c,), jnp.float32),
                0.1 * jax.random.normal(km, (c,), jnp.float32),
                0.5 + jax.random.uniform(kv, (c,), jnp.float32))
    p["bn1"] = bn(ks[5], ks[6], ks[7], ks[8], in_d)
    p["bn3"] = bn(ks[9], ks[10], ks[11], ks[12], in_d)
    p["bn5"] = bn(ks[13], ks[14], ks[15], ks[16], out_d)
    p["bnd"] = bn(ks[17], ks[18], ks[19], ks[20], out_d)
    return p


# ------------------------------ forward pass --------------------------------


def bottleneck_forward(x_nchw, params, *, tile_rows=8):
    """Fused Pallas implementation. Input/output NCHW to match PyTorch."""
    assert tile_rows % 8 == 0
    B, Cin, H, W = x_nchw.shape
    Cout = params["w5"].shape[0]

    Wp = W + 2
    n_tiles = (H + tile_rows - 1) // tile_rows
    H_eff = n_tiles * tile_rows
    Hp = H_eff + 3                       # 1 top pad + H_eff rows + >=2 bottom pads
    Lp = Hp * Wp
    lout = tile_rows * Wp

    # Fold BN into scale/shift, then fold the scales into the conv weights and
    # cast to bf16 for the MXU (constant-folded under jit).
    s1, b1 = bn_fold(*params["bn1"])
    s3, b3 = bn_fold(*params["bn3"])
    s5, b5 = bn_fold(*params["bn5"])
    sd, bdsh = bn_fold(*params["bnd"])

    w1s = (params["w1"][:, :, 0, 0].T * s1).astype(jnp.bfloat16)       # (Cin, Cin)
    w9 = jnp.transpose(params["w3"], (2, 3, 1, 0)).reshape(9, Cin, Cin)
    w9s = (w9 * s3.reshape(1, 1, Cin)).astype(jnp.bfloat16)            # (9, Cin, Cin)
    w5s = (params["w5"][:, :, 0, 0].T * s5).astype(jnp.bfloat16)       # (Cin, Cout)
    wds = (params["wd"][:, :, 0, 0].T * sd).astype(jnp.bfloat16)       # (Cin, Cout)
    b_res = b5 + params["bd"].reshape(1, -1) * sd + bdsh               # (1, Cout)

    # NCHW -> NHWC, zero-pad (1 top, H_eff-H+2 bottom, 1 left, 1 right), flatten.
    x_nhwc = jnp.transpose(x_nchw, (0, 2, 3, 1)).astype(jnp.float32)
    xp = jnp.pad(x_nhwc, ((0, 0), (1, Hp - H - 1), (1, 1), (0, 0)))
    xp_flat = xp.reshape(B, Lp, Cin)

    # 1 at valid image positions, 0 at pad positions (zeroes h1's halo pads).
    mask = jnp.zeros((Hp, Wp), jnp.float32).at[1:1 + H, 1:1 + W].set(1.0)
    mask = mask.reshape(Lp, 1)

    kern = functools.partial(_bottleneck_kernel, wp=Wp, tile_rows=tile_rows)
    out = pl.pallas_call(
        kern,
        out_shape=jax.ShapeDtypeStruct((B, H_eff * Wp, Cout), jnp.float32),
        grid=(B, n_tiles),
        in_specs=[
            pl.BlockSpec((1, Lp, Cin), lambda b, r: (b, 0, 0)),   # resident per batch
            pl.BlockSpec((Lp, 1), lambda b, r: (0, 0)),           # mask, resident
            pl.BlockSpec((Cin, Cin), lambda b, r: (0, 0)),        # w1s
            pl.BlockSpec((1, Cin), lambda b, r: (0, 0)),          # b1
            pl.BlockSpec((9, Cin, Cin), lambda b, r: (0, 0, 0)),  # w9s
            pl.BlockSpec((1, Cin), lambda b, r: (0, 0)),          # b3
            pl.BlockSpec((Cin, Cout), lambda b, r: (0, 0)),       # w5s
            pl.BlockSpec((Cin, Cout), lambda b, r: (0, 0)),       # wds
            pl.BlockSpec((1, Cout), lambda b, r: (0, 0)),         # b_res
        ],
        out_specs=pl.BlockSpec((1, lout, Cout), lambda b, r: (b, r, 0)),
        scratch_shapes=[
            pltpu.VMEM(((tile_rows + 3) * Wp, Cin), jnp.float32),  # h1 halo
            pltpu.VMEM((lout, Cin), jnp.float32),                  # 3x3 accumulator
        ],
        compiler_params=pltpu.CompilerParams(
            dimension_semantics=("parallel", "parallel"),
            vmem_limit_bytes=32 * 1024 * 1024),
    )(xp_flat, mask, w1s, b1, w9s, b3, w5s, wds, b_res)

    # Crop the 2 garbage pad columns per row and any bottom garbage rows.
    out = out.reshape(B, H_eff, Wp, Cout)[:, :H, :W, :]
    return jnp.transpose(out, (0, 3, 1, 2))                        # NHWC -> NCHW


# ------------------------- pure-JAX reference (check) -----------------------


def _conv_nhwc(x, w_torch, stride=1, padding=0):
    w = jnp.transpose(w_torch, (2, 3, 1, 0))  # (out,in,kh,kw) -> HWIO
    return jax.lax.conv_general_dilated(
        x, w, (stride, stride), [(padding, padding)] * 2,
        dimension_numbers=("NHWC", "HWIO", "NHWC"))


def bottleneck_reference(x_nchw, params):
    x = jnp.transpose(x_nchw, (0, 2, 3, 1)).astype(jnp.float32)

    def bn(y, prm):
        g, b, m, v = prm
        return (y - m) / jnp.sqrt(v + BN_EPS) * g + b

    h = jax.nn.relu(bn(_conv_nhwc(x, params["w1"]), params["bn1"]))
    h = jax.nn.relu(bn(_conv_nhwc(h, params["w3"], padding=1), params["bn3"]))
    h = bn(_conv_nhwc(h, params["w5"]), params["bn5"])
    d = bn(_conv_nhwc(x, params["wd"]) + params["bd"], params["bnd"])
    out = jax.nn.relu(h + d)
    return jnp.transpose(out, (0, 3, 1, 2))


# --------------------------------- main --------------------------------------

if __name__ == "__main__":
    B, Cin, Cout, H, W = 2, 4, 8, 16, 16
    key = jax.random.PRNGKey(0)
    kx, kp = jax.random.split(key)
    x = jax.random.normal(kx, (B, Cin, H, W), jnp.float32)
    params = init_params(kp, Cin, Cout)

    fwd = jax.jit(functools.partial(bottleneck_forward, params=params))
    out = jax.block_until_ready(fwd(x))

    ref = jax.block_until_ready(bottleneck_reference(x, params))
    assert out.shape == (B, Cout, H, W), out.shape
    # bf16 MXU operands with f32 accumulation -> relaxed tolerance vs f32 ref.
    err = float(jnp.max(jnp.abs(out - ref)))
    assert jnp.allclose(out, ref, atol=5e-2, rtol=5e-2), err

    print("KERNEL_OK")
</pallas_src>

<mosaic_0001>
module attributes {stable_mosaic.version = 11 : i64} {
  func.func @_bottleneck_kernel(%arg0: i32, %arg1: i32, %arg2: memref<1x342x4xf32, #tpu.memory_space<vmem>>, %arg3: memref<342x1xf32, #tpu.memory_space<vmem>>, %arg4: memref<4x4xbf16, #tpu.memory_space<vmem>>, %arg5: memref<1x4xf32, #tpu.memory_space<vmem>>, %arg6: memref<9x4x4xbf16, #tpu.memory_space<vmem>>, %arg7: memref<1x4xf32, #tpu.memory_space<vmem>>, %arg8: memref<4x8xbf16, #tpu.memory_space<vmem>>, %arg9: memref<4x8xbf16, #tpu.memory_space<vmem>>, %arg10: memref<1x8xf32, #tpu.memory_space<vmem>>, %arg11: memref<1x144x8xf32, #tpu.memory_space<vmem>>, %arg12: memref<198x4xf32, #tpu.memory_space<vmem>>, %arg13: memref<144x4xf32, #tpu.memory_space<vmem>>) attributes {dimension_semantics = [#tpu.dimension_semantics<parallel>, #tpu.dimension_semantics<parallel>], iteration_bounds = array<i64: 2, 2>, scalar_prefetch = 0 : i64, scratch_operands = 2 : i64, tpu.core_type = #tpu.core_type<tc>, window_params = [{transform_indices = @transform_0, window_bounds = array<i64: 1, 342, 4>}, {pipeline_mode = #tpu.pipeline_mode<synchronous>, transform_indices = @transform_1, window_bounds = array<i64: 342, 1>}, {pipeline_mode = #tpu.pipeline_mode<synchronous>, transform_indices = @transform_2, window_bounds = array<i64: 4, 4>}, {pipeline_mode = #tpu.pipeline_mode<synchronous>, transform_indices = @transform_3, window_bounds = array<i64: 1, 4>}, {pipeline_mode = #tpu.pipeline_mode<synchronous>, transform_indices = @transform_4, window_bounds = array<i64: 9, 4, 4>}, {pipeline_mode = #tpu.pipeline_mode<synchronous>, transform_indices = @transform_5, window_bounds = array<i64: 1, 4>}, {pipeline_mode = #tpu.pipeline_mode<synchronous>, transform_indices = @transform_6, window_bounds = array<i64: 4, 8>}, {pipeline_mode = #tpu.pipeline_mode<synchronous>, transform_indices = @transform_7, window_bounds = array<i64: 4, 8>}, {pipeline_mode = #tpu.pipeline_mode<synchronous>, transform_indices = @transform_8, window_bounds = array<i64: 1, 8>}, {transform_indices = @transform_9, window_bounds = array<i64: 1, 144, 8>}]} {
    %c144_i32 = arith.constant 144 : i32
    %0 = arith.muli %arg1, %c144_i32 : i32
    %1 = tpu.assume_multiple %0, 8 : i32
    %c0 = arith.constant 0 : index
    %2 = arith.index_cast %1 : i32 to index
    %c0_0 = arith.constant 0 : index
    %3 = vector.load %arg2[%c0, %2, %c0_0] : memref<1x342x4xf32, #tpu.memory_space<vmem>>, vector<1x198x4xf32>
    %4 = vector.shape_cast %3 : vector<1x198x4xf32> to vector<198x4xf32>
    %5 = arith.truncf %4 : vector<198x4xf32> to vector<198x4xbf16>
    %c0_1 = arith.constant 0 : index
    %c0_2 = arith.constant 0 : index
    %6 = vector.load %arg4[%c0_1, %c0_2] : memref<4x4xbf16, #tpu.memory_space<vmem>>, vector<4x4xbf16>
    %cst = arith.constant dense<0.000000e+00> : vector<198x4xf32>
    %7 = tpu.matmul %5, %6, %cst {dimension_numbers = #tpu.dot_dimension_numbers<[1], [0], [0], [1], [0, 0, 1, 1], [], []>} : vector<198x4xbf16>, vector<4x4xbf16>, vector<198x4xf32> -> vector<198x4xf32>
    %c0_3 = arith.constant 0 : index
    %c0_4 = arith.constant 0 : index
    %8 = vector.load %arg5[%c0_3, %c0_4] : memref<1x4xf32, #tpu.memory_space<vmem>>, vector<1x4xf32>
    %9 = vector.broadcast %8 : vector<1x4xf32> to vector<198x4xf32>
    %10 = arith.addf %7, %9 : vector<198x4xf32>
    %cst_5 = arith.constant 0.000000e+00 : f32
    %11 = vector.broadcast %cst_5 : f32 to vector<198x4xf32>
    %12 = arith.maximumf %10, %11 : vector<198x4xf32>
    %13 = arith.index_cast %1 : i32 to index
    %c0_6 = arith.constant 0 : index
    %14 = vector.load %arg3[%13, %c0_6] : memref<342x1xf32, #tpu.memory_space<vmem>>, vector<198x1xf32>
    %15 = vector.broadcast %14 : vector<198x1xf32> to vector<198x4xf32>
    %16 = arith.mulf %12, %15 : vector<198x4xf32>
    %c0_7 = arith.constant 0 : index
    %c0_8 = arith.constant 0 : index
    %17 = vector.load %arg12[%c0_7, %c0_8] : memref<198x4xf32, #tpu.memory_space<vmem>>, vector<198x4xf32>
    tpu.vector_store %arg12[%c0_7, %c0_8], %16 {strides = array<i32>} : memref<198x4xf32, #tpu.memory_space<vmem>>, vector<198x4xf32>,
    %c0_9 = arith.constant 0 : index
    %c0_10 = arith.constant 0 : index
    %18 = vector.load %arg12[%c0_9, %c0_10] : memref<198x4xf32, #tpu.memory_space<vmem>>, vector<144x4xf32>
    %19 = arith.truncf %18 : vector<144x4xf32> to vector<144x4xbf16>
    %c0_11 = arith.constant 0 : index
    %c0_12 = arith.constant 0 : index
    %c0_13 = arith.constant 0 : index
    %20 = vector.load %arg6[%c0_11, %c0_12, %c0_13] : memref<9x4x4xbf16, #tpu.memory_space<vmem>>, vector<1x4x4xbf16>
    %21 = vector.shape_cast %20 : vector<1x4x4xbf16> to vector<4x4xbf16>
    %cst_14 = arith.constant dense<0.000000e+00> : vector<144x4xf32>
    %22 = tpu.matmul %19, %21, %cst_14 {dimension_numbers = #tpu.dot_dimension_numbers<[1], [0], [0], [1], [0, 0, 1, 1], [], []>} : vector<144x4xbf16>, vector<4x4xbf16>, vector<144x4xf32> -> vector<144x4xf32>
    %c0_15 = arith.constant 0 : index
    %c0_16 = arith.constant 0 : index
    %23 = vector.load %arg13[%c0_15, %c0_16] : memref<144x4xf32, #tpu.memory_space<vmem>>, vector<144x4xf32>
    tpu.vector_store %arg13[%c0_15, %c0_16], %22 {strides = array<i32>} : memref<144x4xf32, #tpu.memory_space<vmem>>, vector<144x4xf32>,
    %c0_17 = arith.constant 0 : index
    %c0_18 = arith.constant 0 : index
    %24 = vector.load %arg13[%c0_17, %c0_18] : memref<144x4xf32, #tpu.memory_space<vmem>>, vector<144x4xf32>
    %c1 = arith.constant 1 : index
    %c0_19 = arith.constant 0 : index
    %25 = vector.load %arg12[%c1, %c0_19] : memref<198x4xf32, #tpu.memory_space<vmem>>, vector<144x4xf32>
    %26 = arith.truncf %25 : vector<144x4xf32> to vector<144x4xbf16>
    %c1_20 = arith.constant 1 : index
    %c0_21 = arith.constant 0 : index
    %c0_22 = arith.constant 0 : index
    %27 = vector.load %arg6[%c1_20, %c0_21, %c0_22] : memref<9x4x4xbf16, #tpu.memory_space<vmem>>, vector<1x4x4xbf16>
    %28 = vector.shape_cast %27 : vector<1x4x4xbf16> to vector<4x4xbf16>
    %cst_23 = arith.constant dense<0.000000e+00> : vector<144x4xf32>
    %29 = tpu.matmul %26, %28, %cst_23 {dimension_numbers = #tpu.dot_dimension_numbers<[1], [0], [0], [1], [0, 0, 1, 1], [], []>} : vector<144x4xbf16>, vector<4x4xbf16>, vector<144x4xf32> -> vector<144x4xf32>
    %30 = arith.addf %24, %29 : vector<144x4xf32>
    %c0_24 = arith.constant 0 : index
    %c0_25 = arith.constant 0 : index
    %31 = vector.load %arg13[%c0_24, %c0_25] : memref<144x4xf32, #tpu.memory_space<vmem>>, vector<144x4xf32>
    tpu.vector_store %arg13[%c0_24, %c0_25], %30 {strides = array<i32>} : memref<144x4xf32, #tpu.memory_space<vmem>>, vector<144x4xf32>,
    %c0_26 = arith.constant 0 : index
    %c0_27 = arith.constant 0 : index
    %32 = vector.load %arg13[%c0_26, %c0_27] : memref<144x4xf32, #tpu.memory_space<vmem>>, vector<144x4xf32>
    %c2 = arith.constant 2 : index
    %c0_28 = arith.constant 0 : index
    %33 = vector.load %arg12[%c2, %c0_28] : memref<198x4xf32, #tpu.memory_space<vmem>>, vector<144x4xf32>
    %34 = arith.truncf %33 : vector<144x4xf32> to vector<144x4xbf16>
    %c2_29 = arith.constant 2 : index
    %c0_30 = arith.constant 0 : index
    %c0_31 = arith.constant 0 : index
    %35 = vector.load %arg6[%c2_29, %c0_30, %c0_31] : memref<9x4x4xbf16, #tpu.memory_space<vmem>>, vector<1x4x4xbf16>
    %36 = vector.shape_cast %35 : vector<1x4x4xbf16> to vector<4x4xbf16>
    %cst_32 = arith.constant dense<0.000000e+00> : vector<144x4xf32>
    %37 = tpu.matmul %34, %36, %cst_32 {dimension_numbers = #tpu.dot_dimension_numbers<[1], [0], [0], [1], [0, 0, 1, 1], [], []>} : vector<144x4xbf16>, vector<4x4xbf16>, vector<144x4xf32> -> vector<144x4xf32>
    %38 = arith.addf %32, %37 : vector<144x4xf32>
    %c0_33 = arith.constant 0 : index
    %c0_34 = arith.constant 0 : index
    %39 = vector.load %arg13[%c0_33, %c0_34] : memref<144x4xf32, #tpu.memory_space<vmem>>, vector<144x4xf32>
    tpu.vector_store %arg13[%c0_33, %c0_34], %38 {strides = array<i32>} : memref<144x4xf32, #tpu.memory_space<vmem>>, vector<144x4xf32>,
    %c0_35 = arith.constant 0 : index
    %c0_36 = arith.constant 0 : index
    %40 = vector.load %arg13[%c0_35, %c0_36] : memref<144x4xf32, #tpu.memory_space<vmem>>, vector<144x4xf32>
    %c18 = arith.constant 18 : index
    %c0_37 = arith.constant 0 : index
    %41 = vector.load %arg12[%c18, %c0_37] : memref<198x4xf32, #tpu.memory_space<vmem>>, vector<144x4xf32>
    %42 = arith.truncf %41 : vector<144x4xf32> to vector<144x4xbf16>
    %c3 = arith.constant 3 : index
    %c0_38 = arith.constant 0 : index
    %c0_39 = arith.constant 0 : index
    %43 = vector.load %arg6[%c3, %c0_38, %c0_39] : memref<9x4x4xbf16, #tpu.memory_space<vmem>>, vector<1x4x4xbf16>
    %44 = vector.shape_cast %43 : vector<1x4x4xbf16> to vector<4x4xbf16>
    %cst_40 = arith.constant dense<0.000000e+00> : vector<144x4xf32>
    %45 = tpu.matmul %42, %44, %cst_40 {dimension_numbers = #tpu.dot_dimension_numbers<[1], [0], [0], [1], [0, 0, 1, 1], [], []>} : vector<144x4xbf16>, vector<4x4xbf16>, vector<144x4xf32> -> vector<144x4xf32>
    %46 = arith.addf %40, %45 : vector<144x4xf32>
    %c0_41 = arith.constant 0 : index
    %c0_42 = arith.constant 0 : index
    %47 = vector.load %arg13[%c0_41, %c0_42] : memref<144x4xf32, #tpu.memory_space<vmem>>, vector<144x4xf32>
    tpu.vector_store %arg13[%c0_41, %c0_42], %46 {strides = array<i32>} : memref<144x4xf32, #tpu.memory_space<vmem>>, vector<144x4xf32>,
    %c0_43 = arith.constant 0 : index
    %c0_44 = arith.constant 0 : index
    %48 = vector.load %arg13[%c0_43, %c0_44] : memref<144x4xf32, #tpu.memory_space<vmem>>, vector<144x4xf32>
    %c19 = arith.constant 19 : index
    %c0_45 = arith.constant 0 : index
    %49 = vector.load %arg12[%c19, %c0_45] : memref<198x4xf32, #tpu.memory_space<vmem>>, vector<144x4xf32>
    %50 = arith.truncf %49 : vector<144x4xf32> to vector<144x4xbf16>
    %c4 = arith.constant 4 : index
    %c0_46 = arith.constant 0 : index
    %c0_47 = arith.constant 0 : index
    %51 = vector.load %arg6[%c4, %c0_46, %c0_47] : memref<9x4x4xbf16, #tpu.memory_space<vmem>>, vector<1x4x4xbf16>
    %52 = vector.shape_cast %51 : vector<1x4x4xbf16> to vector<4x4xbf16>
    %cst_48 = arith.constant dense<0.000000e+00> : vector<144x4xf32>
    %53 = tpu.matmul %50, %52, %cst_48 {dimension_numbers = #tpu.dot_dimension_numbers<[1], [0], [0], [1], [0, 0, 1, 1], [], []>} : vector<144x4xbf16>, vector<4x4xbf16>, vector<144x4xf32> -> vector<144x4xf32>
    %54 = arith.addf %48, %53 : vector<144x4xf32>
    %c0_49 = arith.constant 0 : index
    %c0_50 = arith.constant 0 : index
    %55 = vector.load %arg13[%c0_49, %c0_50] : memref<144x4xf32, #tpu.memory_space<vmem>>, vector<144x4xf32>
    tpu.vector_store %arg13[%c0_49, %c0_50], %54 {strides = array<i32>} : memref<144x4xf32, #tpu.memory_space<vmem>>, vector<144x4xf32>,
    %c0_51 = arith.constant 0 : index
    %c0_52 = arith.constant 0 : index
    %56 = vector.load %arg13[%c0_51, %c0_52] : memref<144x4xf32, #tpu.memory_space<vmem>>, vector<144x4xf32>
    %c20 = arith.constant 20 : index
    %c0_53 = arith.constant 0 : index
    %57 = vector.load %arg12[%c20, %c0_53] : memref<198x4xf32, #tpu.memory_space<vmem>>, vector<144x4xf32>
    %58 = arith.truncf %57 : vector<144x4xf32> to vector<144x4xbf16>
    %c5 = arith.constant 5 : index
    %c0_54 = arith.constant 0 : index
    %c0_55 = arith.constant 0 : index
    %59 = vector.load %arg6[%c5, %c0_54, %c0_55] : memref<9x4x4xbf16, #tpu.memory_space<vmem>>, vector<1x4x4xbf16>
    %60 = vector.shape_cast %59 : vector<1x4x4xbf16> to vector<4x4xbf16>
    %cst_56 = arith.constant dense<0.000000e+00> : vector<144x4xf32>
    %61 = tpu.matmul %58, %60, %cst_56 {dimension_numbers = #tpu.dot_dimension_numbers<[1], [0], [0], [1], [0, 0, 1, 1], [], []>} : vector<144x4xbf16>, vector<4x4xbf16>, vector<144x4xf32> -> vector<144x4xf32>
    %62 = arith.addf %56, %61 : vector<144x4xf32>
    %c0_57 = arith.constant 0 : index
    %c0_58 = arith.constant 0 : index
    %63 = vector.load %arg13[%c0_57, %c0_58] : memref<144x4xf32, #tpu.memory_space<vmem>>, vector<144x4xf32>
    tpu.vector_store %arg13[%c0_57, %c0_58], %62 {strides = array<i32>} : memref<144x4xf32, #tpu.memory_space<vmem>>, vector<144x4xf32>,
    %c0_59 = arith.constant 0 : index
    %c0_60 = arith.constant 0 : index
    %64 = vector.load %arg13[%c0_59, %c0_60] : memref<144x4xf32, #tpu.memory_space<vmem>>, vector<144x4xf32>
    %c36 = arith.constant 36 : index
    %c0_61 = arith.constant 0 : index
    %65 = vector.load %arg12[%c36, %c0_61] : memref<198x4xf32, #tpu.memory_space<vmem>>, vector<144x4xf32>
    %66 = arith.truncf %65 : vector<144x4xf32> to vector<144x4xbf16>
    %c6 = arith.constant 6 : index
    %c0_62 = arith.constant 0 : index
    %c0_63 = arith.constant 0 : index
    %67 = vector.load %arg6[%c6, %c0_62, %c0_63] : memref<9x4x4xbf16, #tpu.memory_space<vmem>>, vector<1x4x4xbf16>
    %68 = vector.shape_cast %67 : vector<1x4x4xbf16> to vector<4x4xbf16>
    %cst_64 = arith.constant dense<0.000000e+00> : vector<144x4xf32>
    %69 = tpu.matmul %66, %68, %cst_64 {dimension_numbers = #tpu.dot_dimension_numbers<[1], [0], [0], [1], [0, 0, 1, 1], [], []>} : vector<144x4xbf16>, vector<4x4xbf16>, vector<144x4xf32> -> vector<144x4xf32>
    %70 = arith.addf %64, %69 : vector<144x4xf32>
    %c0_65 = arith.constant 0 : index
    %c0_66 = arith.constant 0 : index
    %71 = vector.load %arg13[%c0_65, %c0_66] : memref<144x4xf32, #tpu.memory_space<vmem>>, vector<144x4xf32>
    tpu.vector_store %arg13[%c0_65, %c0_66], %70 {strides = array<i32>} : memref<144x4xf32, #tpu.memory_space<vmem>>, vector<144x4xf32>,
    %c0_67 = arith.constant 0 : index
    %c0_68 = arith.constant 0 : index
    %72 = vector.load %arg13[%c0_67, %c0_68] : memref<144x4xf32, #tpu.memory_space<vmem>>, vector<144x4xf32>
    %c37 = arith.constant 37 : index
    %c0_69 = arith.constant 0 : index
    %73 = vector.load %arg12[%c37, %c0_69] : memref<198x4xf32, #tpu.memory_space<vmem>>, vector<144x4xf32>
    %74 = arith.truncf %73 : vector<144x4xf32> to vector<144x4xbf16>
    %c7 = arith.constant 7 : index
    %c0_70 = arith.constant 0 : index
    %c0_71 = arith.constant 0 : index
    %75 = vector.load %arg6[%c7, %c0_70, %c0_71] : memref<9x4x4xbf16, #tpu.memory_space<vmem>>, vector<1x4x4xbf16>
    %76 = vector.shape_cast %75 : vector<1x4x4xbf16> to vector<4x4xbf16>
    %cst_72 = arith.constant dense<0.000000e+00> : vector<144x4xf32>
    %77 = tpu.matmul %74, %76, %cst_72 {dimension_numbers = #tpu.dot_dimension_numbers<[1], [0], [0], [1], [0, 0, 1, 1], [], []>} : vector<144x4xbf16>, vector<4x4xbf16>, vector<144x4xf32> -> vector<144x4xf32>
    %78 = arith.addf %72, %77 : vector<144x4xf32>
    %c0_73 = arith.constant 0 : index
    %c0_74 = arith.constant 0 : index
    %79 = vector.load %arg13[%c0_73, %c0_74] : memref<144x4xf32, #tpu.memory_space<vmem>>, vector<144x4xf32>
    tpu.vector_store %arg13[%c0_73, %c0_74], %78 {strides = array<i32>} : memref<144x4xf32, #tpu.memory_space<vmem>>, vector<144x4xf32>,
    %c0_75 = arith.constant 0 : index
    %c0_76 = arith.constant 0 : index
    %80 = vector.load %arg13[%c0_75, %c0_76] : memref<144x4xf32, #tpu.memory_space<vmem>>, vector<144x4xf32>
    %c38 = arith.constant 38 : index
    %c0_77 = arith.constant 0 : index
    %81 = vector.load %arg12[%c38, %c0_77] : memref<198x4xf32, #tpu.memory_space<vmem>>, vector<144x4xf32>
    %82 = arith.truncf %81 : vector<144x4xf32> to vector<144x4xbf16>
    %c8 = arith.constant 8 : index
    %c0_78 = arith.constant 0 : index
    %c0_79 = arith.constant 0 : index
    %83 = vector.load %arg6[%c8, %c0_78, %c0_79] : memref<9x4x4xbf16, #tpu.memory_space<vmem>>, vector<1x4x4xbf16>
    %84 = vector.shape_cast %83 : vector<1x4x4xbf16> to vector<4x4xbf16>
    %cst_80 = arith.constant dense<0.000000e+00> : vector<144x4xf32>
    %85 = tpu.matmul %82, %84, %cst_80 {dimension_numbers = #tpu.dot_dimension_numbers<[1], [0], [0], [1], [0, 0, 1, 1], [], []>} : vector<144x4xbf16>, vector<4x4xbf16>, vector<144x4xf32> -> vector<144x4xf32>
    %86 = arith.addf %80, %85 : vector<144x4xf32>
    %c0_81 = arith.constant 0 : index
    %c0_82 = arith.constant 0 : index
    %87 = vector.load %arg13[%c0_81, %c0_82] : memref<144x4xf32, #tpu.memory_space<vmem>>, vector<144x4xf32>
    tpu.vector_store %arg13[%c0_81, %c0_82], %86 {strides = array<i32>} : memref<144x4xf32, #tpu.memory_space<vmem>>, vector<144x4xf32>,
    %c0_83 = arith.constant 0 : index
    %c0_84 = arith.constant 0 : index
    %88 = vector.load %arg13[%c0_83, %c0_84] : memref<144x4xf32, #tpu.memory_space<vmem>>, vector<144x4xf32>
    %c0_85 = arith.constant 0 : index
    %c0_86 = arith.constant 0 : index
    %89 = vector.load %arg7[%c0_85, %c0_86] : memref<1x4xf32, #tpu.memory_space<vmem>>, vector<1x4xf32>
    %90 = vector.broadcast %89 : vector<1x4xf32> to vector<144x4xf32>
    %91 = arith.addf %88, %90 : vector<144x4xf32>
    %cst_87 = arith.constant 0.000000e+00 : f32
    %92 = vector.broadcast %cst_87 : f32 to vector<144x4xf32>
    %93 = arith.maximumf %91, %92 : vector<144x4xf32>
    %94 = arith.truncf %93 : vector<144x4xf32> to vector<144x4xbf16>
    %c18_i32 = arith.constant 18 : i32
    %95 = arith.addi %1, %c18_i32 : i32
    %c1_i32 = arith.constant 1 : i32
    %96 = arith.addi %95, %c1_i32 : i32
    %c0_88 = arith.constant 0 : index
    %97 = arith.index_cast %96 : i32 to index
    %c0_89 = arith.constant 0 : index
    %98 = vector.load %arg2[%c0_88, %97, %c0_89] : memref<1x342x4xf32, #tpu.memory_space<vmem>>, vector<1x144x4xf32>
    %99 = vector.shape_cast %98 : vector<1x144x4xf32> to vector<144x4xf32>
    %100 = arith.truncf %99 : vector<144x4xf32> to vector<144x4xbf16>
    %c0_90 = arith.constant 0 : index
    %c0_91 = arith.constant 0 : index
    %101 = vector.load %arg8[%c0_90, %c0_91] : memref<4x8xbf16, #tpu.memory_space<vmem>>, vector<4x8xbf16>
    %cst_92 = arith.constant dense<0.000000e+00> : vector<144x8xf32>
    %102 = tpu.matmul %94, %101, %cst_92 {dimension_numbers = #tpu.dot_dimension_numbers<[1], [0], [0], [1], [0, 0, 1, 1], [], []>} : vector<144x4xbf16>, vector<4x8xbf16>, vector<144x8xf32> -> vector<144x8xf32>
    %c0_93 = arith.constant 0 : index
    %c0_94 = arith.constant 0 : index
    %103 = vector.load %arg9[%c0_93, %c0_94] : memref<4x8xbf16, #tpu.memory_space<vmem>>, vector<4x8xbf16>
    %cst_95 = arith.constant dense<0.000000e+00> : vector<144x8xf32>
    %104 = tpu.matmul %100, %103, %cst_95 {dimension_numbers = #tpu.dot_dimension_numbers<[1], [0], [0], [1], [0, 0, 1, 1], [], []>} : vector<144x4xbf16>, vector<4x8xbf16>, vector<144x8xf32> -> vector<144x8xf32>
    %105 = arith.addf %102, %104 : vector<144x8xf32>
    %c0_96 = arith.constant 0 : index
    %c0_97 = arith.constant 0 : index
    %106 = vector.load %arg10[%c0_96, %c0_97] : memref<1x8xf32, #tpu.memory_space<vmem>>, vector<1x8xf32>
    %107 = vector.broadcast %106 : vector<1x8xf32> to vector<144x8xf32>
    %108 = arith.addf %105, %107 : vector<144x8xf32>
    %cst_98 = arith.constant 0.000000e+00 : f32
    %109 = vector.broadcast %cst_98 : f32 to vector<144x8xf32>
    %110 = arith.maximumf %108, %109 : vector<144x8xf32>
    %c0_99 = arith.constant 0 : index
    %c0_100 = arith.constant 0 : index
    %c0_101 = arith.constant 0 : index
    %111 = vector.load %arg11[%c0_99, %c0_100, %c0_101] : memref<1x144x8xf32, #tpu.memory_space<vmem>>, vector<1x144x8xf32>
    %112 = vector.shape_cast %111 : vector<1x144x8xf32> to vector<144x8xf32>
    %113 = vector.shape_cast %110 : vector<144x8xf32> to vector<1x144x8xf32>
    tpu.vector_store %arg11[%c0_99, %c0_100, %c0_101], %113 {strides = array<i32>} : memref<1x144x8xf32, #tpu.memory_space<vmem>>, vector<1x144x8xf32>,
    return
  }
  func.func @transform_0(%arg0: i32, %arg1: i32) -> (i32, i32, i32) {
    %c0_i32 = arith.constant 0 : i32
    %c0_i32_0 = arith.constant 0 : i32
    %c0_i32_1 = arith.constant 0 : i32
    return %arg0, %c0_i32, %c0_i32_0 : i32, i32, i32
  }
  func.func @transform_1(%arg0: i32, %arg1: i32) -> (i32, i32) {
    %c0_i32 = arith.constant 0 : i32
    %c0_i32_0 = arith.constant 0 : i32
    %c0_i32_1 = arith.constant 0 : i32
    return %c0_i32, %c0_i32_0 : i32, i32
  }
  func.func @transform_2(%arg0: i32, %arg1: i32) -> (i32, i32) {
    %c0_i32 = arith.constant 0 : i32
    %c0_i32_0 = arith.constant 0 : i32
    %c0_i32_1 = arith.constant 0 : i32
    return %c0_i32, %c0_i32_0 : i32, i32
  }
  func.func @transform_3(%arg0: i32, %arg1: i32) -> (i32, i32) {
    %c0_i32 = arith.constant 0 : i32
    %c0_i32_0 = arith.constant 0 : i32
    %c0_i32_1 = arith.constant 0 : i32
    return %c0_i32, %c0_i32_0 : i32, i32
  }
  func.func @transform_4(%arg0: i32, %arg1: i32) -> (i32, i32, i32) {
    %c0_i32 = arith.constant 0 : i32
    %c0_i32_0 = arith.constant 0 : i32
    %c0_i32_1 = arith.constant 0 : i32
    %c0_i32_2 = arith.constant 0 : i32
    return %c0_i32, %c0_i32_0, %c0_i32_1 : i32, i32, i32
  }
  func.func @transform_5(%arg0: i32, %arg1: i32) -> (i32, i32) {
    %c0_i32 = arith.constant 0 : i32
    %c0_i32_0 = arith.constant 0 : i32
    %c0_i32_1 = arith.constant 0 : i32
    return %c0_i32, %c0_i32_0 : i32, i32
  }
  func.func @transform_6(%arg0: i32, %arg1: i32) -> (i32, i32) {
    %c0_i32 = arith.constant 0 : i32
    %c0_i32_0 = arith.constant 0 : i32
    %c0_i32_1 = arith.constant 0 : i32
    return %c0_i32, %c0_i32_0 : i32, i32
  }
  func.func @transform_7(%arg0: i32, %arg1: i32) -> (i32, i32) {
    %c0_i32 = arith.constant 0 : i32
    %c0_i32_0 = arith.constant 0 : i32
    %c0_i32_1 = arith.constant 0 : i32
    return %c0_i32, %c0_i32_0 : i32, i32
  }
  func.func @transform_8(%arg0: i32, %arg1: i32) -> (i32, i32) {
    %c0_i32 = arith.constant 0 : i32
    %c0_i32_0 = arith.constant 0 : i32
    %c0_i32_1 = arith.constant 0 : i32
    return %c0_i32, %c0_i32_0 : i32, i32
  }
  func.func @transform_9(%arg0: i32, %arg1: i32) -> (i32, i32, i32) {
    %c0_i32 = arith.constant 0 : i32
    %c0_i32_0 = arith.constant 0 : i32
    return %arg0, %arg1, %c0_i32 : i32, i32, i32
  }
}

</mosaic_0001>

<bundles_post_ra>
// kernel: bottleneck_forward.1
= control target key start
LH: loop header
LB: loop body
LE: loop exit
PB: predicated region body
PF: predicated region fallthrough
CT: control target
= control target key end

     0   :  { %s4149_s30 = smov 0   ;;  %s4151_s10 = smov 0   ;;  %s5350_s0 = inlined_call_operand.vmem [shape: f32[2,342,4], index: 0, kind: input, shape index: {}]   ;;  %s5351_s1 = inlined_call_operand.vmem [shape: f32[342,1], index: 1, kind: input, shape index: {}]   ;;  %s5352_s2 = inlined_call_operand.vmem [shape: bf16[4,4], index: 2, kind: input, shape index: {}]   ;;  %s5353_s3 = inlined_call_operand.vmem [shape: f32[1,4], index: 3, kind: input, shape index: {}]   ;;  %s5354_s4 = inlined_call_operand.vmem [shape: bf16[9,4,4], index: 4, kind: input, shape index: {}]   ;;  %s5355_s5 = inlined_call_operand.vmem [shape: f32[1,4], index: 5, kind: input, shape index: {}]   ;;  %s5356_s6 = inlined_call_operand.vmem [shape: bf16[4,8], index: 6, kind: input, shape index: {}]   ;;  %s5357_s7 = inlined_call_operand.vmem [shape: bf16[4,8], index: 7, kind: input, shape index: {}]   ;;  %s5358_s8 = inlined_call_operand.vmem [shape: f32[1,8], index: 8, kind: input, shape index: {}]   ;;  %s5359_s9 = inlined_call_operand.vmem [shape: f32[2,288,8], index: 9, kind: output, shape index: {}]  }
   0x1   :  { %s4153_s11 = smov 0   ;;  %s4155_s12 = smov 0  }
   0x2   :  { %s4157_s13 = smov 0  }
   0x3 LB: > { %s28_s14 = sadd.s32 1, %s4086_s11  ;;  %s31_s15 = sadd.s32 1, %s4090_s12  ;;  %s4094_s13 = sphi %s4157_s13, %s19_s13   ;;  %s4090_s12 = sphi %s4155_s12, %s5363_s12   ;;  %s4086_s11 = sphi %s4153_s11, %s5362_s11   ;;  %s4082_s10 = sphi %s4151_s10, %s5361_s10   ;;  %s4078_s30 = sphi %s4149_s30, %s5360_s30  }
   0x4   : > { %p29_p0 = scmp.ge.s32.totalorder %s28_s14, 2  ;;  %p3265_p1 = scmp.ge.s32.totalorder %s4094_s13, 1 }
   0x5   : > { %p301_p2 = scmp.lt.s32.totalorder %s4094_s13, 5 }
   0x6   : > { %s5365_s14 = smov (%p29_p0, %s28_s14), 0  ;;  %s5367_s15 = smov (!%p29_p0, %s31_s15), %s4090_s12 }
   0x7   : > { %p302_p3 = pnand %p3265_p1, %p301_p2  ;;  %p33_p4 = scmp.ge.s32.totalorder %s5367_s15, 2 }
   0x8   : > { %p341_p5 = scmp.lt.s32.totalorder (!%p302_p3), %s4082_s10, 1  ;;  %s357_s18 = smul.u32 (!%p302_p3), 144, %s4078_s30 }
   0x9   : > { %s5369_s15 = smov (%p33_p4, %s5367_s15), 0  ;;  %305 = sbr.rel (%p302_p3) target bundleno = 1014 (0x3f6), region = 56 }
   0xa   : > { %s4197_s21 = scalar_lea.vmem (!%p302_p3), %s5351_s1, %s357_s18 }
   0xe   : > { %v397_v0 = vld [vmem:[%s5352_s2] sm:$0x3]  ;;  %vm445_vm0 = vcmask 1041408   ;;  %v4096_v1 = vmov 0.0   ;;  %s5371_s10 = smov (!%p341_p5, %s4082_s10), 1  ;;  %vm4097_vm1 = vmmov 0  }
   0xf   : > { %3535 = vmatprep.subr.bf16.mxu0 %v4096_v1  ;;  %4007 = vmatprep.subr.bf16.mxu1 %v4096_v1  ;;  %v447_v2 = vsel %vm445_vm0, %v397_v0, 0  ;;  %s4009_s22 = smul.u32 344, %s5371_s10  ;;  %v4098_v3 = vmov 0   ;;  %v611_v4 = vld [vmem:[%s4197_s21] sm:$0xff]  ;;  %v613_v5 = vld [vmem:[%s4197_s21 + $0x10] sm:$0xff]  ;;  %v612_v6 = vld [vmem:[%s4197_s21 + $0x8] sm:$0xff] }
  0x10   : > { %3536 = vmatpush3.bf16.msra.mxu0 %v447_v2  ;;  %4008 = vmatpush3.bf16.msra.mxu1 %v447_v2  ;;  %v614_v7 = vld [vmem:[%s4197_s21 + $0x18] sm:$0xff]  ;;  %vm405_vm2 = vcmask 31744   ;;  %v615_v14 = vld [vmem:[%s4197_s21 + $0x20] sm:$0xff]  ;;  %v616_v15 = vld [vmem:[%s4197_s21 + $0x28] sm:$0xff]  ;;  %s4010_s27 = smul.u32 36, %s5371_s10  ;;  %vm3151_vm3 = vcmask 64512  }
  0x11   : > { %3537 = vmatprep.mubr.msk.bf16.mxu0 %vm4097_vm1, %v4096_v1  ;;  %3581 = vmatprep.mubr.msk.bf16.mxu1 %vm4097_vm1, %v4096_v1  ;;  %s345_s25 = scalar_lea.vmem %s5350_s0, %s4009_s22  ;;  %v617_v19 = vld [vmem:[%s4197_s21 + $0x30] sm:$0xff]  ;;  %v618_v21 = vld [vmem:[%s4197_s21 + $0x38] sm:$0xff]  ;;  %v619_v23 = vld [vmem:[%s4197_s21 + $0x40] sm:$0xff] }
  0x12   : > { %4054 = vset.pattern.permute.xlu0 %v4098_v3  ;;  %4055 = vset.pattern.permute.xlu1 %v4098_v3  ;;  %s4208_s26 = scalar_lea.vmem %s345_s25, %s357_s18  ;;  %v620_v24 = vld [vmem:[%s4197_s21 + $0x48] sm:$0xff]  ;;  %v621_v27 = vld [vmem:[%s4197_s21 + $0x50] sm:$0xff]  ;;  %v622_v29 = vld [vmem:[%s4197_s21 + $0x58] sm:$0xff]  ;;  %s346_s25 = smul.u32 18, %s4078_s30 }
  0x13   : > { %638 = vperm.xlu0 %4054, %v611_v4   ;;  %3589 = vmatprep.subr.bf16.mxu1 %v4096_v1  ;;  %v359_v8 = vld [vmem:[%s4208_s26] sm:$0xff]  ;;  %v360_v9 = vld [vmem:[%s4208_s26 + $0x8] sm:$0xff]  ;;  %v381_v10 = vld [vmem:[%s4208_s26 + $0xb0] sm:$0xff] }
  0x14   : > { %648 = vperm.xlu1 %4055, %v613_v5   ;;  %3665 = vmatprep.subr.bf16.mxu0 %v4096_v1  ;;  %v384_v11 = vpack.c.bf16 %v360_v9, %v359_v8  ;;  %v382_v12 = vld [vmem:[%s4208_s26 + $0xb8] sm:$0xff]  ;;  %v361_v16 = vld [vmem:[%s4208_s26 + $0x10] sm:$0xff]  ;;  %v383_v18 = vld [vmem:[%s4208_s26 + $0xc0] sm:$0x3f]  ;;  %p349_p6 = scmp.lt.s32.totalorder %s346_s25, 35 }
  0x15   : > { %v395_v13 = vpack.c.bf16 %v382_v12, %v381_v10  ;;  %v362_v17 = vld [vmem:[%s4208_s26 + $0x18] sm:$0xff]  ;;  %v396_v22 = vpack.c.bf16 %v383_v18, %v383_v18  ;;  %v363_v25 = vld [vmem:[%s4208_s26 + $0x20] sm:$0xff]  ;;  %v364_v26 = vld [vmem:[%s4208_s26 + $0x28] sm:$0xff] }
  0x16   : > { %3538 = vmatmul.mubr.msk.bf16.vlgmr.msra.gmra.mxu0 %vm405_vm2, %v384_v11  ;;  %v385_v20 = vpack.c.bf16 %v362_v17, %v361_v16  ;;  %v386_v28 = vpack.c.bf16 %v364_v26, %v363_v25  ;;  %v623_v30 = vld [vmem:[%s4197_s21 + $0x60] sm:$0xff]  ;;  %v624_v31 = vld [vmem:[%s4197_s21 + $0x68] sm:$0xff]  ;;  %v365_v32 = vld [vmem:[%s4208_s26 + $0x30] sm:$0xff]  ;;  %s5373_s25 = smov (!%p349_p6, %s346_s25), 35 }
  0x17   : > { %643 = vperm.xlu0 %4054, %v612_v6   ;;  %3582 = vmatmul.mubr.msk.bf16.vlgmr.msra.gmra.mxu1 %vm405_vm2, %v395_v13  ;;  %v366_v33 = vld [vmem:[%s4208_s26 + $0x38] sm:$0xff]  ;;  %v625_v34 = vld [vmem:[%s4197_s21 + $0x70] sm:$0xff]  ;;  %v627_v37 = vld [vmem:[%s4197_s21 + $0x80] sm:$0xff]  ;;  %s352_s28 = sadd.s32 %s4010_s27, %s5373_s25 }
  0x18   : > { %653 = vperm.xlu1 %4055, %v614_v7   ;;  %3541 = vmatprep.mubr.msk.bf16.mxu0 %vm4097_vm1, %v4096_v1  ;;  %v387_v35 = vpack.c.bf16 %v366_v33, %v365_v32  ;;  %v626_v36 = vld [vmem:[%s4197_s21 + $0x78] sm:$0xff]  ;;  %v628_v38 = vld [vmem:[%s4197_s21 + $0x88] sm:$0xff]  ;;  %v367_v39 = vld [vmem:[%s4208_s26 + $0x40] sm:$0xff]  ;;  %s3267_s17 = sshll.u32 %s352_s28, 3 }
  0x19   : > { %3585 = vmatprep.mubr.msk.bf16.mxu1 %vm4097_vm1, %v4096_v1  ;;  %v368_v40 = vld [vmem:[%s4208_s26 + $0x48] sm:$0xff]  ;;  %v629_v41 = vld [vmem:[%s4197_s21 + $0x90] sm:$0xff]  ;;  %v630_v43 = vld [vmem:[%s4197_s21 + $0x98] sm:$0xff]  ;;  %s5267_s20 = scalar_lea.vmem %s5359_s9, %s3267_s17 }
  0x1a   : > { %v388_v42 = vpack.c.bf16 %v368_v40, %v367_v39  ;;  %v631_v44 = vld [vmem:[%s4197_s21 + $0xa0] sm:$0xff]  ;;  %v632_v45 = vld [vmem:[%s4197_s21 + $0xa8] sm:$0xff]  ;;  %v369_v46 = vld [vmem:[%s4208_s26 + $0x50] sm:$0xff] }
  0x1b   : > { %658 = vperm.xlu0 %4054, %v615_v14   ;;  %v370_v47 = vld [vmem:[%s4208_s26 + $0x58] sm:$0xff]  ;;  %v633_v48 = vld [vmem:[%s4197_s21 + $0xb0] sm:$0xff]  ;;  %v635_v51 = vld [vmem:[%s4197_s21 + $0xc0] sm:$0x3f] }
  0x1c   : > { %663 = vperm.xlu1 %4055, %v616_v15   ;;  %v389_v49 = vpack.c.bf16 %v370_v47, %v369_v46  ;;  %v634_v50 = vld [vmem:[%s4197_s21 + $0xb8] sm:$0xff]  ;;  %v371_v52 = vld [vmem:[%s4208_s26 + $0x60] sm:$0xff]  ;;  %v372_v53 = vld [vmem:[%s4208_s26 + $0x68] sm:$0xff] }
  0x1d   : > { %v390_v54 = vpack.c.bf16 %v372_v53, %v371_v52  ;;  %v373_v55 = vld [vmem:[%s4208_s26 + $0x70] sm:$0xff]  ;;  %v374_v56 = vld [vmem:[%s4208_s26 + $0x78] sm:$0xff]  ;;  %v375_v58 = vld [vmem:[%s4208_s26 + $0x80] sm:$0xff] }
  0x1e   : > { %3542 = vmatmul.mubr.msk.bf16.gmra.mxu0 %vm405_vm2, %v385_v20  ;;  %v391_v57 = vpack.c.bf16 %v374_v56, %v373_v55  ;;  %v376_v59 = vld [vmem:[%s4208_s26 + $0x88] sm:$0xff]  ;;  %v377_v61 = vld [vmem:[%s4208_s26 + $0x90] sm:$0xff]  ;;  %v378_v62 = vld [vmem:[%s4208_s26 + $0x98] sm:$0xff] }
  0x1f   : > { %668 = vperm.xlu0 %4054, %v617_v19   ;;  %3586 = vmatmul.mubr.msk.bf16.gmra.mxu1 %vm405_vm2, %v396_v22  ;;  %v392_v60 = vpack.c.bf16 %v376_v59, %v375_v58  ;;  %v393_v63 = vpack.c.bf16 %v378_v62, %v377_v61  ;;  %v379_v0 = vld [vmem:[%s4208_s26 + $0xa0] sm:$0xff]  ;;  %v380_v2 = vld [vmem:[%s4208_s26 + $0xa8] sm:$0xff] }
  0x20   : > { %673 = vperm.xlu1 %4055, %v618_v21   ;;  %3545 = vmatprep.mubr.msk.bf16.mxu0 %vm4097_vm1, %v4096_v1  ;;  %v839_v3 = vld [vmem:[%s5354_s4] sm:$0x3]  ;;  %v394_v4 = vpack.c.bf16 %v380_v2, %v379_v0  ;;  %v3301_v6 = vld [vmem:[%s5354_s4 + $0x4] sm:$0x3]  ;;  %v3291_v2 = vld [vmem:[%s5354_s4 + $0x2] sm:$0x3] }
  0x21   : > { %3591 = vmatprep.mubr.msk.bf16.mxu1 %vm4097_vm1, %v4096_v1  ;;  %v868_v5 = vsel %vm445_vm0, %v839_v3, 0  ;;  %v1286_v7 = vsel %vm445_vm0, %v3301_v6, 0 }
  0x22   : > { %3590 = vmatpush3.bf16.msra.mxu1 %v868_v5  ;;  %3666 = vmatpush3.bf16.msra.mxu0 %v1286_v7 }
  0x23   : > { %678 = vperm.xlu0 %4054, %v619_v23   ;;  %3627 = vmatprep.subr.bf16.mxu1 %v4096_v1 }
  0x24   : > { %683 = vperm.xlu1 %4055, %v620_v24   ;;  %3741 = vmatprep.subr.bf16.mxu0 %v4096_v1 }
  0x26   : > { %3546 = vmatmul.mubr.msk.bf16.gmra.mxu0 %vm405_vm2, %v386_v28  ;;  %v4341_v28 = vld [vmem:[%s5353_s3] ss:$0 sm:$0xff] }
  0x27   : > { %688 = vperm.xlu0 %4054, %v621_v27   ;;  %3549 = vmatprep.mubr.msk.bf16.mxu0 %vm4097_vm1, %v4096_v1 }
  0x28   : > { %693 = vperm.xlu1 %4055, %v622_v29  }
  0x2b   : > { %698 = vperm.xlu0 %4054, %v623_v30  }
  0x2c   : > { %703 = vperm.xlu1 %4055, %v624_v31  }
  0x2e   : > { %3550 = vmatmul.mubr.msk.bf16.gmra.mxu0 %vm405_vm2, %v387_v35 }
  0x2f   : > { %708 = vperm.xlu0 %4054, %v625_v34   ;;  %3553 = vmatprep.mubr.msk.bf16.mxu0 %vm4097_vm1, %v4096_v1 }
  0x30   : > { %713 = vperm.xlu1 %4055, %v626_v36  }
  0x33   : > { %718 = vperm.xlu0 %4054, %v627_v37  }
  0x34   : > { %723 = vperm.xlu1 %4055, %v628_v38  }
  0x36   : > { %3554 = vmatmul.mubr.msk.bf16.gmra.mxu0 %vm405_vm2, %v388_v42 }
  0x37   : > { %728 = vperm.xlu0 %4054, %v629_v41   ;;  %3557 = vmatprep.mubr.msk.bf16.mxu0 %vm4097_vm1, %v4096_v1 }
  0x38   : > { %733 = vperm.xlu1 %4055, %v630_v43  }
  0x3b   : > { %738 = vperm.xlu0 %4054, %v631_v44  }
  0x3c   : > { %743 = vperm.xlu1 %4055, %v632_v45  }
  0x3e   : > { %3558 = vmatmul.mubr.msk.bf16.gmra.mxu0 %vm405_vm2, %v389_v49 }
  0x3f   : > { %748 = vperm.xlu0 %4054, %v633_v48   ;;  %3561 = vmatprep.mubr.msk.bf16.mxu0 %vm4097_vm1, %v4096_v1 }
  0x40   : > { %753 = vperm.xlu1 %4055, %v634_v50  }
  0x43   : > { %758 = vperm.xlu0 %4054, %v635_v51  }
  0x46   : > { %3562 = vmatmul.mubr.msk.bf16.gmra.mxu0 %vm405_vm2, %v390_v54 }
  0x47   : > { %3565 = vmatprep.mubr.msk.bf16.mxu0 %vm4097_vm1, %v4096_v1 }
  0x4e   : > { %3566 = vmatmul.mubr.msk.bf16.gmra.mxu0 %vm405_vm2, %v391_v57 }
  0x4f   : > { %3569 = vmatprep.mubr.msk.bf16.mxu0 %vm4097_vm1, %v4096_v1 }
  0x56   : > { %3570 = vmatmul.mubr.msk.bf16.gmra.mxu0 %vm405_vm2, %v392_v60 }
  0x57   : > { %3573 = vmatprep.mubr.msk.bf16.mxu0 %vm4097_vm1, %v4096_v1 }
  0x5e   : > { %3574 = vmatmul.mubr.msk.bf16.gmra.mxu0 %vm405_vm2, %v393_v63 }
  0x5f   : > { %3577 = vmatprep.mubr.msk.bf16.mxu0 %vm4097_vm1, %v4096_v1 }
  0x66   : > { %3578 = vmatmul.mubr.msk.bf16.gmra.mxu0 %vm405_vm2, %v394_v4 }
  0x67   : > { %3667 = vmatprep.mubr.msk.bf16.mxu0 %vm4097_vm1, %v4096_v1 }
  0x8e   : > { %v639_v8 = vpop.permute.xlu0 %638 }
  0x8f   : > { %v649_v9 = vpop.permute.xlu1 %648 }
  0x92   : > { %v644_v10 = vpop.permute.xlu0 %643 }
  0x93   : > { %v654_v11 = vpop.permute.xlu1 %653 }
  0x96   : > { %v4306_v12 = vpop.permute.xlu0 %658 }
  0x97   : > { %v4308_v13 = vpop.permute.xlu1 %663 }
  0x9a   : > { %v4310_v14 = vpop.permute.xlu0 %668 }
  0x9b   : > { %v4312_v15 = vpop.permute.xlu1 %673 }
  0x9e   : > { %v4314_v16 = vpop.permute.xlu0 %678 }
  0x9f   : > { %v4316_v17 = vpop.permute.xlu1 %683 }
  0xa2   : > { %v4318_v18 = vpop.permute.xlu0 %688 }
  0xa3   : > { %v4320_v19 = vpop.permute.xlu1 %693 }
  0xa6   : > { %v4322_v20 = vpop.permute.xlu0 %698 }
  0xa7   : > { %v4324_v21 = vpop.permute.xlu1 %703 }
  0xaa   : > { %v4326_v22 = vpop.permute.xlu0 %708 }
  0xab   : > { %v4328_v23 = vpop.permute.xlu1 %713 }
  0xae   : > { %v4330_v24 = vpop.permute.xlu0 %718 }
  0xaf   : > { %v4332_v25 = vpop.permute.xlu1 %723 }
  0xb2   : > { %v4334_v26 = vpop.permute.xlu0 %728 }
  0xb3   : > { %v4336_v27 = vpop.permute.xlu1 %733 }
  0xb6   : > { %v4343_v29 = vpop.permute.xlu0 %738 }
  0xb7   : > { %v4346_v33 = vpop.permute.xlu1 %743 }
  0xba   : > { %v749_v40 = vpop.permute.xlu0 %748 }
  0xbb   : > { %v754_v48 = vpop.permute.xlu1 %753 }
  0xbe   : > { %v759_v57 = vpop.permute.xlu0 %758 }
  0xd6   : > { %v483_v30 = vpop.f32.mrf.mxu0 }
  0xd7   : > { %v484_v31 = vadd.f32 %v4341_v28, %v483_v30  ;;  %v571_v32 = vpop.f32.mrf.mxu1 }
  0xd8   : > { %v572_v34 = vadd.f32 %v4341_v28, %v571_v32  ;;  %v3539_v35 = vpop.f32.mrf.mxu0 }
  0xd9   : > { %v585_v36 = vmax.f32 %v484_v31, 0.0  ;;  %v3583_v37 = vpop.f32.mrf.mxu1  ;;  %v3321_v31 = vld [vmem:[%s5354_s4 + $0x8] sm:$0x3] }
  0xda   : > { %v607_v38 = vmax.f32 %v572_v34, 0.0  ;;  %v486_v39 = vpop.f32.mrf.mxu0 }
  0xdb   : > { %v761_v41 = vmul.f32 %v639_v8, %v585_v36  ;;  %v487_v42 = vadd.f32 %v4341_v28, %v486_v39  ;;  %v574_v43 = vpop.f32.mrf.mxu1  ;;  %v1722_v39 = vsel %vm445_vm0, %v3321_v31, 0 }
  0xdc   : > { %v783_v44 = vmul.f32 %v749_v40, %v607_v38  ;;  %v3540_v45 = vpop.f32.mrf.mxu0 }
  0xdd   : > { %786 = vst.msk [vmem:[#allocation2] sm:$0xff] %vm405_vm2, %v761_v41  ;;  %v586_v46 = vmax.f32 %v487_v42, 0.0  ;;  %v3584_v47 = vpop.f32.mrf.mxu1 }
  0xde   : > { %808 = vst.msk [vmem:[#allocation2 + $0xb0] sm:$0xff] %vm405_vm2, %v783_v44  ;;  %v491_v49 = vpop.f32.mrf.mxu0 }
  0xdf   : > { %v762_v50 = vmul.f32 %v644_v10, %v586_v46  ;;  %v492_v51 = vadd.f32 %v4341_v28, %v491_v49  ;;  %v579_v52 = vpop.f32.mrf.mxu1  ;;  %v1068_v10 = vsel %vm445_vm0, %v3291_v2, 0 }
  0xe0   : > { %v3543_v53 = vpop.f32.mrf.mxu0 }
  0xe1   : > { %787 = vst.msk [vmem:[#allocation2 + $0x8] sm:$0xff] %vm405_vm2, %v762_v50  ;;  %v587_v54 = vmax.f32 %v492_v51, 0.0  ;;  %v3587_v55 = vpop.f32.mrf.mxu1 }
  0xe2   : > { %v494_v56 = vpop.f32.mrf.mxu0 }
  0xe3   : > { %v763_v58 = vmul.f32 %v649_v9, %v587_v54  ;;  %v495_v59 = vadd.f32 %v4341_v28, %v494_v56  ;;  %v582_v60 = vpop.f32.mrf.mxu1 }
  0xe4   : > { %v3544_v61 = vpop.f32.mrf.mxu0  ;;  %v812_v6 = vld [vmem:[#allocation2] sm:$0xff] }
  0xe5   : > { %788 = vst.msk [vmem:[#allocation2 + $0x10] sm:$0xff] %vm405_vm2, %v763_v58  ;;  %v588_v62 = vmax.f32 %v495_v59, 0.0  ;;  %v3588_v63 = vpop.f32.mrf.mxu1 }
  0xe6   : > { %v499_v0 = vpop.f32.mrf.mxu0 }
  0xe7   : > { %v764_v3 = vmul.f32 %v654_v11, %v588_v62  ;;  %v500_v4 = vadd.f32 %v4341_v28, %v499_v0 }
  0xe8   : > { %v3547_v5 = vpop.f32.mrf.mxu0  ;;  %v813_v7 = vld [vmem:[#allocation2 + $0x8] sm:$0xff] }
  0xe9   : > { %789 = vst.msk [vmem:[#allocation2 + $0x18] sm:$0xff] %vm405_vm2, %v764_v3  ;;  %v589_v8 = vmax.f32 %v500_v4, 0.0  ;;  %v830_v9 = vpack.c.bf16 %v813_v7, %v812_v6  ;;  %v1229_v35 = vld [vmem:[#allocation2 + $0x2] sm:$0xff] }
  0xea   : > { %v502_v30 = vpop.f32.mrf.mxu0 }
  0xeb   : > { %v765_v32 = vmul.f32 %v4306_v12, %v589_v8  ;;  %v503_v11 = vadd.f32 %v4341_v28, %v502_v30  ;;  %3592 = vmatmul.mubr.msk.bf16.vlgmr.msra.gmra.mxu1 %vm405_vm2, %v830_v9 }
  0xec   : > { %3628 = vmatpush3.bf16.msra.mxu1 %v1068_v10  ;;  %v3548_v34 = vpop.f32.mrf.mxu0  ;;  %v1230_v36 = vld [vmem:[#allocation2 + $0xa] sm:$0xff]  ;;  %3595 = vmatprep.mubr.msk.bf16.mxu1 %vm4097_vm1, %v4096_v1 }
  0xed   : > { %790 = vst.msk [vmem:[#allocation2 + $0x20] sm:$0xff] %vm405_vm2, %v765_v32  ;;  %v590_v37 = vmax.f32 %v503_v11, 0.0  ;;  %v1247_v38 = vpack.c.bf16 %v1230_v36, %v1229_v35  ;;  %3703 = vmatprep.subr.bf16.mxu1 %v4096_v1  ;;  %v814_v43 = vld [vmem:[#allocation2 + $0x10] sm:$0xff] }
  0xee   : > { %v507_v12 = vpop.f32.mrf.mxu0 }
  0xef   : > { %v766_v40 = vmul.f32 %v4308_v13, %v590_v37  ;;  %v508_v41 = vadd.f32 %v4341_v28, %v507_v12  ;;  %3668 = vmatmul.mubr.msk.bf16.vlgmr.msra.gmra.mxu0 %vm405_vm2, %v1247_v38 }
  0xf0   : > { %v3551_v42 = vpop.f32.mrf.mxu0  ;;  %v815_v44 = vld [vmem:[#allocation2 + $0x18] sm:$0xff]  ;;  %3671 = vmatprep.mubr.msk.bf16.mxu0 %vm4097_vm1, %v4096_v1  ;;  %3742 = vmatpush3.bf16.msra.mxu0 %v1722_v39 }
  0xf1   : > { %791 = vst.msk [vmem:[#allocation2 + $0x28] sm:$0xff] %vm405_vm2, %v766_v40  ;;  %v591_v45 = vmax.f32 %v508_v41, 0.0  ;;  %v831_v46 = vpack.c.bf16 %v815_v44, %v814_v43  ;;  %3817 = vmatprep.subr.bf16.mxu0 %v4096_v1  ;;  %v1231_v50 = vld [vmem:[#allocation2 + $0x12] sm:$0xff] }
  0xf2   : > { %v510_v47 = vpop.f32.mrf.mxu0 }
  0xf3   : > { %v767_v13 = vmul.f32 %v4310_v14, %v591_v45  ;;  %v511_v48 = vadd.f32 %v4341_v28, %v510_v47  ;;  %3596 = vmatmul.mubr.msk.bf16.gmra.mxu1 %vm405_vm2, %v831_v46 }
  0xf4   : > { %v3552_v49 = vpop.f32.mrf.mxu0  ;;  %v1232_v51 = vld [vmem:[#allocation2 + $0x1a] sm:$0xff]  ;;  %3599 = vmatprep.mubr.msk.bf16.mxu1 %vm4097_vm1, %v4096_v1 }
  0xf5   : > { %792 = vst.msk [vmem:[#allocation2 + $0x30] sm:$0xff] %vm405_vm2, %v767_v13  ;;  %v592_v52 = vmax.f32 %v511_v48, 0.0  ;;  %v4386_v53 = vpack.c.bf16 %v1232_v51, %v1231_v50  ;;  %v816_v57 = vld [vmem:[#allocation2 + $0x20] sm:$0xff] }
  0xf6   : > { %v515_v54 = vpop.f32.mrf.mxu0 }
  0xf7   : > { %v768_v55 = vmul.f32 %v4312_v15, %v592_v52  ;;  %v516_v14 = vadd.f32 %v4341_v28, %v515_v54  ;;  %3672 = vmatmul.mubr.msk.bf16.gmra.mxu0 %vm405_vm2, %v4386_v53 }
  0xf8   : > { %v3555_v56 = vpop.f32.mrf.mxu0  ;;  %v817_v58 = vld [vmem:[#allocation2 + $0x28] sm:$0xff]  ;;  %3675 = vmatprep.mubr.msk.bf16.mxu0 %vm4097_vm1, %v4096_v1 }
  0xf9   : > { %793 = vst.msk [vmem:[#allocation2 + $0x38] sm:$0xff] %vm405_vm2, %v768_v55  ;;  %v593_v59 = vmax.f32 %v516_v14, 0.0  ;;  %v832_v60 = vpack.c.bf16 %v817_v58, %v816_v57  ;;  %v1233_v0 = vld [vmem:[#allocation2 + $0x22] sm:$0xff] }
  0xfa   : > { %v518_v61 = vpop.f32.mrf.mxu0 }
  0xfb   : > { %v769_v62 = vmul.f32 %v4314_v16, %v593_v59  ;;  %v519_v15 = vadd.f32 %v4341_v28, %v518_v61  ;;  %3600 = vmatmul.mubr.msk.bf16.gmra.mxu1 %vm405_vm2, %v832_v60 }
  0xfc   : > { %v3556_v63 = vpop.f32.mrf.mxu0  ;;  %v1234_v2 = vld [vmem:[#allocation2 + $0x2a] sm:$0xff]  ;;  %3603 = vmatprep.mubr.msk.bf16.mxu1 %vm4097_vm1, %v4096_v1 }
  0xfd   : > { %794 = vst.msk [vmem:[#allocation2 + $0x40] sm:$0xff] %vm405_vm2, %v769_v62  ;;  %v594_v3 = vmax.f32 %v519_v15, 0.0  ;;  %v4401_v4 = vpack.c.bf16 %v1234_v2, %v1233_v0  ;;  %v818_v8 = vld [vmem:[#allocation2 + $0x30] sm:$0xff] }
  0xfe   : > { %v523_v5 = vpop.f32.mrf.mxu0 }
  0xff   : > { %v770_v6 = vmul.f32 %v4316_v17, %v594_v3  ;;  %v524_v16 = vadd.f32 %v4341_v28, %v523_v5  ;;  %3676 = vmatmul.mubr.msk.bf16.gmra.mxu0 %vm405_vm2, %v4401_v4 }
 0x100   : > { %v3559_v7 = vpop.f32.mrf.mxu0  ;;  %v819_v9 = vld [vmem:[#allocation2 + $0x38] sm:$0xff]  ;;  %3679 = vmatprep.mubr.msk.bf16.mxu0 %vm4097_vm1, %v4096_v1 }
 0x101   : > { %795 = vst.msk [vmem:[#allocation2 + $0x48] sm:$0xff] %vm405_vm2, %v770_v6  ;;  %v595_v10 = vmax.f32 %v524_v16, 0.0  ;;  %v833_v30 = vpack.c.bf16 %v819_v9, %v818_v8  ;;  %v1235_v34 = vld [vmem:[#allocation2 + $0x32] sm:$0xff] }
 0x102   : > { %v526_v31 = vpop.f32.mrf.mxu0 }
 0x103   : > { %v771_v32 = vmul.f32 %v4318_v18, %v595_v10  ;;  %v527_v17 = vadd.f32 %v4341_v28, %v526_v31  ;;  %3604 = vmatmul.mubr.msk.bf16.gmra.mxu1 %vm405_vm2, %v833_v30 }
 0x104   : > { %v3560_v11 = vpop.f32.mrf.mxu0  ;;  %v1236_v35 = vld [vmem:[#allocation2 + $0x3a] sm:$0xff]  ;;  %3607 = vmatprep.mubr.msk.bf16.mxu1 %vm4097_vm1, %v4096_v1 }
 0x105   : > { %796 = vst.msk [vmem:[#allocation2 + $0x50] sm:$0xff] %vm405_vm2, %v771_v32  ;;  %v596_v36 = vmax.f32 %v527_v17, 0.0  ;;  %v4416_v37 = vpack.c.bf16 %v1236_v35, %v1235_v34  ;;  %v820_v40 = vld [vmem:[#allocation2 + $0x40] sm:$0xff] }
 0x106   : > { %v531_v38 = vpop.f32.mrf.mxu0 }
 0x107   : > { %v772_v39 = vmul.f32 %v4320_v19, %v596_v36  ;;  %v532_v18 = vadd.f32 %v4341_v28, %v531_v38  ;;  %3680 = vmatmul.mubr.msk.bf16.gmra.mxu0 %vm405_vm2, %v4416_v37 }
 0x108   : > { %v3563_v12 = vpop.f32.mrf.mxu0  ;;  %v821_v41 = vld [vmem:[#allocation2 + $0x48] sm:$0xff]  ;;  %3683 = vmatprep.mubr.msk.bf16.mxu0 %vm4097_vm1, %v4096_v1 }
 0x109   : > { %797 = vst.msk [vmem:[#allocation2 + $0x58] sm:$0xff] %vm405_vm2, %v772_v39  ;;  %v597_v42 = vmax.f32 %v532_v18, 0.0  ;;  %v834_v43 = vpack.c.bf16 %v821_v41, %v820_v40  ;;  %v1237_v47 = vld [vmem:[#allocation2 + $0x42] sm:$0xff] }
 0x10a   : > { %v534_v44 = vpop.f32.mrf.mxu0 }
 0x10b   : > { %v773_v45 = vmul.f32 %v4322_v20, %v597_v42  ;;  %v535_v19 = vadd.f32 %v4341_v28, %v534_v44  ;;  %3608 = vmatmul.mubr.msk.bf16.gmra.mxu1 %vm405_vm2, %v834_v43 }
 0x10c   : > { %v3564_v46 = vpop.f32.mrf.mxu0  ;;  %v1238_v13 = vld [vmem:[#allocation2 + $0x4a] sm:$0xff]  ;;  %3611 = vmatprep.mubr.msk.bf16.mxu1 %vm4097_vm1, %v4096_v1 }
 0x10d   : > { %798 = vst.msk [vmem:[#allocation2 + $0x60] sm:$0xff] %vm405_vm2, %v773_v45  ;;  %v598_v48 = vmax.f32 %v535_v19, 0.0  ;;  %v4431_v49 = vpack.c.bf16 %v1238_v13, %v1237_v47  ;;  %v822_v54 = vld [vmem:[#allocation2 + $0x50] sm:$0xff] }
 0x10e   : > { %v539_v50 = vpop.f32.mrf.mxu0 }
 0x10f   : > { %v774_v51 = vmul.f32 %v4324_v21, %v598_v48  ;;  %v540_v20 = vadd.f32 %v4341_v28, %v539_v50  ;;  %3684 = vmatmul.mubr.msk.bf16.gmra.mxu0 %vm405_vm2, %v4431_v49 }
 0x110   : > { %v3567_v52 = vpop.f32.mrf.mxu0  ;;  %v823_v55 = vld [vmem:[#allocation2 + $0x58] sm:$0xff]  ;;  %3687 = vmatprep.mubr.msk.bf16.mxu0 %vm4097_vm1, %v4096_v1 }
 0x111   : > { %799 = vst.msk [vmem:[#allocation2 + $0x68] sm:$0xff] %vm405_vm2, %v774_v51  ;;  %v599_v14 = vmax.f32 %v540_v20, 0.0  ;;  %v835_v56 = vpack.c.bf16 %v823_v55, %v822_v54  ;;  %v1239_v60 = vld [vmem:[#allocation2 + $0x52] sm:$0xff] }
 0x112   : > { %v542_v57 = vpop.f32.mrf.mxu0 }
 0x113   : > { %v775_v58 = vmul.f32 %v4326_v22, %v599_v14  ;;  %v543_v21 = vadd.f32 %v4341_v28, %v542_v57  ;;  %3612 = vmatmul.mubr.msk.bf16.gmra.mxu1 %vm405_vm2, %v835_v56  ;;  %v1012_v57 = vld [vmem:[#allocation2 + $0x9] sm:$0xff] }
 0x114   : > { %v3568_v59 = vpop.f32.mrf.mxu0  ;;  %v1240_v61 = vld [vmem:[#allocation2 + $0x5a] sm:$0xff]  ;;  %3615 = vmatprep.mubr.msk.bf16.mxu1 %vm4097_vm1, %v4096_v1 }
 0x115   : > { %800 = vst.msk [vmem:[#allocation2 + $0x70] sm:$0xff] %vm405_vm2, %v775_v58  ;;  %v600_v62 = vmax.f32 %v543_v21, 0.0  ;;  %v4446_v15 = vpack.c.bf16 %v1240_v61, %v1239_v60  ;;  %v824_v3 = vld [vmem:[#allocation2 + $0x60] sm:$0xff]  ;;  %v3341_v61 = vld [vmem:[%s5354_s4 + $0xc] sm:$0x3] }
 0x116   : > { %v547_v63 = vpop.f32.mrf.mxu0  ;;  %v1011_v58 = vld [vmem:[#allocation2 + $0x1] sm:$0xff] }
 0x117   : > { %v776_v0 = vmul.f32 %v4328_v23, %v600_v62  ;;  %v548_v22 = vadd.f32 %v4341_v28, %v547_v63  ;;  %3688 = vmatmul.mubr.msk.bf16.gmra.mxu0 %vm405_vm2, %v4446_v15  ;;  %v1029_v21 = vpack.c.bf16 %v1012_v57, %v1011_v58  ;;  %v1666_v60 = vld [vmem:[#allocation2 + $0x1b] sm:$0xff]  ;;  %v2158_v63 = vsel %vm445_vm0, %v3341_v61, 0  ;;  %v3361_v61 = vld [vmem:[%s5354_s4 + $0x10] sm:$0x3] }
 0x118   : > { %v3571_v2 = vpop.f32.mrf.mxu0  ;;  %v825_v5 = vld [vmem:[#allocation2 + $0x68] sm:$0xff]  ;;  %3691 = vmatprep.mubr.msk.bf16.mxu0 %vm4097_vm1, %v4096_v1 }
 0x119   : > { %801 = vst.msk [vmem:[#allocation2 + $0x78] sm:$0xff] %vm405_vm2, %v776_v0  ;;  %v601_v6 = vmax.f32 %v548_v22, 0.0  ;;  %v836_v16 = vpack.c.bf16 %v825_v5, %v824_v3  ;;  %v1241_v10 = vld [vmem:[#allocation2 + $0x62] sm:$0xff]  ;;  %v1014_v0 = vld [vmem:[#allocation2 + $0x19] sm:$0xff]  ;;  %v1013_v22 = vld [vmem:[#allocation2 + $0x11] sm:$0xff] }
 0x11a   : > { %v550_v7 = vpop.f32.mrf.mxu0  ;;  %v1030_v2 = vpack.c.bf16 %v1014_v0, %v1013_v22  ;;  %v1668_v3 = vld [vmem:[#allocation2 + $0x2b] sm:$0xff]  ;;  %v1667_v5 = vld [vmem:[#allocation2 + $0x23] sm:$0xff]  ;;  %v2103_v0 = vld [vmem:[#allocation2 + $0x34] sm:$0xff] }
 0x11b   : > { %v777_v8 = vmul.f32 %v4330_v24, %v601_v6  ;;  %v551_v23 = vadd.f32 %v4341_v28, %v550_v7  ;;  %3616 = vmatmul.mubr.msk.bf16.gmra.mxu1 %vm405_vm2, %v836_v16  ;;  %v1684_v6 = vpack.c.bf16 %v1668_v3, %v1667_v5  ;;  %v1016_v16 = vld [vmem:[#allocation2 + $0x29] sm:$0xff]  ;;  %v1015_v7 = vld [vmem:[#allocation2 + $0x21] sm:$0xff] }
 0x11c   : > { %v3572_v9 = vpop.f32.mrf.mxu0  ;;  %v1242_v30 = vld [vmem:[#allocation2 + $0x6a] sm:$0xff]  ;;  %3619 = vmatprep.mubr.msk.bf16.mxu1 %vm4097_vm1, %v4096_v1  ;;  %v2108_v5 = vld [vmem:[#allocation2 + $0x5c] sm:$0xff] }
 0x11d   : > { %802 = vst.msk [vmem:[#allocation2 + $0x80] sm:$0xff] %vm405_vm2, %v777_v8  ;;  %v602_v31 = vmax.f32 %v551_v23, 0.0  ;;  %v4461_v32 = vpack.c.bf16 %v1242_v30, %v1241_v10  ;;  %v826_v35 = vld [vmem:[#allocation2 + $0x70] sm:$0xff]  ;;  %v1031_v8 = vpack.c.bf16 %v1016_v16, %v1015_v7  ;;  %v1670_v23 = vld [vmem:[#allocation2 + $0x3b] sm:$0xff]  ;;  %v2105_v3 = vld [vmem:[#allocation2 + $0x44] sm:$0xff] }
 0x11e   : > { %v555_v17 = vpop.f32.mrf.mxu0  ;;  %v1669_v9 = vld [vmem:[#allocation2 + $0x33] sm:$0xff]  ;;  %v2109_v7 = vld [vmem:[#allocation2 + $0x64] sm:$0xff] }
 0x11f   : > { %v778_v11 = vmul.f32 %v4332_v25, %v602_v31  ;;  %v556_v24 = vadd.f32 %v4341_v28, %v555_v17  ;;  %3692 = vmatmul.mubr.msk.bf16.gmra.mxu0 %vm405_vm2, %v4461_v32  ;;  %v1685_v10 = vpack.c.bf16 %v1670_v23, %v1669_v9  ;;  %v1018_v30 = vld [vmem:[#allocation2 + $0x39] sm:$0xff]  ;;  %v1017_v31 = vld [vmem:[#allocation2 + $0x31] sm:$0xff] }
 0x120   : > { %v3575_v34 = vpop.f32.mrf.mxu0  ;;  %v827_v36 = vld [vmem:[#allocation2 + $0x78] sm:$0xff]  ;;  %3695 = vmatprep.mubr.msk.bf16.mxu0 %vm4097_vm1, %v4096_v1  ;;  %v1032_v17 = vpack.c.bf16 %v1018_v30, %v1017_v31  ;;  %v2110_v16 = vld [vmem:[#allocation2 + $0x6c] sm:$0xff] }
 0x121   : > { %803 = vst.msk [vmem:[#allocation2 + $0x88] sm:$0xff] %vm405_vm2, %v778_v11  ;;  %v603_v38 = vmax.f32 %v556_v24, 0.0  ;;  %v837_v39 = vpack.c.bf16 %v827_v36, %v826_v35  ;;  %v1243_v41 = vld [vmem:[#allocation2 + $0x72] sm:$0xff]  ;;  %v1671_v24 = vld [vmem:[#allocation2 + $0x43] sm:$0xff] }
 0x122   : > { %v558_v18 = vpop.f32.mrf.mxu0  ;;  %v1672_v11 = vld [vmem:[#allocation2 + $0x4b] sm:$0xff]  ;;  %v1019_v36 = vld [vmem:[#allocation2 + $0x41] sm:$0xff]  ;;  %v2111_v23 = vld [vmem:[#allocation2 + $0x74] sm:$0xff] }
 0x123   : > { %v779_v12 = vmul.f32 %v4334_v26, %v603_v38  ;;  %v559_v25 = vadd.f32 %v4341_v28, %v558_v18  ;;  %3620 = vmatmul.mubr.msk.bf16.gmra.mxu1 %vm405_vm2, %v837_v39  ;;  %v1686_v34 = vpack.c.bf16 %v1672_v11, %v1671_v24  ;;  %v1020_v35 = vld [vmem:[#allocation2 + $0x49] sm:$0xff]  ;;  %v1674_v39 = vld [vmem:[#allocation2 + $0x5b] sm:$0xff]  ;;  %v1673_v18 = vld [vmem:[#allocation2 + $0x53] sm:$0xff] }
 0x124   : > { %v3576_v40 = vpop.f32.mrf.mxu0  ;;  %v1244_v42 = vld [vmem:[#allocation2 + $0x7a] sm:$0xff]  ;;  %3623 = vmatprep.mubr.msk.bf16.mxu1 %vm4097_vm1, %v4096_v1  ;;  %v1033_v38 = vpack.c.bf16 %v1020_v35, %v1019_v36 }
 0x125   : > { %804 = vst.msk [vmem:[#allocation2 + $0x90] sm:$0xff] %vm405_vm2, %v779_v12  ;;  %v604_v43 = vmax.f32 %v559_v25, 0.0  ;;  %v4476_v44 = vpack.c.bf16 %v1244_v42, %v1243_v41  ;;  %v828_v47 = vld [vmem:[#allocation2 + $0x80] sm:$0xff]  ;;  %v1687_v12 = vpack.c.bf16 %v1674_v39, %v1673_v18  ;;  %v1021_v40 = vld [vmem:[#allocation2 + $0x51] sm:$0xff] }
 0x126   : > { %v563_v45 = vpop.f32.mrf.mxu0  ;;  %v1022_v25 = vld [vmem:[#allocation2 + $0x59] sm:$0xff]  ;;  %v1676_v42 = vld [vmem:[#allocation2 + $0x6b] sm:$0xff] }
 0x127   : > { %v780_v19 = vmul.f32 %v4336_v27, %v604_v43  ;;  %v564_v26 = vadd.f32 %v4341_v28, %v563_v45  ;;  %3696 = vmatmul.mubr.msk.bf16.gmra.mxu0 %vm405_vm2, %v4476_v44  ;;  %v1034_v41 = vpack.c.bf16 %v1022_v25, %v1021_v40  ;;  %v1675_v43 = vld [vmem:[#allocation2 + $0x63] sm:$0xff] }
 0x128   : > { %v3579_v46 = vpop.f32.mrf.mxu0  ;;  %v829_v13 = vld [vmem:[#allocation2 + $0x88] sm:$0xff]  ;;  %3699 = vmatprep.mubr.msk.bf16.mxu0 %vm4097_vm1, %v4096_v1  ;;  %v1688_v45 = vpack.c.bf16 %v1676_v42, %v1675_v43 }
 0x129   : > { %805 = vst.msk [vmem:[#allocation2 + $0x98] sm:$0xff] %vm405_vm2, %v780_v19  ;;  %v605_v48 = vmax.f32 %v564_v26, 0.0  ;;  %v838_v50 = vpack.c.bf16 %v829_v13, %v828_v47  ;;  %v1245_v52 = vld [vmem:[#allocation2 + $0x82] sm:$0xff]  ;;  %v1677_v13 = vld [vmem:[#allocation2 + $0x73] sm:$0xff] }
 0x12a   : > { %v566_v51 = vpop.f32.mrf.mxu0  ;;  %v1024_v19 = vld [vmem:[#allocation2 + $0x69] sm:$0xff]  ;;  %v1023_v26 = vld [vmem:[#allocation2 + $0x61] sm:$0xff] }
 0x12b   : > { %v781_v20 = vmul.f32 %v4343_v29, %v605_v48  ;;  %v567_v27 = vadd.f32 %v4341_v28, %v566_v51  ;;  %3624 = vmatmul.mubr.msk.bf16.gmra.mxu1 %vm405_vm2, %v838_v50  ;;  %v3311_v29 = vld [vmem:[%s5354_s4 + $0x6] sm:$0x3]  ;;  %v1035_v46 = vpack.c.bf16 %v1024_v19, %v1023_v26  ;;  %v1678_v47 = vld [vmem:[#allocation2 + $0x7b] sm:$0xff]  ;;  %v1025_v51 = vld [vmem:[#allocation2 + $0x71] sm:$0xff] }
 0x12c   : > { %v1246_v54 = vld [vmem:[#allocation2 + $0x8a] sm:$0xff]  ;;  %3629 = vmatprep.mubr.msk.bf16.mxu1 %vm4097_vm1, %v4096_v1  ;;  %v3580_v55 = vpop.f32.mrf.mxu0  ;;  %v1504_v59 = vsel %vm445_vm0, %v3311_v29, 0  ;;  %v1689_v48 = vpack.c.bf16 %v1678_v47, %v1677_v13  ;;  %v1026_v50 = vld [vmem:[#allocation2 + $0x79] sm:$0xff] }
 0x12d   : > { %806 = vst.msk [vmem:[#allocation2 + $0xa0] sm:$0xff] %vm405_vm2, %v781_v20  ;;  %v606_v14 = vmax.f32 %v567_v27, 0.0  ;;  %v4491_v56 = vpack.c.bf16 %v1246_v54, %v1245_v52  ;;  %v1036_v20 = vpack.c.bf16 %v1026_v50, %v1025_v51  ;;  %v1680_v27 = vld [vmem:[#allocation2 + $0x8b] sm:$0xff]  ;;  %v1679_v52 = vld [vmem:[#allocation2 + $0x83] sm:$0xff] }
 0x12e   : > { %v1690_v54 = vpack.c.bf16 %v1680_v27, %v1679_v52  ;;  %v1028_v55 = vld [vmem:[#allocation2 + $0x89] sm:$0xff]  ;;  %v1884_v51 = vld [vmem:[#allocation2 + $0x1c] sm:$0xff] }
 0x12f   : > { %v782_v28 = vmul.f32 %v4346_v33, %v606_v14  ;;  %3700 = vmatmul.mubr.msk.bf16.gmra.mxu0 %vm405_vm2, %v4491_v56  ;;  %v1665_v33 = vld [vmem:[#allocation2 + $0x13] sm:$0xff]  ;;  %v1027_v14 = vld [vmem:[#allocation2 + $0x81] sm:$0xff] }
 0x130   : > { %3743 = vmatprep.mubr.msk.bf16.mxu0 %vm4097_vm1, %v4096_v1  ;;  %v1683_v62 = vpack.c.bf16 %v1666_v60, %v1665_v33  ;;  %v1037_v57 = vpack.c.bf16 %v1028_v55, %v1027_v14  ;;  %v2102_v60 = vld [vmem:[#allocation2 + $0x2c] sm:$0xff]  ;;  %v2101_v33 = vld [vmem:[#allocation2 + $0x24] sm:$0xff] }
 0x131   : > { %807 = vst.msk [vmem:[#allocation2 + $0xa8] sm:$0xff] %vm405_vm2, %v782_v28  ;;  %v1681_v28 = vld [vmem:[#allocation2 + $0x93] sm:$0xff] }
 0x132   : > { %v2114_v9 = vld [vmem:[#allocation2 + $0x8c] sm:$0xff] }
 0x133   : > { %3630 = vmatmul.mubr.msk.bf16.vlgmr.msra.gmra.mxu1 %vm405_vm2, %v1029_v21  ;;  %v3331_v21 = vld [vmem:[%s5354_s4 + $0xa] sm:$0x3] }
 0x134   : > { %3704 = vmatpush3.bf16.msra.mxu1 %v1504_v59  ;;  %3633 = vmatprep.mubr.msk.bf16.mxu1 %vm4097_vm1, %v4096_v1  ;;  %v1682_v29 = vld [vmem:[#allocation2 + $0x9b] sm:$0xff]  ;;  %v1940_v59 = vsel %vm445_vm0, %v3331_v21, 0 }
 0x135   : > { %3779 = vmatprep.subr.bf16.mxu1 %v4096_v1  ;;  %v1691_v58 = vpack.c.bf16 %v1682_v29, %v1681_v28  ;;  %v1464_v25 = vld [vmem:[#allocation2 + $0x9a] sm:$0xff]  ;;  %v2538_v28 = vld [vmem:[#allocation2 + $0x2e] sm:$0xff] }
 0x137   : > { %3744 = vmatmul.mubr.msk.bf16.vlgmr.msra.gmra.mxu0 %vm405_vm2, %v1683_v62  ;;  %v4574_v62 = vpack.c.bf16 %v2102_v60, %v2101_v33 }
 0x138   : > { %3747 = vmatprep.mubr.msk.bf16.mxu0 %vm4097_vm1, %v4096_v1  ;;  %3818 = vmatpush3.bf16.msra.mxu0 %v2158_v63  ;;  %v2594_v63 = vsel %vm445_vm0, %v3361_v61, 0  ;;  %v2117_v19 = vld [vmem:[#allocation2 + $0xa4] sm:$0xff]  ;;  %v2118_v26 = vld [vmem:[#allocation2 + $0xac] sm:$0xff] }
 0x139   : > { %3893 = vmatprep.subr.bf16.mxu0 %v4096_v1  ;;  %v2127_v50 = vpack.c.bf16 %v2118_v26, %v2117_v19 }
 0x13b   : > { %3634 = vmatmul.mubr.msk.bf16.gmra.mxu1 %vm405_vm2, %v1030_v2  ;;  %v2106_v2 = vld [vmem:[#allocation2 + $0x4c] sm:$0xff] }
 0x13c   : > { %3637 = vmatprep.mubr.msk.bf16.mxu1 %vm4097_vm1, %v4096_v1 }
 0x13f   : > { %3748 = vmatmul.mubr.msk.bf16.gmra.mxu0 %vm405_vm2, %v1684_v6  ;;  %v2107_v6 = vld [vmem:[#allocation2 + $0x54] sm:$0xff] }
 0x140   : > { %3751 = vmatprep.mubr.msk.bf16.mxu0 %vm4097_vm1, %v4096_v1 }
 0x143   : > { %3638 = vmatmul.mubr.msk.bf16.gmra.mxu1 %vm405_vm2, %v1031_v8  ;;  %v2112_v8 = vld [vmem:[#allocation2 + $0x7c] sm:$0xff] }
 0x144   : > { %3641 = vmatprep.mubr.msk.bf16.mxu1 %vm4097_vm1, %v4096_v1 }
 0x147   : > { %3752 = vmatmul.mubr.msk.bf16.gmra.mxu0 %vm405_vm2, %v1685_v10 }
 0x148   : > { %3755 = vmatprep.mubr.msk.bf16.mxu0 %vm4097_vm1, %v4096_v1 }
 0x14b   : > { %3642 = vmatmul.mubr.msk.bf16.gmra.mxu1 %vm405_vm2, %v1032_v17 }
 0x14c   : > { %3645 = vmatprep.mubr.msk.bf16.mxu1 %vm4097_vm1, %v4096_v1 }
 0x14f   : > { %3756 = vmatmul.mubr.msk.bf16.gmra.mxu0 %vm405_vm2, %v1686_v34  ;;  %v2116_v34 = vld [vmem:[#allocation2 + $0x9c] sm:$0xff] }
 0x150   : > { %3759 = vmatprep.mubr.msk.bf16.mxu0 %vm4097_vm1, %v4096_v1 }
 0x153   : > { %3646 = vmatmul.mubr.msk.bf16.gmra.mxu1 %vm405_vm2, %v1033_v38  ;;  %v2115_v38 = vld [vmem:[#allocation2 + $0x94] sm:$0xff] }
 0x154   : > { %3649 = vmatprep.mubr.msk.bf16.mxu1 %vm4097_vm1, %v4096_v1 }
 0x157   : > { %3760 = vmatmul.mubr.msk.bf16.gmra.mxu0 %vm405_vm2, %v1687_v12  ;;  %v4654_v12 = vpack.c.bf16 %v2116_v34, %v2115_v38 }
 0x158   : > { %3763 = vmatprep.mubr.msk.bf16.mxu0 %vm4097_vm1, %v4096_v1 }
 0x15b   : > { %3650 = vmatmul.mubr.msk.bf16.gmra.mxu1 %vm405_vm2, %v1034_v41 }
 0x15c   : > { %3653 = vmatprep.mubr.msk.bf16.mxu1 %vm4097_vm1, %v4096_v1 }
 0x15f   : > { %3764 = vmatmul.mubr.msk.bf16.gmra.mxu0 %vm405_vm2, %v1688_v45 }
 0x160   : > { %3767 = vmatprep.mubr.msk.bf16.mxu0 %vm4097_vm1, %v4096_v1 }
 0x163   : > { %3654 = vmatmul.mubr.msk.bf16.gmra.mxu1 %vm405_vm2, %v1035_v46 }
 0x164   : > { %3657 = vmatprep.mubr.msk.bf16.mxu1 %vm4097_vm1, %v4096_v1 }
 0x167   : > { %3768 = vmatmul.mubr.msk.bf16.gmra.mxu0 %vm405_vm2, %v1689_v48 }
 0x168   : > { %3771 = vmatprep.mubr.msk.bf16.mxu0 %vm4097_vm1, %v4096_v1 }
 0x16b   : > { %3658 = vmatmul.mubr.msk.bf16.gmra.mxu1 %vm405_vm2, %v1036_v20  ;;  %v3351_v20 = vld [vmem:[%s5354_s4 + $0xe] sm:$0x3] }
 0x16c   : > { %3661 = vmatprep.mubr.msk.bf16.mxu1 %vm4097_vm1, %v4096_v1  ;;  %v2376_v29 = vsel %vm445_vm0, %v3351_v20, 0 }
 0x16f   : > { %3772 = vmatmul.mubr.msk.bf16.gmra.mxu0 %vm405_vm2, %v1690_v54  ;;  %v1883_v54 = vld [vmem:[#allocation2 + $0x14] sm:$0xff] }
 0x170   : > { %3775 = vmatprep.mubr.msk.bf16.mxu0 %vm4097_vm1, %v4096_v1 }
 0x173   : > { %3662 = vmatmul.mubr.msk.bf16.gmra.mxu1 %vm405_vm2, %v1037_v57  ;;  %v1901_v57 = vpack.c.bf16 %v1884_v51, %v1883_v54 }
 0x174   : > { %3705 = vmatprep.mubr.msk.bf16.mxu1 %vm4097_vm1, %v4096_v1 }
 0x177   : > { %3776 = vmatmul.mubr.msk.bf16.gmra.mxu0 %vm405_vm2, %v1691_v58 }
 0x178   : > { %3819 = vmatprep.mubr.msk.bf16.mxu0 %vm4097_vm1, %v4096_v1 }
 0x17b   : > { %3706 = vmatmul.mubr.msk.bf16.vlgmr.msra.gmra.mxu1 %vm405_vm2, %v4386_v53  ;;  %v2104_v53 = vld [vmem:[#allocation2 + $0x3c] sm:$0xff] }
 0x17c   : > { %3780 = vmatpush3.bf16.msra.mxu1 %v1940_v59  ;;  %3709 = vmatprep.mubr.msk.bf16.mxu1 %vm4097_vm1, %v4096_v1  ;;  %v4587_v22 = vpack.c.bf16 %v2104_v53, %v2103_v0  ;;  %v2537_v59 = vld [vmem:[#allocation2 + $0x26] sm:$0xff] }
 0x17d   : > { %3855 = vmatprep.subr.bf16.mxu1 %v4096_v1  ;;  %v2555_v33 = vpack.c.bf16 %v2538_v28, %v2537_v59 }
 0x17f   : > { %3820 = vmatmul.mubr.msk.bf16.vlgmr.msra.gmra.mxu0 %vm405_vm2, %v4574_v62 }
 0x180   : > { %3823 = vmatprep.mubr.msk.bf16.mxu0 %vm4097_vm1, %v4096_v1  ;;  %3894 = vmatpush3.bf16.msra.mxu0 %v2594_v63 }
 0x181   : > { %3969 = vmatprep.subr.bf16.mxu0 %v4096_v1 }
 0x183   : > { %3710 = vmatmul.mubr.msk.bf16.gmra.mxu1 %vm405_vm2, %v4401_v4  ;;  %v4597_v4 = vpack.c.bf16 %v2106_v2, %v2105_v3  ;;  %v2540_v3 = vld [vmem:[#allocation2 + $0x3e] sm:$0xff] }
 0x184   : > { %3713 = vmatprep.mubr.msk.bf16.mxu1 %vm4097_vm1, %v4096_v1 }
 0x187   : > { %3824 = vmatmul.mubr.msk.bf16.gmra.mxu0 %vm405_vm2, %v4587_v22 }
 0x188   : > { %3827 = vmatprep.mubr.msk.bf16.mxu0 %vm4097_vm1, %v4096_v1 }
 0x18b   : > { %3714 = vmatmul.mubr.msk.bf16.gmra.mxu1 %vm405_vm2, %v4416_v37  ;;  %v4607_v37 = vpack.c.bf16 %v2108_v5, %v2107_v6 }
 0x18c   : > { %3717 = vmatprep.mubr.msk.bf16.mxu1 %vm4097_vm1, %v4096_v1 }
 0x18f   : > { %3828 = vmatmul.mubr.msk.bf16.gmra.mxu0 %vm405_vm2, %v4597_v4 }
 0x190   : > { %3831 = vmatprep.mubr.msk.bf16.mxu0 %vm4097_vm1, %v4096_v1 }
 0x193   : > { %3718 = vmatmul.mubr.msk.bf16.gmra.mxu1 %vm405_vm2, %v4431_v49  ;;  %v4617_v49 = vpack.c.bf16 %v2110_v16, %v2109_v7  ;;  %v2539_v16 = vld [vmem:[#allocation2 + $0x36] sm:$0xff] }
 0x194   : > { %3721 = vmatprep.mubr.msk.bf16.mxu1 %vm4097_vm1, %v4096_v1 }
 0x197   : > { %3832 = vmatmul.mubr.msk.bf16.gmra.mxu0 %vm405_vm2, %v4607_v37 }
 0x198   : > { %3835 = vmatprep.mubr.msk.bf16.mxu0 %vm4097_vm1, %v4096_v1 }
 0x19b   : > { %3722 = vmatmul.mubr.msk.bf16.gmra.mxu1 %vm405_vm2, %v4446_v15  ;;  %v4627_v15 = vpack.c.bf16 %v2112_v8, %v2111_v23  ;;  %v2556_v23 = vpack.c.bf16 %v2540_v3, %v2539_v16  ;;  %v2550_v16 = vld [vmem:[#allocation2 + $0x8e] sm:$0xff] }
 0x19c   : > { %3725 = vmatprep.mubr.msk.bf16.mxu1 %vm4097_vm1, %v4096_v1 }
 0x19f   : > { %3836 = vmatmul.mubr.msk.bf16.gmra.mxu0 %vm405_vm2, %v4617_v49 }
 0x1a0   : > { %3839 = vmatprep.mubr.msk.bf16.mxu0 %vm4097_vm1, %v4096_v1 }
 0x1a3   : > { %3726 = vmatmul.mubr.msk.bf16.gmra.mxu1 %vm405_vm2, %v4461_v32  ;;  %v2113_v32 = vld [vmem:[#allocation2 + $0x84] sm:$0xff] }
 0x1a4   : > { %3729 = vmatprep.mubr.msk.bf16.mxu1 %vm4097_vm1, %v4096_v1  ;;  %v4638_v31 = vpack.c.bf16 %v2114_v9, %v2113_v32 }
 0x1a7   : > { %3840 = vmatmul.mubr.msk.bf16.gmra.mxu0 %vm405_vm2, %v4627_v15 }
 0x1a8   : > { %3843 = vmatprep.mubr.msk.bf16.mxu0 %vm4097_vm1, %v4096_v1 }
 0x1ab   : > { %v904_v10 = vpop.f32.mrf.mxu1  ;;  %3730 = vmatmul.mubr.msk.bf16.gmra.mxu1 %vm405_vm2, %v4476_v44 }
 0x1ac   : > { %975 = vst.msk [vmem:[#allocation3] sm:$0xff] %vm405_vm2, %v904_v10  ;;  %3733 = vmatprep.mubr.msk.bf16.mxu1 %vm4097_vm1, %v4096_v1 }
 0x1ad   : > { %v3593_v30 = vpop.f32.mrf.mxu1 }
 0x1ae   : > { %v2542_v30 = vld [vmem:[#allocation2 + $0x4e] sm:$0xff] }
 0x1af   : > { %v907_v17 = vpop.f32.mrf.mxu1  ;;  %v4640_v11 = vpop.f32.mrf.mxu0  ;;  %3844 = vmatmul.mubr.msk.bf16.gmra.mxu0 %vm405_vm2, %v4638_v31 }
 0x1b0   : > { %976 = vst.msk [vmem:[#allocation3 + $0x8] sm:$0xff] %vm405_vm2, %v907_v17  ;;  %3847 = vmatprep.mubr.msk.bf16.mxu0 %vm4097_vm1, %v4096_v1 }
 0x1b1   : > { %v3594_v44 = vpop.f32.mrf.mxu1  ;;  %v3669_v24 = vpop.f32.mrf.mxu0 }
 0x1b2   : > { %v2541_v24 = vld [vmem:[#allocation2 + $0x46] sm:$0xff] }
 0x1b3   : > { %v912_v35 = vpop.f32.mrf.mxu1  ;;  %v4647_v36 = vpop.f32.mrf.mxu0  ;;  %3734 = vmatmul.mubr.msk.bf16.gmra.mxu1 %vm405_vm2, %v4491_v56  ;;  %v1463_v56 = vld [vmem:[#allocation2 + $0x92] sm:$0xff]  ;;  %v2557_v38 = vpack.c.bf16 %v2542_v30, %v2541_v24 }
 0x1b4   : > { %977 = vst.msk [vmem:[#allocation3 + $0x10] sm:$0xff] %vm405_vm2, %v912_v35  ;;  %3737 = vmatprep.mubr.msk.bf16.mxu1 %vm4097_vm1, %v4096_v1  ;;  %v1473_v45 = vpack.c.bf16 %v1464_v25, %v1463_v56 }
 0x1b5   : > { %v3597_v39 = vpop.f32.mrf.mxu1  ;;  %v3670_v18 = vpop.f32.mrf.mxu0 }
 0x1b7   : > { %v915_v40 = vpop.f32.mrf.mxu1  ;;  %v4656_v41 = vpop.f32.mrf.mxu0  ;;  %3848 = vmatmul.mubr.msk.bf16.gmra.mxu0 %vm405_vm2, %v4654_v12  ;;  %v994_v24 = vld [vmem:[#allocation3 + $0x8] sm:$0xff] }
 0x1b8   : > { %978 = vst.msk [vmem:[#allocation3 + $0x18] sm:$0xff] %vm405_vm2, %v915_v40  ;;  %3851 = vmatprep.mubr.msk.bf16.mxu0 %vm4097_vm1, %v4096_v1  ;;  %v2544_v40 = vld [vmem:[#allocation2 + $0x5e] sm:$0xff] }
 0x1b9   : > { %v3598_v42 = vpop.f32.mrf.mxu1  ;;  %v3673_v43 = vpop.f32.mrf.mxu0 }
 0x1ba   : > { %v2543_v43 = vld [vmem:[#allocation2 + $0x56] sm:$0xff] }
 0x1bb   : > { %v920_v46 = vpop.f32.mrf.mxu1  ;;  %v4663_v47 = vpop.f32.mrf.mxu0  ;;  %3738 = vmatmul.mubr.msk.bf16.gmra.mxu1 %vm405_vm2, %v1473_v45  ;;  %v2558_v26 = vpack.c.bf16 %v2544_v40, %v2543_v43 }
 0x1bc   : > { %979 = vst.msk [vmem:[#allocation3 + $0x20] sm:$0xff] %vm405_vm2, %v920_v46  ;;  %3781 = vmatprep.mubr.msk.bf16.mxu1 %vm4097_vm1, %v4096_v1 }
 0x1bd   : > { %v3601_v13 = vpop.f32.mrf.mxu1  ;;  %v3674_v48 = vpop.f32.mrf.mxu0 }
 0x1bf   : > { %v923_v27 = vpop.f32.mrf.mxu1  ;;  %v4672_v52 = vpop.f32.mrf.mxu0  ;;  %3852 = vmatmul.mubr.msk.bf16.gmra.mxu0 %vm405_vm2, %v2127_v50  ;;  %v2546_v50 = vld [vmem:[#allocation2 + $0x6e] sm:$0xff] }
 0x1c0   : > { %980 = vst.msk [vmem:[#allocation3 + $0x28] sm:$0xff] %vm405_vm2, %v923_v27  ;;  %3895 = vmatprep.mubr.msk.bf16.mxu0 %vm4097_vm1, %v4096_v1  ;;  %v2545_v27 = vld [vmem:[#allocation2 + $0x66] sm:$0xff] }
 0x1c1   : > { %v3602_v55 = vpop.f32.mrf.mxu1  ;;  %v3677_v14 = vpop.f32.mrf.mxu0 }
 0x1c2   : > { %v2559_v14 = vpack.c.bf16 %v2546_v50, %v2545_v27  ;;  %v996_v50 = vld [vmem:[#allocation3 + $0x18] sm:$0xff] }
 0x1c3   : > { %v928_v58 = vpop.f32.mrf.mxu1  ;;  %v4679_v21 = vpop.f32.mrf.mxu0  ;;  %3782 = vmatmul.mubr.msk.bf16.vlgmr.msra.gmra.mxu1 %vm405_vm2, %v1901_v57 }
 0x1c4   : > { %981 = vst.msk [vmem:[#allocation3 + $0x30] sm:$0xff] %vm405_vm2, %v928_v58  ;;  %3856 = vmatpush3.bf16.msra.mxu1 %v2376_v29  ;;  %3785 = vmatprep.mubr.msk.bf16.mxu1 %vm4097_vm1, %v4096_v1  ;;  %v2548_v58 = vld [vmem:[#allocation2 + $0x7e] sm:$0xff] }
 0x1c5   : > { %v3605_v60 = vpop.f32.mrf.mxu1  ;;  %v3678_v61 = vpop.f32.mrf.mxu0  ;;  %3931 = vmatprep.subr.bf16.mxu1 %v4096_v1 }
 0x1c6   : > { %v2547_v61 = vld [vmem:[#allocation2 + $0x76] sm:$0xff] }
 0x1c7   : > { %v931_v63 = vpop.f32.mrf.mxu1  ;;  %v4686_v53 = vpop.f32.mrf.mxu0  ;;  %3896 = vmatmul.mubr.msk.bf16.vlgmr.msra.gmra.mxu0 %vm405_vm2, %v2555_v33 }
 0x1c8   : > { %982 = vst.msk [vmem:[#allocation3 + $0x38] sm:$0xff] %vm405_vm2, %v931_v63  ;;  %3899 = vmatprep.mubr.msk.bf16.mxu0 %vm4097_vm1, %v4096_v1 }
 0x1c9   : > { %v3606_v0 = vpop.f32.mrf.mxu1  ;;  %v3681_v2 = vpop.f32.mrf.mxu0 }
 0x1ca   : > { %v2560_v0 = vpack.c.bf16 %v2548_v58, %v2547_v61 }
 0x1cb   : > { %v936_v5 = vpop.f32.mrf.mxu1  ;;  %v4692_v6 = vpop.f32.mrf.mxu0  ;;  %3786 = vmatmul.mubr.msk.bf16.gmra.mxu1 %vm405_vm2, %v4574_v62 }
 0x1cc   : > { %983 = vst.msk [vmem:[#allocation3 + $0x40] sm:$0xff] %vm405_vm2, %v936_v5  ;;  %3789 = vmatprep.mubr.msk.bf16.mxu1 %vm4097_vm1, %v4096_v1 }
 0x1cd   : > { %v3609_v7 = vpop.f32.mrf.mxu1  ;;  %v3682_v8 = vpop.f32.mrf.mxu0 }
 0x1ce   : > { %v993_v7 = vld [vmem:[#allocation3] sm:$0xff] }
 0x1cf   : > { %v939_v9 = vpop.f32.mrf.mxu1  ;;  %v4699_v10 = vpop.f32.mrf.mxu0  ;;  %3900 = vmatmul.mubr.msk.bf16.gmra.mxu0 %vm405_vm2, %v2556_v23 }
 0x1d0   : > { %984 = vst.msk [vmem:[#allocation3 + $0x48] sm:$0xff] %vm405_vm2, %v939_v9  ;;  %3903 = vmatprep.mubr.msk.bf16.mxu0 %vm4097_vm1, %v4096_v1 }
 0x1d1   : > { %v3610_v62 = vpop.f32.mrf.mxu1  ;;  %v3685_v32 = vpop.f32.mrf.mxu0 }
 0x1d2   : > { %v2549_v62 = vld [vmem:[#allocation2 + $0x86] sm:$0xff] }
 0x1d3   : > { %v944_v17 = vpop.f32.mrf.mxu1  ;;  %v4705_v44 = vpop.f32.mrf.mxu0  ;;  %3790 = vmatmul.mubr.msk.bf16.gmra.mxu1 %vm405_vm2, %v4587_v22 }
 0x1d4   : > { %985 = vst.msk [vmem:[#allocation3 + $0x50] sm:$0xff] %vm405_vm2, %v944_v17  ;;  %3793 = vmatprep.mubr.msk.bf16.mxu1 %vm4097_vm1, %v4096_v1  ;;  %v2561_v17 = vpack.c.bf16 %v2550_v16, %v2549_v62 }
 0x1d5   : > { %v3613_v34 = vpop.f32.mrf.mxu1  ;;  %v3686_v35 = vpop.f32.mrf.mxu0 }
 0x1d7   : > { %v947_v39 = vpop.f32.mrf.mxu1  ;;  %v4712_v18 = vpop.f32.mrf.mxu0  ;;  %3904 = vmatmul.mubr.msk.bf16.gmra.mxu0 %vm405_vm2, %v2557_v38 }
 0x1d8   : > { %986 = vst.msk [vmem:[#allocation3 + $0x58] sm:$0xff] %vm405_vm2, %v947_v39  ;;  %3907 = vmatprep.mubr.msk.bf16.mxu0 %vm4097_vm1, %v4096_v1 }
 0x1d9   : > { %v3614_v22 = vpop.f32.mrf.mxu1  ;;  %v3689_v25 = vpop.f32.mrf.mxu0 }
 0x1da   : > { %v2552_v22 = vld [vmem:[#allocation2 + $0x9e] sm:$0xff] }
 0x1db   : > { %v952_v56 = vpop.f32.mrf.mxu1  ;;  %v4718_v42 = vpop.f32.mrf.mxu0  ;;  %3794 = vmatmul.mubr.msk.bf16.gmra.mxu1 %vm405_vm2, %v4597_v4  ;;  %v995_v25 = vld [vmem:[#allocation3 + $0x10] sm:$0xff] }
 0x1dc   : > { %987 = vst.msk [vmem:[#allocation3 + $0x60] sm:$0xff] %vm405_vm2, %v952_v56  ;;  %3797 = vmatprep.mubr.msk.bf16.mxu1 %vm4097_vm1, %v4096_v1 }
 0x1dd   : > { %v3617_v45 = vpop.f32.mrf.mxu1  ;;  %v3690_v19 = vpop.f32.mrf.mxu0 }
 0x1de   : > { %v2551_v45 = vld [vmem:[#allocation2 + $0x96] sm:$0xff] }
 0x1df   : > { %v955_v46 = vpop.f32.mrf.mxu1  ;;  %v4725_v13 = vpop.f32.mrf.mxu0  ;;  %3908 = vmatmul.mubr.msk.bf16.gmra.mxu0 %vm405_vm2, %v2558_v26 }
 0x1e0   : > { %988 = vst.msk [vmem:[#allocation3 + $0x68] sm:$0xff] %vm405_vm2, %v955_v46  ;;  %3911 = vmatprep.mubr.msk.bf16.mxu0 %vm4097_vm1, %v4096_v1  ;;  %v2562_v46 = vpack.c.bf16 %v2552_v22, %v2551_v45 }
 0x1e1   : > { %v3618_v4 = vpop.f32.mrf.mxu1  ;;  %v3693_v48 = vpop.f32.mrf.mxu0 }
 0x1e3   : > { %v960_v51 = vpop.f32.mrf.mxu1  ;;  %v4731_v20 = vpop.f32.mrf.mxu0  ;;  %3798 = vmatmul.mubr.msk.bf16.gmra.mxu1 %vm405_vm2, %v4607_v37 }
 0x1e4   : > { %989 = vst.msk [vmem:[#allocation3 + $0x70] sm:$0xff] %vm405_vm2, %v960_v51  ;;  %3801 = vmatprep.mubr.msk.bf16.mxu1 %vm4097_vm1, %v4096_v1 }
 0x1e5   : > { %v3621_v54 = vpop.f32.mrf.mxu1  ;;  %v3694_v55 = vpop.f32.mrf.mxu0 }
 0x1e7   : > { %v963_v57 = vpop.f32.mrf.mxu1  ;;  %v4738_v29 = vpop.f32.mrf.mxu0  ;;  %3912 = vmatmul.mubr.msk.bf16.gmra.mxu0 %vm405_vm2, %v2559_v14 }
 0x1e8   : > { %990 = vst.msk [vmem:[#allocation3 + $0x78] sm:$0xff] %vm405_vm2, %v963_v57  ;;  %3915 = vmatprep.mubr.msk.bf16.mxu0 %vm4097_vm1, %v4096_v1  ;;  %v2553_v57 = vld [vmem:[#allocation2 + $0xa6] sm:$0xff] }
 0x1e9   : > { %v3622_v37 = vpop.f32.mrf.mxu1  ;;  %v3697_v28 = vpop.f32.mrf.mxu0 }
 0x1ea   : > { %v2554_v37 = vld [vmem:[#allocation2 + $0xae] sm:$0xff] }
 0x1eb   : > { %v968_v59 = vpop.f32.mrf.mxu1  ;;  %v4744_v60 = vpop.f32.mrf.mxu0  ;;  %3802 = vmatmul.mubr.msk.bf16.gmra.mxu1 %vm405_vm2, %v4617_v49  ;;  %v997_v28 = vld [vmem:[#allocation3 + $0x20] sm:$0xff] }
 0x1ec   : > { %991 = vst.msk [vmem:[#allocation3 + $0x80] sm:$0xff] %vm405_vm2, %v968_v59  ;;  %3805 = vmatprep.mubr.msk.bf16.mxu1 %vm4097_vm1, %v4096_v1 }
 0x1ed   : > { %v3625_v33 = vpop.f32.mrf.mxu1  ;;  %v3698_v63 = vpop.f32.mrf.mxu0 }
 0x1ef   : > { %v971_v2 = vpop.f32.mrf.mxu1  ;;  %v4751_v3 = vpop.f32.mrf.mxu0  ;;  %3916 = vmatmul.mubr.msk.bf16.gmra.mxu0 %vm405_vm2, %v2560_v0  ;;  %v2563_v0 = vpack.c.bf16 %v2554_v37, %v2553_v57 }
 0x1f0   : > { %992 = vst.msk [vmem:[#allocation3 + $0x88] sm:$0xff] %vm405_vm2, %v971_v2  ;;  %3919 = vmatprep.mubr.msk.bf16.mxu0 %vm4097_vm1, %v4096_v1 }
 0x1f1   : > { %v3626_v49 = vpop.f32.mrf.mxu1  ;;  %v3701_v5 = vpop.f32.mrf.mxu0 }
 0x1f2   : > { %v998_v5 = vld [vmem:[#allocation3 + $0x28] sm:$0xff] }
 0x1f3   : > { %v1104_v8 = vpop.f32.mrf.mxu1  ;;  %v4757_v23 = vpop.f32.mrf.mxu0  ;;  %3806 = vmatmul.mubr.msk.bf16.gmra.mxu1 %vm405_vm2, %v4627_v15 }
 0x1f4   : > { %v1175_v9 = vadd.f32 %v1104_v8, %v993_v7  ;;  %3809 = vmatprep.mubr.msk.bf16.mxu1 %vm4097_vm1, %v4096_v1  ;;  %v2319_v8 = vld [vmem:[#allocation2 + $0x25] sm:$0xff] }
 0x1f5   : > { %v3631_v32 = vpop.f32.mrf.mxu1  ;;  %v3702_v30 = vpop.f32.mrf.mxu0 }
 0x1f6   : > { %1193 = vst.msk [vmem:[#allocation3] sm:$0xff] %vm405_vm2, %v1175_v9 }
 0x1f7   : > { %v1107_v34 = vpop.f32.mrf.mxu1  ;;  %v4764_v35 = vpop.f32.mrf.mxu0  ;;  %3920 = vmatmul.mubr.msk.bf16.gmra.mxu0 %vm405_vm2, %v2561_v17  ;;  %v999_v17 = vld [vmem:[#allocation3 + $0x30] sm:$0xff] }
 0x1f8   : > { %v1176_v38 = vadd.f32 %v1107_v34, %v994_v24  ;;  %3923 = vmatprep.mubr.msk.bf16.mxu0 %vm4097_vm1, %v4096_v1 }
 0x1f9   : > { %v3632_v15 = vpop.f32.mrf.mxu1  ;;  %v3745_v39 = vpop.f32.mrf.mxu0 }
 0x1fa   : > { %1194 = vst.msk [vmem:[#allocation3 + $0x8] sm:$0xff] %vm405_vm2, %v1176_v38 }
 0x1fb   : > { %v1112_v40 = vpop.f32.mrf.mxu1  ;;  %v4770_v56 = vpop.f32.mrf.mxu0  ;;  %3810 = vmatmul.mubr.msk.bf16.gmra.mxu1 %vm405_vm2, %v4638_v31 }
 0x1fc   : > { %v1177_v43 = vadd.f32 %v1112_v40, %v995_v25  ;;  %3813 = vmatprep.mubr.msk.bf16.mxu1 %vm4097_vm1, %v4096_v1  ;;  %v2322_v25 = vld [vmem:[#allocation2 + $0x3d] sm:$0xff] }
 0x1fd   : > { %v3635_v19 = vpop.f32.mrf.mxu1  ;;  %v3746_v26 = vpop.f32.mrf.mxu0  ;;  %v1211_v4 = vld [vmem:[#allocation3] sm:$0xff]  ;;  %v1000_v40 = vld [vmem:[#allocation3 + $0x38] sm:$0xff] }
 0x1fe   : > { %1195 = vst.msk [vmem:[#allocation3 + $0x10] sm:$0xff] %vm405_vm2, %v1177_v43  ;;  %v1393_v48 = vadd.f32 %v4640_v11, %v1211_v4  ;;  %v2321_v26 = vld [vmem:[#allocation2 + $0x35] sm:$0xff] }
 0x1ff   : > { %v1115_v51 = vpop.f32.mrf.mxu1  ;;  %v4778_v27 = vpop.f32.mrf.mxu0  ;;  %3924 = vmatmul.mubr.msk.bf16.gmra.mxu0 %vm405_vm2, %v2562_v46 }
 0x200   : > { %v1178_v31 = vadd.f32 %v1115_v51, %v996_v50  ;;  %3927 = vmatprep.mubr.msk.bf16.mxu0 %vm4097_vm1, %v4096_v1  ;;  %1411 = vst.msk [vmem:[#allocation3] sm:$0xff] %vm405_vm2, %v1393_v48  ;;  %v2338_v48 = vpack.c.bf16 %v2322_v25, %v2321_v26 }
 0x201   : > { %v3636_v54 = vpop.f32.mrf.mxu1  ;;  %v3749_v55 = vpop.f32.mrf.mxu0  ;;  %v1212_v14 = vld [vmem:[#allocation3 + $0x8] sm:$0xff] }
 0x202   : > { %1196 = vst.msk [vmem:[#allocation3 + $0x18] sm:$0xff] %vm405_vm2, %v1178_v31  ;;  %v1394_v11 = vadd.f32 %v4647_v36, %v1212_v14  ;;  %v2320_v36 = vld [vmem:[#allocation2 + $0x2d] sm:$0xff] }
 0x203   : > { %v1120_v58 = vpop.f32.mrf.mxu1  ;;  %v4786_v59 = vpop.f32.mrf.mxu0  ;;  %3814 = vmatmul.mubr.msk.bf16.gmra.mxu1 %vm405_vm2, %v4654_v12  ;;  %v2337_v32 = vpack.c.bf16 %v2320_v36, %v2319_v8  ;;  %v1001_v31 = vld [vmem:[#allocation3 + $0x40] sm:$0xff] }
 0x204   : > { %v1179_v61 = vadd.f32 %v1120_v58, %v997_v28  ;;  %3857 = vmatprep.mubr.msk.bf16.mxu1 %vm4097_vm1, %v4096_v1  ;;  %1412 = vst.msk [vmem:[#allocation3 + $0x8] sm:$0xff] %vm405_vm2, %v1394_v11  ;;  %v2324_v11 = vld [vmem:[#allocation2 + $0x4d] sm:$0xff] }
 0x205   : > { %v3639_v33 = vpop.f32.mrf.mxu1  ;;  %v3750_v63 = vpop.f32.mrf.mxu0  ;;  %v1213_v2 = vld [vmem:[#allocation3 + $0x10] sm:$0xff]  ;;  %v1002_v28 = vld [vmem:[#allocation3 + $0x48] sm:$0xff] }
 0x206   : > { %1197 = vst.msk [vmem:[#allocation3 + $0x20] sm:$0xff] %vm405_vm2, %v1179_v61  ;;  %v1395_v49 = vadd.f32 %v4656_v41, %v1213_v2  ;;  %v2323_v63 = vld [vmem:[#allocation2 + $0x45] sm:$0xff] }
 0x207   : > { %v1123_v16 = vpop.f32.mrf.mxu1  ;;  %v4795_v7 = vpop.f32.mrf.mxu0  ;;  %3928 = vmatmul.mubr.msk.bf16.gmra.mxu0 %vm405_vm2, %v2563_v0  ;;  %v2339_v36 = vpack.c.bf16 %v2324_v11, %v2323_v63 }
 0x208   : > { %v1180_v12 = vadd.f32 %v1123_v16, %v998_v5  ;;  %1413 = vst.msk [vmem:[#allocation3 + $0x10] sm:$0xff] %vm405_vm2, %v1395_v49  ;;  %3971 = vmatprep.mubr.msk.bf16.mxu0 %vm4097_vm1, %v4096_v1  ;;  %v1003_v16 = vld [vmem:[#allocation3 + $0x50] sm:$0xff] }
 0x209   : > { %v3640_v9 = vpop.f32.mrf.mxu1  ;;  %v3753_v62 = vpop.f32.mrf.mxu0  ;;  %v1214_v30 = vld [vmem:[#allocation3 + $0x18] sm:$0xff] }
 0x20a   : > { %1198 = vst.msk [vmem:[#allocation3 + $0x28] sm:$0xff] %vm405_vm2, %v1180_v12  ;;  %v1396_v41 = vadd.f32 %v4663_v47, %v1214_v30  ;;  %v2326_v30 = vld [vmem:[#allocation2 + $0x5d] sm:$0xff] }
 0x20b   : > { %v1128_v24 = vpop.f32.mrf.mxu1  ;;  %v4803_v34 = vpop.f32.mrf.mxu0  ;;  %3858 = vmatmul.mubr.msk.bf16.vlgmr.msra.gmra.mxu1 %vm405_vm2, %v2337_v32 }
 0x20c   : > { %v1181_v38 = vadd.f32 %v1128_v24, %v999_v17  ;;  %3861 = vmatprep.mubr.msk.bf16.mxu1 %vm4097_vm1, %v4096_v1  ;;  %1414 = vst.msk [vmem:[#allocation3 + $0x18] sm:$0xff] %vm405_vm2, %v1396_v41  ;;  %v1004_v41 = vld [vmem:[#allocation3 + $0x58] sm:$0xff] }
 0x20d   : > { %v3643_v15 = vpop.f32.mrf.mxu1  ;;  %v3754_v39 = vpop.f32.mrf.mxu0  ;;  %v1215_v22 = vld [vmem:[#allocation3 + $0x20] sm:$0xff] }
 0x20e   : > { %1199 = vst.msk [vmem:[#allocation3 + $0x30] sm:$0xff] %vm405_vm2, %v1181_v38  ;;  %v1397_v47 = vadd.f32 %v4672_v52, %v1215_v22  ;;  %v2325_v15 = vld [vmem:[#allocation2 + $0x55] sm:$0xff] }
 0x20f   : > { %v1131_v43 = vpop.f32.mrf.mxu1  ;;  %v4811_v45 = vpop.f32.mrf.mxu0  ;;  %v2340_v25 = vpack.c.bf16 %v2326_v30, %v2325_v15 }
 0x210   : > { %v1182_v19 = vadd.f32 %v1131_v43, %v1000_v40  ;;  %1415 = vst.msk [vmem:[#allocation3 + $0x20] sm:$0xff] %vm405_vm2, %v1397_v47  ;;  %v2836_v43 = vld [vmem:[%s5356_s6] sm:$0x3] }
 0x211   : > { %v3644_v46 = vpop.f32.mrf.mxu1  ;;  %v3757_v4 = vpop.f32.mrf.mxu0  ;;  %v1216_v50 = vld [vmem:[#allocation3 + $0x28] sm:$0xff] }
 0x212   : > { %1200 = vst.msk [vmem:[#allocation3 + $0x38] sm:$0xff] %vm405_vm2, %v1182_v19  ;;  %v1398_v51 = vadd.f32 %v4679_v21, %v1216_v50  ;;  %v1005_v19 = vld [vmem:[#allocation3 + $0x60] sm:$0xff] }
 0x213   : > { %v1136_v54 = vpop.f32.mrf.mxu1  ;;  %v4816_v55 = vpop.f32.mrf.mxu0  ;;  %3862 = vmatmul.mubr.msk.bf16.gmra.mxu1 %vm405_vm2, %v2338_v48  ;;  %v3001_v48 = vsel %vm445_vm0, %v2836_v43, 0 }
 0x214   : > { %v1183_v52 = vadd.f32 %v1136_v54, %v1001_v31  ;;  %3865 = vmatprep.mubr.msk.bf16.mxu1 %vm4097_vm1, %v4096_v1  ;;  %1416 = vst.msk [vmem:[#allocation3 + $0x28] sm:$0xff] %vm405_vm2, %v1398_v51  ;;  %3970 = vmatpush3.bf16.msra.mxu0 %v3001_v48  ;;  %v2328_v54 = vld [vmem:[#allocation2 + $0x6d] sm:$0xff] }
 0x215   : > { %v3647_v14 = vpop.f32.mrf.mxu1  ;;  %v3758_v57 = vpop.f32.mrf.mxu0  ;;  %v1217_v37 = vld [vmem:[#allocation3 + $0x30] sm:$0xff] }
 0x216   : > { %1201 = vst.msk [vmem:[#allocation3 + $0x40] sm:$0xff] %vm405_vm2, %v1183_v52  ;;  %v1399_v21 = vadd.f32 %v4686_v53, %v1217_v37  ;;  %v1006_v14 = vld [vmem:[#allocation3 + $0x68] sm:$0xff] }
 0x217   : > { %v1139_v58 = vpop.f32.mrf.mxu1  ;;  %v4824_v61 = vpop.f32.mrf.mxu0 }
 0x218   : > { %v1184_v33 = vadd.f32 %v1139_v58, %v1002_v28  ;;  %1417 = vst.msk [vmem:[#allocation3 + $0x30] sm:$0xff] %vm405_vm2, %v1399_v21  ;;  %v2327_v21 = vld [vmem:[#allocation2 + $0x65] sm:$0xff] }
 0x219   : > { %v3648_v0 = vpop.f32.mrf.mxu1  ;;  %v3761_v2 = vpop.f32.mrf.mxu0  ;;  %v1218_v49 = vld [vmem:[#allocation3 + $0x38] sm:$0xff] }
 0x21a   : > { %1202 = vst.msk [vmem:[#allocation3 + $0x48] sm:$0xff] %vm405_vm2, %v1184_v33  ;;  %v1400_v5 = vadd.f32 %v4692_v6, %v1218_v49  ;;  %v2341_v33 = vpack.c.bf16 %v2328_v54, %v2327_v21  ;;  %v1007_v2 = vld [vmem:[#allocation3 + $0x70] sm:$0xff] }
 0x21b   : > { %v1144_v12 = vpop.f32.mrf.mxu1  ;;  %v4829_v8 = vpop.f32.mrf.mxu0  ;;  %3866 = vmatmul.mubr.msk.bf16.gmra.mxu1 %vm405_vm2, %v2339_v36 }
 0x21c   : > { %v1185_v53 = vadd.f32 %v1144_v12, %v1003_v16  ;;  %3869 = vmatprep.mubr.msk.bf16.mxu1 %vm4097_vm1, %v4096_v1  ;;  %1418 = vst.msk [vmem:[#allocation3 + $0x38] sm:$0xff] %vm405_vm2, %v1400_v5 }
 0x21d   : > { %v3651_v9 = vpop.f32.mrf.mxu1  ;;  %v3762_v62 = vpop.f32.mrf.mxu0  ;;  %v1219_v32 = vld [vmem:[#allocation3 + $0x40] sm:$0xff] }
 0x21e   : > { %1203 = vst.msk [vmem:[#allocation3 + $0x50] sm:$0xff] %vm405_vm2, %v1185_v53  ;;  %v1401_v6 = vadd.f32 %v4699_v10, %v1219_v32  ;;  %v2837_v10 = vld [vmem:[%s5357_s7] sm:$0x3] }
 0x21f   : > { %v1147_v17 = vpop.f32.mrf.mxu1  ;;  %v4837_v24 = vpop.f32.mrf.mxu0  ;;  %v2866_v4 = vsel %vm445_vm0, %v2837_v10, 0  ;;  %v2330_v53 = vld [vmem:[#allocation2 + $0x7d] sm:$0xff] }
 0x220   : > { %v1186_v38 = vadd.f32 %v1147_v17, %v1004_v41  ;;  %1419 = vst.msk [vmem:[#allocation3 + $0x40] sm:$0xff] %vm405_vm2, %v1401_v6  ;;  %3932 = vmatpush3.bf16.msra.mxu1 %v2866_v4  ;;  %v1008_v9 = vld [vmem:[#allocation3 + $0x78] sm:$0xff]  ;;  %v2329_v6 = vld [vmem:[#allocation2 + $0x75] sm:$0xff] }
 0x221   : > { %v3652_v39 = vpop.f32.mrf.mxu1  ;;  %v3765_v22 = vpop.f32.mrf.mxu0  ;;  %v1220_v47 = vld [vmem:[#allocation3 + $0x48] sm:$0xff] }
 0x222   : > { %1204 = vst.msk [vmem:[#allocation3 + $0x58] sm:$0xff] %vm405_vm2, %v1186_v38  ;;  %v1402_v40 = vadd.f32 %v4705_v44, %v1220_v47  ;;  %v2342_v38 = vpack.c.bf16 %v2330_v53, %v2329_v6  ;;  %v1009_v22 = vld [vmem:[#allocation3 + $0x80] sm:$0xff] }
 0x223   : > { %v1152_v26 = vpop.f32.mrf.mxu1  ;;  %v4848_v46 = vpop.f32.mrf.mxu0  ;;  %3870 = vmatmul.mubr.msk.bf16.gmra.mxu1 %vm405_vm2, %v2340_v25 }
 0x224   : > { %v1187_v50 = vadd.f32 %v1152_v26, %v1005_v19  ;;  %3873 = vmatprep.mubr.msk.bf16.mxu1 %vm4097_vm1, %v4096_v1  ;;  %1420 = vst.msk [vmem:[#allocation3 + $0x48] sm:$0xff] %vm405_vm2, %v1402_v40  ;;  %v2332_v19 = vld [vmem:[#allocation2 + $0x8d] sm:$0xff] }
 0x225   : > { %v3655_v44 = vpop.f32.mrf.mxu1  ;;  %v3766_v51 = vpop.f32.mrf.mxu0  ;;  %v1221_v31 = vld [vmem:[#allocation3 + $0x50] sm:$0xff]  ;;  %v1010_v26 = vld [vmem:[#allocation3 + $0x88] sm:$0xff] }
 0x226   : > { %1205 = vst.msk [vmem:[#allocation3 + $0x60] sm:$0xff] %vm405_vm2, %v1187_v50  ;;  %v1403_v52 = vadd.f32 %v4712_v18, %v1221_v31  ;;  %v2331_v44 = vld [vmem:[#allocation2 + $0x85] sm:$0xff] }
 0x227   : > { %v1155_v57 = vpop.f32.mrf.mxu1  ;;  %v4858_v37 = vpop.f32.mrf.mxu0  ;;  %v2343_v54 = vpack.c.bf16 %v2332_v19, %v2331_v44 }
 0x228   : > { %v1188_v11 = vadd.f32 %v1155_v57, %v1006_v14  ;;  %1421 = vst.msk [vmem:[#allocation3 + $0x50] sm:$0xff] %vm405_vm2, %v1403_v52  ;;  %v1429_v57 = vld [vmem:[#allocation3] sm:$0xff] }
 0x229   : > { %v3656_v28 = vpop.f32.mrf.mxu1  ;;  %v3769_v58 = vpop.f32.mrf.mxu0  ;;  %v1222_v63 = vld [vmem:[#allocation3 + $0x58] sm:$0xff] }
 0x22a   : > { %1206 = vst.msk [vmem:[#allocation3 + $0x68] sm:$0xff] %vm405_vm2, %v1188_v11  ;;  %v1404_v0 = vadd.f32 %v4718_v42, %v1222_v63  ;;  %v2334_v63 = vld [vmem:[#allocation2 + $0x9d] sm:$0xff] }
 0x22b   : > { %v1160_v36 = vpop.f32.mrf.mxu1  ;;  %v4863_v49 = vpop.f32.mrf.mxu0  ;;  %3874 = vmatmul.mubr.msk.bf16.gmra.mxu1 %vm405_vm2, %v2341_v33 }
 0x22c   : > { %v1189_v18 = vadd.f32 %v1160_v36, %v1007_v2  ;;  %3877 = vmatprep.mubr.msk.bf16.mxu1 %vm4097_vm1, %v4096_v1  ;;  %1422 = vst.msk [vmem:[#allocation3 + $0x58] sm:$0xff] %vm405_vm2, %v1404_v0  ;;  %v1430_v0 = vld [vmem:[#allocation3 + $0x8] sm:$0xff] }
 0x22d   : > { %v3659_v5 = vpop.f32.mrf.mxu1  ;;  %v3770_v16 = vpop.f32.mrf.mxu0  ;;  %v1223_v12 = vld [vmem:[#allocation3 + $0x60] sm:$0xff] }
 0x22e   : > { %1207 = vst.msk [vmem:[#allocation3 + $0x70] sm:$0xff] %vm405_vm2, %v1189_v18  ;;  %v1405_v42 = vadd.f32 %v4725_v13, %v1223_v12  ;;  %v2333_v5 = vld [vmem:[#allocation2 + $0x95] sm:$0xff] }
 0x22f   : > { %v1163_v62 = vpop.f32.mrf.mxu1  ;;  %v4871_v32 = vpop.f32.mrf.mxu0  ;;  %v2344_v53 = vpack.c.bf16 %v2334_v63, %v2333_v5  ;;  %v1435_v63 = vld [vmem:[#allocation3 + $0x30] sm:$0xff] }
 0x230   : > { %v1190_v30 = vadd.f32 %v1163_v62, %v1008_v9  ;;  %1423 = vst.msk [vmem:[#allocation3 + $0x60] sm:$0xff] %vm405_vm2, %v1405_v42  ;;  %v1431_v62 = vld [vmem:[#allocation3 + $0x10] sm:$0xff] }
 0x231   : > { %v3660_v41 = vpop.f32.mrf.mxu1  ;;  %v3773_v17 = vpop.f32.mrf.mxu0  ;;  %v1224_v15 = vld [vmem:[#allocation3 + $0x68] sm:$0xff] }
 0x232   : > { %1208 = vst.msk [vmem:[#allocation3 + $0x78] sm:$0xff] %vm405_vm2, %v1190_v30  ;;  %v1406_v39 = vadd.f32 %v4731_v20, %v1224_v15  ;;  %v2335_v15 = vld [vmem:[#allocation2 + $0xa5] sm:$0xff] }
 0x233   : > { %v1168_v25 = vpop.f32.mrf.mxu1  ;;  %v4876_v47 = vpop.f32.mrf.mxu0  ;;  %3878 = vmatmul.mubr.msk.bf16.gmra.mxu1 %vm405_vm2, %v2342_v38 }
 0x234   : > { %v1191_v13 = vadd.f32 %v1168_v25, %v1009_v22  ;;  %3881 = vmatprep.mubr.msk.bf16.mxu1 %vm4097_vm1, %v4096_v1  ;;  %1424 = vst.msk [vmem:[#allocation3 + $0x68] sm:$0xff] %vm405_vm2, %v1406_v39  ;;  %v2336_v39 = vld [vmem:[#allocation2 + $0xad] sm:$0xff]  ;;  %v1432_v22 = vld [vmem:[#allocation3 + $0x18] sm:$0xff] }
 0x235   : > { %v3663_v40 = vpop.f32.mrf.mxu1  ;;  %v3774_v10 = vpop.f32.mrf.mxu0  ;;  %v1225_v43 = vld [vmem:[#allocation3 + $0x70] sm:$0xff]  ;;  %v2345_v19 = vpack.c.bf16 %v2336_v39, %v2335_v15 }
 0x236   : > { %1209 = vst.msk [vmem:[#allocation3 + $0x80] sm:$0xff] %vm405_vm2, %v1191_v13  ;;  %v1407_v20 = vadd.f32 %v4738_v29, %v1225_v43 }
 0x237   : > { %v1171_v4 = vpop.f32.mrf.mxu1  ;;  %v4884_v48 = vpop.f32.mrf.mxu0 }
 0x238   : > { %v1192_v50 = vadd.f32 %v1171_v4, %v1010_v26  ;;  %1425 = vst.msk [vmem:[#allocation3 + $0x70] sm:$0xff] %vm405_vm2, %v1407_v20  ;;  %v1433_v4 = vld [vmem:[#allocation3 + $0x20] sm:$0xff] }
 0x239   : > { %v3664_v51 = vpop.f32.mrf.mxu1  ;;  %v3777_v31 = vpop.f32.mrf.mxu0  ;;  %v1226_v52 = vld [vmem:[#allocation3 + $0x78] sm:$0xff] }
 0x23a   : > { %1210 = vst.msk [vmem:[#allocation3 + $0x88] sm:$0xff] %vm405_vm2, %v1192_v50  ;;  %v1408_v14 = vadd.f32 %v4744_v60, %v1226_v52 }
 0x23b   : > { %v1540_v11 = vpop.f32.mrf.mxu1  ;;  %v4889_v21 = vpop.f32.mrf.mxu0  ;;  %3882 = vmatmul.mubr.msk.bf16.gmra.mxu1 %vm405_vm2, %v2343_v54 }
 0x23c   : > { %v1611_v29 = vadd.f32 %v1540_v11, %v1429_v57  ;;  %3885 = vmatprep.mubr.msk.bf16.mxu1 %vm4097_vm1, %v4096_v1  ;;  %1426 = vst.msk [vmem:[#allocation3 + $0x78] sm:$0xff] %vm405_vm2, %v1408_v14 }
 0x23d   : > { %v3707_v28 = vpop.f32.mrf.mxu1  ;;  %v3778_v58 = vpop.f32.mrf.mxu0  ;;  %v1227_v33 = vld [vmem:[#allocation3 + $0x80] sm:$0xff] }
 0x23e   : > { %1629 = vst.msk [vmem:[#allocation3] sm:$0xff] %vm405_vm2, %v1611_v29  ;;  %v1409_v60 = vadd.f32 %v4751_v3, %v1227_v33 }
 0x23f   : > { %v1543_v2 = vpop.f32.mrf.mxu1  ;;  %v4897_v36 = vpop.f32.mrf.mxu0 }
 0x240   : > { %v1612_v18 = vadd.f32 %v1543_v2, %v1430_v0  ;;  %1427 = vst.msk [vmem:[#allocation3 + $0x80] sm:$0xff] %vm405_vm2, %v1409_v60 }
 0x241   : > { %v3708_v16 = vpop.f32.mrf.mxu1  ;;  %v3821_v12 = vpop.f32.mrf.mxu0  ;;  %v1228_v42 = vld [vmem:[#allocation3 + $0x88] sm:$0xff] }
 0x242   : > { %1630 = vst.msk [vmem:[#allocation3 + $0x8] sm:$0xff] %vm405_vm2, %v1612_v18  ;;  %v1410_v9 = vadd.f32 %v4757_v23, %v1228_v42  ;;  %v1436_v12 = vld [vmem:[#allocation3 + $0x38] sm:$0xff] }
 0x243   : > { %v1548_v30 = vpop.f32.mrf.mxu1  ;;  %v4902_v6 = vpop.f32.mrf.mxu0  ;;  %3886 = vmatmul.mubr.msk.bf16.gmra.mxu1 %vm405_vm2, %v2344_v53 }
 0x244   : > { %v1613_v3 = vadd.f32 %v1548_v30, %v1431_v62  ;;  %3889 = vmatprep.mubr.msk.bf16.mxu1 %vm4097_vm1, %v4096_v1  ;;  %1428 = vst.msk [vmem:[#allocation3 + $0x88] sm:$0xff] %vm405_vm2, %v1410_v9 }
 0x245   : > { %v3711_v41 = vpop.f32.mrf.mxu1  ;;  %v3822_v17 = vpop.f32.mrf.mxu0  ;;  %v1647_v38 = vld [vmem:[#allocation3] sm:$0xff] }
 0x246   : > { %1631 = vst.msk [vmem:[#allocation3 + $0x10] sm:$0xff] %vm405_vm2, %v1613_v3  ;;  %v1829_v23 = vadd.f32 %v4764_v35, %v1647_v38  ;;  %v1437_v41 = vld [vmem:[#allocation3 + $0x40] sm:$0xff] }
 0x247   : > { %v1551_v25 = vpop.f32.mrf.mxu1  ;;  %v4910_v13 = vpop.f32.mrf.mxu0 }
 0x248   : > { %v1614_v40 = vadd.f32 %v1551_v25, %v1432_v22  ;;  %1847 = vst.msk [vmem:[#allocation3] sm:$0xff] %vm405_vm2, %v1829_v23  ;;  %v1438_v25 = vld [vmem:[#allocation3 + $0x48] sm:$0xff] }
 0x249   : > { %v3712_v10 = vpop.f32.mrf.mxu1  ;;  %v3825_v43 = vpop.f32.mrf.mxu0  ;;  %v1648_v20 = vld [vmem:[#allocation3 + $0x8] sm:$0xff] }
 0x24a   : > { %1632 = vst.msk [vmem:[#allocation3 + $0x18] sm:$0xff] %vm405_vm2, %v1614_v40  ;;  %v1830_v26 = vadd.f32 %v4770_v56, %v1648_v20  ;;  %v1434_v56 = vld [vmem:[#allocation3 + $0x28] sm:$0xff] }
 0x24b   : > { %v1556_v50 = vpop.f32.mrf.mxu1  ;;  %v4915_v44 = vpop.f32.mrf.mxu0  ;;  %3890 = vmatmul.mubr.msk.bf16.gmra.mxu1 %vm405_vm2, %v2345_v19 }
 0x24c   : > { %v1615_v35 = vadd.f32 %v1556_v50, %v1433_v4  ;;  %1848 = vst.msk [vmem:[#allocation3 + $0x8] sm:$0xff] %vm405_vm2, %v1830_v26  ;;  %3933 = vmatprep.mubr.msk.bf16.mxu1 %vm4097_vm1, %v4096_v1  ;;  %v1439_v4 = vld [vmem:[#allocation3 + $0x50] sm:$0xff] }
 0x24d   : > { %v3715_v51 = vpop.f32.mrf.mxu1  ;;  %v3826_v31 = vpop.f32.mrf.mxu0  ;;  %v1649_v54 = vld [vmem:[#allocation3 + $0x10] sm:$0xff] }
 0x24e   : > { %1633 = vst.msk [vmem:[#allocation3 + $0x20] sm:$0xff] %vm405_vm2, %v1615_v35  ;;  %v1831_v52 = vadd.f32 %v4778_v27, %v1649_v54  ;;  %v3372_v51 = vld [vmem:[%s4208_s26 + $0x13] sm:$0xff] }
 0x24f   : > { %v1559_v14 = vpop.f32.mrf.mxu1  ;;  %v4923_v57 = vpop.f32.mrf.mxu0 }
 0x250   : > { %v1616_v11 = vadd.f32 %v1559_v14, %v1434_v56  ;;  %1849 = vst.msk [vmem:[#allocation3 + $0x10] sm:$0xff] %vm405_vm2, %v1831_v52 }
 0x251   : > { %v3716_v29 = vpop.f32.mrf.mxu1  ;;  %v3829_v28 = vpop.f32.mrf.mxu0  ;;  %v1650_v58 = vld [vmem:[#allocation3 + $0x18] sm:$0xff] }
 0x252   : > { %1634 = vst.msk [vmem:[#allocation3 + $0x28] sm:$0xff] %vm405_vm2, %v1616_v11  ;;  %v1832_v33 = vadd.f32 %v4786_v59, %v1650_v58 }
 0x253   : > { %v1564_v60 = vpop.f32.mrf.mxu1  ;;  %v4928_v0 = vpop.f32.mrf.mxu0 }
 0x254   : > { %v1617_v2 = vadd.f32 %v1564_v60, %v1435_v63  ;;  %1850 = vst.msk [vmem:[#allocation3 + $0x18] sm:$0xff] %vm405_vm2, %v1832_v33 }
 0x255   : > { %v3719_v27 = vpop.f32.mrf.mxu1  ;;  %v3830_v18 = vpop.f32.mrf.mxu0  ;;  %v1651_v5 = vld [vmem:[#allocation3 + $0x20] sm:$0xff] }
 0x256   : > { %1635 = vst.msk [vmem:[#allocation3 + $0x30] sm:$0xff] %vm405_vm2, %v1617_v2  ;;  %v1833_v16 = vadd.f32 %v4795_v7, %v1651_v5  ;;  %v1441_v2 = vld [vmem:[#allocation3 + $0x60] sm:$0xff] }
 0x257   : > { %v1567_v53 = vpop.f32.mrf.mxu1  ;;  %v4933_v42 = vpop.f32.mrf.mxu0  ;;  %v3374_v5 = vld [vmem:[%s4208_s26 + $0x23] sm:$0xff] }
 0x258   : > { %v1618_v9 = vadd.f32 %v1567_v53, %v1436_v12  ;;  %1851 = vst.msk [vmem:[#allocation3 + $0x20] sm:$0xff] %vm405_vm2, %v1833_v16  ;;  %v3375_v16 = vld [vmem:[%s4208_s26 + $0x2b] sm:$0xff] }
 0x259   : > { %v3720_v59 = vpop.f32.mrf.mxu1  ;;  %v3833_v62 = vpop.f32.mrf.mxu0  ;;  %v1652_v30 = vld [vmem:[#allocation3 + $0x28] sm:$0xff]  ;;  %v2828_v53 = vpack.c.bf16 %v3375_v16, %v3374_v5 }
 0x25a   : > { %1636 = vst.msk [vmem:[#allocation3 + $0x38] sm:$0xff] %vm405_vm2, %v1618_v9  ;;  %v1834_v3 = vadd.f32 %v4803_v34, %v1652_v30 }
 0x25b   : > { %v1572_v17 = vpop.f32.mrf.mxu1  ;;  %v4938_v38 = vpop.f32.mrf.mxu0 }
 0x25c   : > { %v1619_v15 = vadd.f32 %v1572_v17, %v1437_v41  ;;  %1852 = vst.msk [vmem:[#allocation3 + $0x28] sm:$0xff] %vm405_vm2, %v1834_v3 }
 0x25d   : > { %v3723_v7 = vpop.f32.mrf.mxu1  ;;  %v3834_v39 = vpop.f32.mrf.mxu0  ;;  %v1653_v23 = vld [vmem:[#allocation3 + $0x30] sm:$0xff] }
 0x25e   : > { %1637 = vst.msk [vmem:[#allocation3 + $0x40] sm:$0xff] %vm405_vm2, %v1619_v15  ;;  %v1835_v22 = vadd.f32 %v4811_v45, %v1653_v23  ;;  %v3373_v45 = vld [vmem:[%s4208_s26 + $0x1b] sm:$0xff] }
 0x25f   : > { %v1575_v40 = vpop.f32.mrf.mxu1  ;;  %v4943_v10 = vpop.f32.mrf.mxu0  ;;  %v2827_v54 = vpack.c.bf16 %v3373_v45, %v3372_v51  ;;  %v1443_v23 = vld [vmem:[#allocation3 + $0x70] sm:$0xff] }
 0x260   : > { %v1620_v34 = vadd.f32 %v1575_v40, %v1438_v25  ;;  %1853 = vst.msk [vmem:[#allocation3 + $0x30] sm:$0xff] %vm405_vm2, %v1835_v22  ;;  %v3376_v40 = vld [vmem:[%s4208_s26 + $0x33] sm:$0xff] }
 0x261   : > { %v3724_v43 = vpop.f32.mrf.mxu1  ;;  %v3837_v19 = vpop.f32.mrf.mxu0  ;;  %v1654_v20 = vld [vmem:[#allocation3 + $0x38] sm:$0xff]  ;;  %3934 = vmatmul.mubr.msk.bf16.vlgmr.msra.gmra.mxu1 %vm405_vm2, %v2827_v54 }
 0x262   : > { %1638 = vst.msk [vmem:[#allocation3 + $0x48] sm:$0xff] %vm405_vm2, %v1620_v34  ;;  %v1836_v26 = vadd.f32 %v4816_v55, %v1654_v20  ;;  %v1440_v55 = vld [vmem:[#allocation3 + $0x58] sm:$0xff]  ;;  %3937 = vmatprep.mubr.msk.bf16.mxu1 %vm4097_vm1, %v4096_v1 }
 0x263   : > { %v1580_v50 = vpop.f32.mrf.mxu1  ;;  %v4948_v35 = vpop.f32.mrf.mxu0  ;;  %v3377_v34 = vld [vmem:[%s4208_s26 + $0x3b] sm:$0xff] }
 0x264   : > { %v1621_v31 = vadd.f32 %v1580_v50, %v1439_v4  ;;  %1854 = vst.msk [vmem:[#allocation3 + $0x38] sm:$0xff] %vm405_vm2, %v1836_v26  ;;  %v2829_v19 = vpack.c.bf16 %v3377_v34, %v3376_v40 }
 0x265   : > { %v3727_v52 = vpop.f32.mrf.mxu1  ;;  %v3838_v56 = vpop.f32.mrf.mxu0  ;;  %v1655_v14 = vld [vmem:[#allocation3 + $0x40] sm:$0xff] }
 0x266   : > { %1639 = vst.msk [vmem:[#allocation3 + $0x50] sm:$0xff] %vm405_vm2, %v1621_v31  ;;  %v1837_v11 = vadd.f32 %v4824_v61, %v1655_v14  ;;  %v1445_v14 = vld [vmem:[#allocation3 + $0x80] sm:$0xff] }
 0x267   : > { %v1583_v29 = vpop.f32.mrf.mxu1  ;;  %v4956_v28 = vpop.f32.mrf.mxu0 }
 0x268   : > { %v1622_v58 = vadd.f32 %v1583_v29, %v1440_v55  ;;  %1855 = vst.msk [vmem:[#allocation3 + $0x40] sm:$0xff] %vm405_vm2, %v1837_v11  ;;  %v3378_v29 = vld [vmem:[%s4208_s26 + $0x43] sm:$0xff] }
 0x269   : > { %v3728_v33 = vpop.f32.mrf.mxu1  ;;  %v3841_v63 = vpop.f32.mrf.mxu0  ;;  %v1656_v60 = vld [vmem:[#allocation3 + $0x48] sm:$0xff]  ;;  %3938 = vmatmul.mubr.msk.bf16.gmra.mxu1 %vm405_vm2, %v2828_v53 }
 0x26a   : > { %1640 = vst.msk [vmem:[#allocation3 + $0x58] sm:$0xff] %vm405_vm2, %v1622_v58  ;;  %v1838_v61 = vadd.f32 %v4829_v8, %v1656_v60  ;;  %v1442_v8 = vld [vmem:[#allocation3 + $0x68] sm:$0xff]  ;;  %3941 = vmatprep.mubr.msk.bf16.mxu1 %vm4097_vm1, %v4096_v1 }
 0x26b   : > { %v1588_v27 = vpop.f32.mrf.mxu1  ;;  %v4963_v18 = vpop.f32.mrf.mxu0  ;;  %v3379_v58 = vld [vmem:[%s4208_s26 + $0x4b] sm:$0xff] }
 0x26c   : > { %v1623_v12 = vadd.f32 %v1588_v27, %v1441_v2  ;;  %1856 = vst.msk [vmem:[#allocation3 + $0x48] sm:$0xff] %vm405_vm2, %v1838_v61  ;;  %v2830_v63 = vpack.c.bf16 %v3379_v58, %v3378_v29 }
 0x26d   : > { %v3731_v9 = vpop.f32.mrf.mxu1  ;;  %v3842_v59 = vpop.f32.mrf.mxu0  ;;  %v1657_v62 = vld [vmem:[#allocation3 + $0x50] sm:$0xff] }
 0x26e   : > { %1641 = vst.msk [vmem:[#allocation3 + $0x60] sm:$0xff] %vm405_vm2, %v1623_v12  ;;  %v1839_v30 = vadd.f32 %v4837_v24, %v1657_v62  ;;  %v1865_v62 = vld [vmem:[#allocation3] sm:$0xff] }
 0x26f   : > { %v1591_v3 = vpop.f32.mrf.mxu1  ;;  %v4971_v41 = vpop.f32.mrf.mxu0 }
 0x270   : > { %v1624_v17 = vadd.f32 %v1591_v3, %v1442_v8  ;;  %1857 = vst.msk [vmem:[#allocation3 + $0x50] sm:$0xff] %vm405_vm2, %v1839_v30  ;;  %v3380_v3 = vld [vmem:[%s4208_s26 + $0x53] sm:$0xff] }
 0x271   : > { %v3732_v15 = vpop.f32.mrf.mxu1  ;;  %v3845_v7 = vpop.f32.mrf.mxu0  ;;  %v1658_v39 = vld [vmem:[#allocation3 + $0x58] sm:$0xff]  ;;  %3942 = vmatmul.mubr.msk.bf16.gmra.mxu1 %vm405_vm2, %v2829_v19 }
 0x272   : > { %1642 = vst.msk [vmem:[#allocation3 + $0x68] sm:$0xff] %vm405_vm2, %v1624_v17  ;;  %v1840_v24 = vadd.f32 %v4848_v46, %v1658_v39  ;;  %v1444_v46 = vld [vmem:[#allocation3 + $0x78] sm:$0xff]  ;;  %3945 = vmatprep.mubr.msk.bf16.mxu1 %vm4097_vm1, %v4096_v1 }
 0x273   : > { %v1596_v22 = vpop.f32.mrf.mxu1  ;;  %v4978_v25 = vpop.f32.mrf.mxu0  ;;  %v3381_v17 = vld [vmem:[%s4208_s26 + $0x5b] sm:$0xff] }
 0x274   : > { %v1625_v43 = vadd.f32 %v1596_v22, %v1443_v23  ;;  %1858 = vst.msk [vmem:[#allocation3 + $0x58] sm:$0xff] %vm405_vm2, %v1840_v24  ;;  %v2831_v7 = vpack.c.bf16 %v3381_v17, %v3380_v3 }
 0x275   : > { %v3735_v20 = vpop.f32.mrf.mxu1  ;;  %v3846_v26 = vpop.f32.mrf.mxu0  ;;  %v1659_v4 = vld [vmem:[#allocation3 + $0x60] sm:$0xff] }
 0x276   : > { %1643 = vst.msk [vmem:[#allocation3 + $0x70] sm:$0xff] %vm405_vm2, %v1625_v43  ;;  %v1841_v50 = vadd.f32 %v4858_v37, %v1659_v4  ;;  %v1867_v4 = vld [vmem:[#allocation3 + $0x10] sm:$0xff] }
 0x277   : > { %v1599_v51 = vpop.f32.mrf.mxu1  ;;  %v4986_v45 = vpop.f32.mrf.mxu0 }
 0x278   : > { %v1626_v31 = vadd.f32 %v1599_v51, %v1444_v46  ;;  %1859 = vst.msk [vmem:[#allocation3 + $0x60] sm:$0xff] %vm405_vm2, %v1841_v50  ;;  %v3382_v51 = vld [vmem:[%s4208_s26 + $0x63] sm:$0xff] }
 0x279   : > { %v3736_v54 = vpop.f32.mrf.mxu1  ;;  %v3849_v52 = vpop.f32.mrf.mxu0  ;;  %v1660_v56 = vld [vmem:[#allocation3 + $0x68] sm:$0xff]  ;;  %3946 = vmatmul.mubr.msk.bf16.gmra.mxu1 %vm405_vm2, %v2830_v63 }
 0x27a   : > { %1644 = vst.msk [vmem:[#allocation3 + $0x78] sm:$0xff] %vm405_vm2, %v1626_v31  ;;  %v1842_v37 = vadd.f32 %v4863_v49, %v1660_v56  ;;  %v1446_v49 = vld [vmem:[#allocation3 + $0x88] sm:$0xff]  ;;  %3949 = vmatprep.mubr.msk.bf16.mxu1 %vm4097_vm1, %v4096_v1 }
 0x27b   : > { %v1604_v11 = vpop.f32.mrf.mxu1  ;;  %v4993_v55 = vpop.f32.mrf.mxu0  ;;  %v3383_v31 = vld [vmem:[%s4208_s26 + $0x6b] sm:$0xff] }
 0x27c   : > { %v1627_v33 = vadd.f32 %v1604_v11, %v1445_v14  ;;  %1860 = vst.msk [vmem:[#allocation3 + $0x68] sm:$0xff] %vm405_vm2, %v1842_v37  ;;  %v2832_v52 = vpack.c.bf16 %v3383_v31, %v3382_v51 }
 0x27d   : > { %v3739_v60 = vpop.f32.mrf.mxu1  ;;  %v3850_v61 = vpop.f32.mrf.mxu0  ;;  %v1661_v2 = vld [vmem:[#allocation3 + $0x70] sm:$0xff] }
 0x27e   : > { %1645 = vst.msk [vmem:[#allocation3 + $0x80] sm:$0xff] %vm405_vm2, %v1627_v33  ;;  %v1843_v27 = vadd.f32 %v4871_v32, %v1661_v2  ;;  %v1869_v2 = vld [vmem:[#allocation3 + $0x20] sm:$0xff] }
 0x27f   : > { %v1607_v5 = vpop.f32.mrf.mxu1  ;;  %v5001_v16 = vpop.f32.mrf.mxu0 }
 0x280   : > { %v1628_v12 = vadd.f32 %v1607_v5, %v1446_v49  ;;  %1861 = vst.msk [vmem:[#allocation3 + $0x70] sm:$0xff] %vm405_vm2, %v1843_v27  ;;  %v3384_v5 = vld [vmem:[%s4208_s26 + $0x73] sm:$0xff] }
 0x281   : > { %v3740_v53 = vpop.f32.mrf.mxu1  ;;  %v3853_v9 = vpop.f32.mrf.mxu0  ;;  %v1662_v59 = vld [vmem:[#allocation3 + $0x78] sm:$0xff]  ;;  %3950 = vmatmul.mubr.msk.bf16.gmra.mxu1 %vm405_vm2, %v2831_v7 }
 0x282   : > { %1646 = vst.msk [vmem:[#allocation3 + $0x88] sm:$0xff] %vm405_vm2, %v1628_v12  ;;  %v1844_v32 = vadd.f32 %v4876_v47, %v1662_v59  ;;  %v1866_v47 = vld [vmem:[#allocation3 + $0x8] sm:$0xff]  ;;  %3953 = vmatprep.mubr.msk.bf16.mxu1 %vm4097_vm1, %v4096_v1  ;;  %v3385_v12 = vld [vmem:[%s4208_s26 + $0x7b] sm:$0xff] }
 0x283   : > { %v1976_v30 = vpop.f32.mrf.mxu1  ;;  %v5008_v8 = vpop.f32.mrf.mxu0  ;;  %v2833_v9 = vpack.c.bf16 %v3385_v12, %v3384_v5 }
 0x284   : > { %v2047_v15 = vadd.f32 %v1976_v30, %v1865_v62  ;;  %1862 = vst.msk [vmem:[#allocation3 + $0x78] sm:$0xff] %vm405_vm2, %v1844_v32 }
 0x285   : > { %v3783_v39 = vpop.f32.mrf.mxu1  ;;  %v3854_v24 = vpop.f32.mrf.mxu0  ;;  %v1663_v23 = vld [vmem:[#allocation3 + $0x80] sm:$0xff] }
 0x286   : > { %2065 = vst.msk [vmem:[#allocation3] sm:$0xff] %vm405_vm2, %v2047_v15  ;;  %v1845_v22 = vadd.f32 %v4884_v48, %v1663_v23  ;;  %v1871_v23 = vld [vmem:[#allocation3 + $0x30] sm:$0xff] }
 0x287   : > { %v1979_v40 = vpop.f32.mrf.mxu1  ;;  %v5016_v34 = vpop.f32.mrf.mxu0 }
 0x288   : > { %v2048_v43 = vadd.f32 %v1979_v40, %v1866_v47  ;;  %1863 = vst.msk [vmem:[#allocation3 + $0x80] sm:$0xff] %vm405_vm2, %v1845_v22  ;;  %v3386_v40 = vld [vmem:[%s4208_s26 + $0x83] sm:$0xff] }
 0x289   : > { %v3784_v19 = vpop.f32.mrf.mxu1  ;;  %v3897_v20 = vpop.f32.mrf.mxu0  ;;  %v1664_v26 = vld [vmem:[#allocation3 + $0x88] sm:$0xff]  ;;  %3954 = vmatmul.mubr.msk.bf16.gmra.mxu1 %vm405_vm2, %v2832_v52 }
 0x28a   : > { %2066 = vst.msk [vmem:[#allocation3 + $0x8] sm:$0xff] %vm405_vm2, %v2048_v43  ;;  %v1846_v48 = vadd.f32 %v4889_v21, %v1664_v26  ;;  %v1868_v21 = vld [vmem:[#allocation3 + $0x18] sm:$0xff]  ;;  %3957 = vmatprep.mubr.msk.bf16.mxu1 %vm4097_vm1, %v4096_v1  ;;  %v3387_v43 = vld [vmem:[%s4208_s26 + $0x8b] sm:$0xff] }
 0x28b   : > { %v1984_v50 = vpop.f32.mrf.mxu1  ;;  %v5023_v46 = vpop.f32.mrf.mxu0  ;;  %v2834_v20 = vpack.c.bf16 %v3387_v43, %v3386_v40 }
 0x28c   : > { %v2049_v54 = vadd.f32 %v1984_v50, %v1867_v4  ;;  %1864 = vst.msk [vmem:[#allocation3 + $0x88] sm:$0xff] %vm405_vm2, %v1846_v48 }
 0x28d   : > { %v3787_v56 = vpop.f32.mrf.mxu1  ;;  %v3898_v37 = vpop.f32.mrf.mxu0  ;;  %v2083_v14 = vld [vmem:[#allocation3] sm:$0xff] }
 0x28e   : > { %2067 = vst.msk [vmem:[#allocation3 + $0x10] sm:$0xff] %vm405_vm2, %v2049_v54  ;;  %v2265_v11 = vadd.f32 %v4897_v36, %v2083_v14 }
 0x28f   : > { %v1987_v29 = vpop.f32.mrf.mxu1  ;;  %v5031_v58 = vpop.f32.mrf.mxu0 }
 0x290   : > { %v2050_v33 = vadd.f32 %v1987_v29, %v1868_v21  ;;  %2283 = vst.msk [vmem:[#allocation3] sm:$0xff] %vm405_vm2, %v2265_v11  ;;  %v3389_v11 = vld [vmem:[%s4208_s26 + $0x9b] sm:$0xff]  ;;  %v1873_v21 = vld [vmem:[#allocation3 + $0x40] sm:$0xff] }
 0x291   : > { %v3788_v63 = vpop.f32.mrf.mxu1  ;;  %v3901_v60 = vpop.f32.mrf.mxu0  ;;  %v2084_v61 = vld [vmem:[#allocation3 + $0x8] sm:$0xff]  ;;  %3958 = vmatmul.mubr.msk.bf16.gmra.mxu1 %vm405_vm2, %v2833_v9 }
 0x292   : > { %2068 = vst.msk [vmem:[#allocation3 + $0x18] sm:$0xff] %vm405_vm2, %v2050_v33  ;;  %v2266_v36 = vadd.f32 %v4902_v6, %v2084_v61  ;;  %v1870_v6 = vld [vmem:[#allocation3 + $0x28] sm:$0xff]  ;;  %3961 = vmatprep.mubr.msk.bf16.mxu1 %vm4097_vm1, %v4096_v1 }
 0x293   : > { %v1992_v27 = vpop.f32.mrf.mxu1  ;;  %v5038_v49 = vpop.f32.mrf.mxu0 }
 0x294   : > { %v2051_v53 = vadd.f32 %v1992_v27, %v1869_v2  ;;  %2284 = vst.msk [vmem:[#allocation3 + $0x8] sm:$0xff] %vm405_vm2, %v2266_v36 }
 0x295   : > { %v3791_v59 = vpop.f32.mrf.mxu1  ;;  %v3902_v32 = vpop.f32.mrf.mxu0  ;;  %v2085_v62 = vld [vmem:[#allocation3 + $0x10] sm:$0xff] }
 0x296   : > { %2069 = vst.msk [vmem:[#allocation3 + $0x20] sm:$0xff] %vm405_vm2, %v2051_v53  ;;  %v2267_v30 = vadd.f32 %v4910_v13, %v2085_v62 }
 0x297   : > { %v1995_v3 = vpop.f32.mrf.mxu1  ;;  %v5046_v17 = vpop.f32.mrf.mxu0 }
 0x298   : > { %v2052_v15 = vadd.f32 %v1995_v3, %v1870_v6  ;;  %2285 = vst.msk [vmem:[#allocation3 + $0x10] sm:$0xff] %vm405_vm2, %v2267_v30  ;;  %v1875_v30 = vld [vmem:[#allocation3 + $0x50] sm:$0xff] }
 0x299   : > { %v3792_v7 = vpop.f32.mrf.mxu1  ;;  %v3905_v39 = vpop.f32.mrf.mxu0  ;;  %v2086_v24 = vld [vmem:[#allocation3 + $0x18] sm:$0xff]  ;;  %3962 = vmatmul.mubr.msk.bf16.gmra.mxu1 %vm405_vm2, %v2834_v20 }
 0x29a   : > { %2070 = vst.msk [vmem:[#allocation3 + $0x28] sm:$0xff] %vm405_vm2, %v2052_v15  ;;  %v2268_v13 = vadd.f32 %v4915_v44, %v2086_v24  ;;  %v1872_v44 = vld [vmem:[#allocation3 + $0x38] sm:$0xff]  ;;  %3965 = vmatprep.mubr.msk.bf16.mxu1 %vm4097_vm1, %v4096_v1 }
 0x29b   : > { %v2000_v22 = vpop.f32.mrf.mxu1  ;;  %v5053_v47 = vpop.f32.mrf.mxu0 }
 0x29c   : > { %v2053_v19 = vadd.f32 %v2000_v22, %v1871_v23  ;;  %2286 = vst.msk [vmem:[#allocation3 + $0x18] sm:$0xff] %vm405_vm2, %v2268_v13  ;;  %v1876_v13 = vld [vmem:[#allocation3 + $0x58] sm:$0xff] }
 0x29d   : > { %v3795_v26 = vpop.f32.mrf.mxu1  ;;  %v3906_v48 = vpop.f32.mrf.mxu0  ;;  %v2087_v4 = vld [vmem:[#allocation3 + $0x20] sm:$0xff] }
 0x29e   : > { %2071 = vst.msk [vmem:[#allocation3 + $0x30] sm:$0xff] %vm405_vm2, %v2053_v19  ;;  %v2269_v50 = vadd.f32 %v4923_v57, %v2087_v4  ;;  %v3388_v57 = vld [vmem:[%s4208_s26 + $0x93] sm:$0xff]  ;;  %v1877_v26 = vld [vmem:[#allocation3 + $0x60] sm:$0xff] }
 0x29f   : > { %v2003_v51 = vpop.f32.mrf.mxu1  ;;  %v5061_v31 = vpop.f32.mrf.mxu0  ;;  %v2835_v63 = vpack.c.bf16 %v3389_v11, %v3388_v57 }
 0x2a0   : > { %v2054_v54 = vadd.f32 %v2003_v51, %v1872_v44  ;;  %2287 = vst.msk [vmem:[#allocation3 + $0x20] sm:$0xff] %vm405_vm2, %v2269_v50 }
 0x2a1   : > { %v3796_v52 = vpop.f32.mrf.mxu1  ;;  %v3909_v56 = vpop.f32.mrf.mxu0  ;;  %v2088_v37 = vld [vmem:[#allocation3 + $0x28] sm:$0xff]  ;;  %3966 = vmatmul.mubr.msk.bf16.gmra.mxu1 %vm405_vm2, %v2835_v63 }
 0x2a2   : > { %2072 = vst.msk [vmem:[#allocation3 + $0x38] sm:$0xff] %vm405_vm2, %v2054_v54  ;;  %v2270_v14 = vadd.f32 %v4928_v0, %v2088_v37  ;;  %v1874_v0 = vld [vmem:[#allocation3 + $0x48] sm:$0xff] }
 0x2a3   : > { %v2008_v29 = vpop.f32.mrf.mxu1  ;;  %v5070_v33 = vpop.f32.mrf.mxu0  ;;  %v1878_v52 = vld [vmem:[#allocation3 + $0x68] sm:$0xff] }
 0x2a4   : > { %v2055_v60 = vadd.f32 %v2008_v29, %v1873_v21  ;;  %2288 = vst.msk [vmem:[#allocation3 + $0x28] sm:$0xff] %vm405_vm2, %v2270_v14  ;;  %v1879_v29 = vld [vmem:[#allocation3 + $0x70] sm:$0xff] }
 0x2a5   : > { %v3799_v61 = vpop.f32.mrf.mxu1  ;;  %v3910_v36 = vpop.f32.mrf.mxu0  ;;  %v2089_v2 = vld [vmem:[#allocation3 + $0x30] sm:$0xff] }
 0x2a6   : > { %2073 = vst.msk [vmem:[#allocation3 + $0x40] sm:$0xff] %vm405_vm2, %v2055_v60  ;;  %v2271_v27 = vadd.f32 %v4933_v42, %v2089_v2 }
 0x2a7   : > { %v2011_v5 = vpop.f32.mrf.mxu1  ;;  %v5076_v12 = vpop.f32.mrf.mxu0 }
 0x2a8   : > { %v2056_v53 = vadd.f32 %v2011_v5, %v1874_v0  ;;  %2289 = vst.msk [vmem:[#allocation3 + $0x30] sm:$0xff] %vm405_vm2, %v2271_v27  ;;  %v1880_v0 = vld [vmem:[#allocation3 + $0x78] sm:$0xff] }
 0x2a9   : > { %v3800_v9 = vpop.f32.mrf.mxu1  ;;  %v3913_v59 = vpop.f32.mrf.mxu0  ;;  %v2090_v32 = vld [vmem:[#allocation3 + $0x38] sm:$0xff] }
 0x2aa   : > { %2074 = vst.msk [vmem:[#allocation3 + $0x48] sm:$0xff] %vm405_vm2, %v2056_v53  ;;  %v2272_v62 = vadd.f32 %v4938_v38, %v2090_v32 }
 0x2ab   : > { %v2016_v6 = vpop.f32.mrf.mxu1  ;;  %v5081_v3 = vpop.f32.mrf.mxu0 }
 0x2ac   : > { %v2057_v42 = vadd.f32 %v2016_v6, %v1875_v30  ;;  %2290 = vst.msk [vmem:[#allocation3 + $0x38] sm:$0xff] %vm405_vm2, %v2272_v62  ;;  %v1881_v30 = vld [vmem:[#allocation3 + $0x80] sm:$0xff] }
 0x2ad   : > { %v3803_v15 = vpop.f32.mrf.mxu1  ;;  %v3914_v7 = vpop.f32.mrf.mxu0  ;;  %v2091_v39 = vld [vmem:[#allocation3 + $0x40] sm:$0xff] }
 0x2ae   : > { %2075 = vst.msk [vmem:[#allocation3 + $0x50] sm:$0xff] %vm405_vm2, %v2057_v42  ;;  %v2273_v24 = vadd.f32 %v4943_v10, %v2091_v39 }
 0x2af   : > { %v2019_v23 = vpop.f32.mrf.mxu1  ;;  %v5086_v22 = vpop.f32.mrf.mxu0 }
 0x2b0   : > { %v2058_v40 = vadd.f32 %v2019_v23, %v1876_v13  ;;  %2291 = vst.msk [vmem:[#allocation3 + $0x40] sm:$0xff] %vm405_vm2, %v2273_v24  ;;  %v1882_v13 = vld [vmem:[#allocation3 + $0x88] sm:$0xff] }
 0x2b1   : > { %v3804_v38 = vpop.f32.mrf.mxu1  ;;  %v3917_v43 = vpop.f32.mrf.mxu0  ;;  %v2092_v19 = vld [vmem:[#allocation3 + $0x48] sm:$0xff] }
 0x2b2   : > { %2076 = vst.msk [vmem:[#allocation3 + $0x58] sm:$0xff] %vm405_vm2, %v2058_v40  ;;  %v2274_v20 = vadd.f32 %v4948_v35, %v2092_v19 }
 0x2b3   : > { %v2024_v48 = vpop.f32.mrf.mxu1  ;;  %v5091_v4 = vpop.f32.mrf.mxu0 }
 0x2b4   : > { %v2059_v50 = vadd.f32 %v2024_v48, %v1877_v26  ;;  %2292 = vst.msk [vmem:[#allocation3 + $0x48] sm:$0xff] %vm405_vm2, %v2274_v20  ;;  %v2301_v26 = vld [vmem:[#allocation3] sm:$0xff] }
 0x2b5   : > { %v3807_v10 = vpop.f32.mrf.mxu1  ;;  %v3918_v44 = vpop.f32.mrf.mxu0  ;;  %v2093_v51 = vld [vmem:[#allocation3 + $0x50] sm:$0xff] }
 0x2b6   : > { %2077 = vst.msk [vmem:[#allocation3 + $0x60] sm:$0xff] %vm405_vm2, %v2059_v50  ;;  %v2275_v54 = vadd.f32 %v4956_v28, %v2093_v51 }
 0x2b7   : > { %v2027_v56 = vpop.f32.mrf.mxu1  ;;  %v5096_v37 = vpop.f32.mrf.mxu0 }
 0x2b8   : > { %v2060_v14 = vadd.f32 %v2027_v56, %v1878_v52  ;;  %2293 = vst.msk [vmem:[#allocation3 + $0x50] sm:$0xff] %vm405_vm2, %v2275_v54  ;;  %v2302_v52 = vld [vmem:[#allocation3 + $0x8] sm:$0xff] }
 0x2b9   : > { %v3808_v35 = vpop.f32.mrf.mxu1  ;;  %v3921_v57 = vpop.f32.mrf.mxu0  ;;  %v2094_v11 = vld [vmem:[#allocation3 + $0x58] sm:$0xff] }
 0x2ba   : > { %2078 = vst.msk [vmem:[#allocation3 + $0x68] sm:$0xff] %vm405_vm2, %v2060_v14  ;;  %v2276_v21 = vadd.f32 %v4963_v18, %v2094_v11  ;;  %v2303_v11 = vld [vmem:[#allocation3 + $0x10] sm:$0xff] }
 0x2bb   : > { %v2032_v63 = vpop.f32.mrf.mxu1  ;;  %v5101_v60 = vpop.f32.mrf.mxu0 }
 0x2bc   : > { %v2061_v61 = vadd.f32 %v2032_v63, %v1879_v29  ;;  %2294 = vst.msk [vmem:[#allocation3 + $0x58] sm:$0xff] %vm405_vm2, %v2276_v21 }
 0x2bd   : > { %v3811_v28 = vpop.f32.mrf.mxu1  ;;  %v3922_v36 = vpop.f32.mrf.mxu0  ;;  %v2095_v2 = vld [vmem:[#allocation3 + $0x60] sm:$0xff] }
 0x2be   : > { %2079 = vst.msk [vmem:[#allocation3 + $0x70] sm:$0xff] %vm405_vm2, %v2061_v61  ;;  %v2277_v27 = vadd.f32 %v4971_v41, %v2095_v2  ;;  %v2304_v28 = vld [vmem:[#allocation3 + $0x18] sm:$0xff] }
 0x2bf   : > { %v2035_v5 = vpop.f32.mrf.mxu1  ;;  %v5106_v53 = vpop.f32.mrf.mxu0 }
 0x2c0   : > { %v2062_v9 = vadd.f32 %v2035_v5, %v1880_v0  ;;  %2295 = vst.msk [vmem:[#allocation3 + $0x60] sm:$0xff] %vm405_vm2, %v2277_v27  ;;  %v2305_v5 = vld [vmem:[#allocation3 + $0x20] sm:$0xff] }
 0x2c1   : > { %v3812_v18 = vpop.f32.mrf.mxu1  ;;  %v3925_v59 = vpop.f32.mrf.mxu0  ;;  %v2096_v32 = vld [vmem:[#allocation3 + $0x68] sm:$0xff] }
 0x2c2   : > { %2080 = vst.msk [vmem:[#allocation3 + $0x78] sm:$0xff] %vm405_vm2, %v2062_v9  ;;  %v2278_v62 = vadd.f32 %v4978_v25, %v2096_v32 }
 0x2c3   : > { %v2040_v6 = vpop.f32.mrf.mxu1  ;;  %v5111_v42 = vpop.f32.mrf.mxu0 }
 0x2c4   : > { %v2063_v15 = vadd.f32 %v2040_v6, %v1881_v30  ;;  %2296 = vst.msk [vmem:[#allocation3 + $0x68] sm:$0xff] %vm405_vm2, %v2278_v62  ;;  %v2306_v62 = vld [vmem:[#allocation3 + $0x28] sm:$0xff] }
 0x2c5   : > { %v3815_v41 = vpop.f32.mrf.mxu1  ;;  %v3926_v7 = vpop.f32.mrf.mxu0  ;;  %v2097_v39 = vld [vmem:[#allocation3 + $0x70] sm:$0xff] }
 0x2c6   : > { %2081 = vst.msk [vmem:[#allocation3 + $0x80] sm:$0xff] %vm405_vm2, %v2063_v15  ;;  %v2279_v24 = vadd.f32 %v4986_v45, %v2097_v39 }
 0x2c7   : > { %v2043_v23 = vpop.f32.mrf.mxu1  ;;  %v5116_v40 = vpop.f32.mrf.mxu0 }
 0x2c8   : > { %v2064_v38 = vadd.f32 %v2043_v23, %v1882_v13  ;;  %2297 = vst.msk [vmem:[#allocation3 + $0x70] sm:$0xff] %vm405_vm2, %v2279_v24  ;;  %v2307_v24 = vld [vmem:[#allocation3 + $0x30] sm:$0xff] }
 0x2c9   : > { %v3816_v25 = vpop.f32.mrf.mxu1  ;;  %v3929_v43 = vpop.f32.mrf.mxu0  ;;  %v2098_v19 = vld [vmem:[#allocation3 + $0x78] sm:$0xff] }
 0x2ca   : > { %2082 = vst.msk [vmem:[#allocation3 + $0x88] sm:$0xff] %vm405_vm2, %v2064_v38  ;;  %v2280_v20 = vadd.f32 %v4993_v55, %v2098_v19 }
 0x2cb   : > { %v2412_v48 = vpop.f32.mrf.mxu1  ;;  %v5121_v50 = vpop.f32.mrf.mxu0 }
 0x2cc   : > { %v2483_v10 = vadd.f32 %v2412_v48, %v2301_v26  ;;  %2298 = vst.msk [vmem:[#allocation3 + $0x78] sm:$0xff] %vm405_vm2, %v2280_v20  ;;  %v2308_v48 = vld [vmem:[#allocation3 + $0x38] sm:$0xff] }
 0x2cd   : > { %v3859_v45 = vpop.f32.mrf.mxu1  ;;  %v3930_v44 = vpop.f32.mrf.mxu0  ;;  %v2099_v51 = vld [vmem:[#allocation3 + $0x80] sm:$0xff] }
 0x2ce   : > { %2501 = vst.msk [vmem:[#allocation3] sm:$0xff] %vm405_vm2, %v2483_v10  ;;  %v2281_v54 = vadd.f32 %v5001_v16, %v2099_v51 }
 0x2cf   : > { %v2415_v56 = vpop.f32.mrf.mxu1 }
 0x2d0   : > { %v2484_v14 = vadd.f32 %v2415_v56, %v2302_v52  ;;  %2299 = vst.msk [vmem:[#allocation3 + $0x80] sm:$0xff] %vm405_vm2, %v2281_v54 }
 0x2d1   : > { %v3860_v55 = vpop.f32.mrf.mxu1  ;;  %v2100_v35 = vld [vmem:[#allocation3 + $0x88] sm:$0xff] }
 0x2d2   : > { %2502 = vst.msk [vmem:[#allocation3 + $0x8] sm:$0xff] %vm405_vm2, %v2484_v14  ;;  %v2282_v57 = vadd.f32 %v5008_v8, %v2100_v35  ;;  %v2309_v14 = vld [vmem:[#allocation3 + $0x40] sm:$0xff] }
 0x2d3   : > { %v2420_v21 = vpop.f32.mrf.mxu1 }
 0x2d4   : > { %v2485_v29 = vadd.f32 %v2420_v21, %v2303_v11  ;;  %2300 = vst.msk [vmem:[#allocation3 + $0x88] sm:$0xff] %vm405_vm2, %v2282_v57 }
 0x2d5   : > { %v2519_v63 = vld [vmem:[#allocation3] sm:$0xff]  ;;  %v3863_v61 = vpop.f32.mrf.mxu1 }
 0x2d6   : > { %v2701_v16 = vadd.f32 %v5016_v34, %v2519_v63  ;;  %2503 = vst.msk [vmem:[#allocation3 + $0x10] sm:$0xff] %vm405_vm2, %v2485_v29 }
 0x2d7   : > { %v2423_v36 = vpop.f32.mrf.mxu1 }
 0x2d8   : > { %2719 = vst.msk [vmem:[#allocation3] sm:$0xff] %vm405_vm2, %v2701_v16  ;;  %v2486_v2 = vadd.f32 %v2423_v36, %v2304_v28  ;;  %v2310_v16 = vld [vmem:[#allocation3 + $0x48] sm:$0xff] }
 0x2d9   : > { %v2520_v27 = vld [vmem:[#allocation3 + $0x8] sm:$0xff]  ;;  %v3864_v0 = vpop.f32.mrf.mxu1 }
 0x2da   : > { %v2702_v8 = vadd.f32 %v5023_v46, %v2520_v27  ;;  %2504 = vst.msk [vmem:[#allocation3 + $0x18] sm:$0xff] %vm405_vm2, %v2486_v2  ;;  %v5141_v46 = vld [vmem:[%s5355_s5] ss:$0 sm:$0xff] }
 0x2db   : > { %v2428_v9 = vpop.f32.mrf.mxu1 }
 0x2dc   : > { %2720 = vst.msk [vmem:[#allocation3 + $0x8] sm:$0xff] %vm405_vm2, %v2702_v8  ;;  %v2487_v18 = vadd.f32 %v2428_v9, %v2305_v5  ;;  %v2311_v9 = vld [vmem:[#allocation3 + $0x50] sm:$0xff] }
 0x2dd   : > { %v2521_v59 = vld [vmem:[#allocation3 + $0x10] sm:$0xff]  ;;  %v3867_v34 = vpop.f32.mrf.mxu1 }
 0x2de   : > { %v2703_v32 = vadd.f32 %v5031_v58, %v2521_v59  ;;  %2505 = vst.msk [vmem:[#allocation3 + $0x20] sm:$0xff] %vm405_vm2, %v2487_v18 }
 0x2df   : > { %v2431_v30 = vpop.f32.mrf.mxu1  ;;  %v2737_v6 = vld [vmem:[#allocation3] sm:$0xff] }
 0x2e0   : > { %2721 = vst.msk [vmem:[#allocation3 + $0x10] sm:$0xff] %vm405_vm2, %v2703_v32  ;;  %v2488_v15 = vadd.f32 %v2431_v30, %v2306_v62  ;;  %v2762_v58 = vadd.f32 %v5141_v46, %v2737_v6 }
 0x2e1   : > { %v2522_v41 = vld [vmem:[#allocation3 + $0x18] sm:$0xff]  ;;  %v3868_v7 = vpop.f32.mrf.mxu1 }
 0x2e2   : > { %v2704_v39 = vadd.f32 %v5038_v49, %v2522_v41  ;;  %2506 = vst.msk [vmem:[#allocation3 + $0x28] sm:$0xff] %vm405_vm2, %v2488_v15  ;;  %v2780_v26 = vmax.f32 %v2762_v58, 0.0  ;;  %v2312_v41 = vld [vmem:[#allocation3 + $0x58] sm:$0xff] }
 0x2e3   : > { %v2436_v13 = vpop.f32.mrf.mxu1  ;;  %v2738_v23 = vld [vmem:[#allocation3 + $0x8] sm:$0xff] }
 0x2e4   : > { %2722 = vst.msk [vmem:[#allocation3 + $0x18] sm:$0xff] %vm405_vm2, %v2704_v39  ;;  %v2489_v38 = vadd.f32 %v2436_v13, %v2307_v24  ;;  %v2763_v25 = vadd.f32 %v5141_v46, %v2738_v23 }
 0x2e5   : > { %v2523_v43 = vld [vmem:[#allocation3 + $0x20] sm:$0xff]  ;;  %v3871_v19 = vpop.f32.mrf.mxu1 }
 0x2e6   : > { %v2705_v20 = vadd.f32 %v5046_v17, %v2523_v43  ;;  %2507 = vst.msk [vmem:[#allocation3 + $0x30] sm:$0xff] %vm405_vm2, %v2489_v38  ;;  %v2781_v49 = vmax.f32 %v2763_v25, 0.0  ;;  %v2313_v25 = vld [vmem:[#allocation3 + $0x60] sm:$0xff] }
 0x2e7   : > { %v2439_v10 = vpop.f32.mrf.mxu1  ;;  %v2739_v45 = vld [vmem:[#allocation3 + $0x10] sm:$0xff] }
 0x2e8   : > { %2723 = vst.msk [vmem:[#allocation3 + $0x20] sm:$0xff] %vm405_vm2, %v2705_v20  ;;  %v2490_v44 = vadd.f32 %v2439_v10, %v2308_v48  ;;  %v2798_v51 = vpack.c.bf16 %v2781_v49, %v2780_v26  ;;  %v2764_v17 = vadd.f32 %v5141_v46, %v2739_v45 }
 0x2e9   : > { %v2524_v54 = vld [vmem:[#allocation3 + $0x28] sm:$0xff]  ;;  %v3872_v52 = vpop.f32.mrf.mxu1 }
 0x2ea   : > { %v2706_v56 = vadd.f32 %v5053_v47, %v2524_v54  ;;  %2508 = vst.msk [vmem:[#allocation3 + $0x38] sm:$0xff] %vm405_vm2, %v2490_v44  ;;  %3972 = vmatmul.mubr.msk.bf16.vlgmr.msra.gmra.mxu0 %vm405_vm2, %v2798_v51  ;;  %v2782_v63 = vmax.f32 %v2764_v17, 0.0  ;;  %v2314_v44 = vld [vmem:[#allocation3 + $0x68] sm:$0xff] }
 0x2eb   : > { %v2444_v55 = vpop.f32.mrf.mxu1  ;;  %3975 = vmatprep.mubr.msk.bf16.mxu0 %vm4097_vm1, %v4096_v1  ;;  %v2740_v35 = vld [vmem:[#allocation3 + $0x18] sm:$0xff] }
 0x2ec   : > { %2724 = vst.msk [vmem:[#allocation3 + $0x28] sm:$0xff] %vm405_vm2, %v2706_v56  ;;  %v2491_v57 = vadd.f32 %v2444_v55, %v2309_v14  ;;  %v2765_v11 = vadd.f32 %v5141_v46, %v2740_v35  ;;  %v2315_v35 = vld [vmem:[#allocation3 + $0x70] sm:$0xff] }
 0x2ed   : > { %v2525_v21 = vld [vmem:[#allocation3 + $0x30] sm:$0xff]  ;;  %v3875_v29 = vpop.f32.mrf.mxu1 }
 0x2ee   : > { %v2707_v47 = vadd.f32 %v5061_v31, %v2525_v21  ;;  %2509 = vst.msk [vmem:[#allocation3 + $0x40] sm:$0xff] %vm405_vm2, %v2491_v57  ;;  %v2783_v61 = vmax.f32 %v2765_v11, 0.0 }
 0x2ef   : > { %v2447_v28 = vpop.f32.mrf.mxu1  ;;  %v2741_v36 = vld [vmem:[#allocation3 + $0x20] sm:$0xff] }
 0x2f0   : > { %2725 = vst.msk [vmem:[#allocation3 + $0x30] sm:$0xff] %vm405_vm2, %v2707_v47  ;;  %v2492_v2 = vadd.f32 %v2447_v28, %v2310_v16  ;;  %v2799_v27 = vpack.c.bf16 %v2783_v61, %v2782_v63  ;;  %v2766_v31 = vadd.f32 %v5141_v46, %v2741_v36  ;;  %v2316_v28 = vld [vmem:[#allocation3 + $0x78] sm:$0xff] }
 0x2f1   : > { %v2526_v0 = vld [vmem:[#allocation3 + $0x38] sm:$0xff]  ;;  %v3876_v8 = vpop.f32.mrf.mxu1 }
 0x2f2   : > { %v2708_v5 = vadd.f32 %v5070_v33, %v2526_v0  ;;  %2510 = vst.msk [vmem:[#allocation3 + $0x48] sm:$0xff] %vm405_vm2, %v2492_v2  ;;  %3976 = vmatmul.mubr.msk.bf16.gmra.mxu0 %vm405_vm2, %v2799_v27  ;;  %v2784_v6 = vmax.f32 %v2766_v31, 0.0 }
 0x2f3   : > { %v2452_v18 = vpop.f32.mrf.mxu1  ;;  %3979 = vmatprep.mubr.msk.bf16.mxu0 %vm4097_vm1, %v4096_v1  ;;  %v2742_v59 = vld [vmem:[#allocation3 + $0x28] sm:$0xff] }
 0x2f4   : > { %2726 = vst.msk [vmem:[#allocation3 + $0x38] sm:$0xff] %vm405_vm2, %v2708_v5  ;;  %v2493_v34 = vadd.f32 %v2452_v18, %v2311_v9  ;;  %v2767_v32 = vadd.f32 %v5141_v46, %v2742_v59  ;;  %v2317_v9 = vld [vmem:[#allocation3 + $0x80] sm:$0xff] }
 0x2f5   : > { %v2527_v62 = vld [vmem:[#allocation3 + $0x40] sm:$0xff]  ;;  %v3879_v30 = vpop.f32.mrf.mxu1 }
 0x2f6   : > { %v2709_v33 = vadd.f32 %v5076_v12, %v2527_v62  ;;  %2511 = vst.msk [vmem:[#allocation3 + $0x50] sm:$0xff] %vm405_vm2, %v2493_v34  ;;  %v2785_v15 = vmax.f32 %v2767_v32, 0.0 }
 0x2f7   : > { %v2455_v7 = vpop.f32.mrf.mxu1  ;;  %v2743_v39 = vld [vmem:[#allocation3 + $0x30] sm:$0xff] }
 0x2f8   : > { %2727 = vst.msk [vmem:[#allocation3 + $0x40] sm:$0xff] %vm405_vm2, %v2709_v33  ;;  %v2494_v58 = vadd.f32 %v2455_v7, %v2312_v41  ;;  %v2800_v24 = vpack.c.bf16 %v2785_v15, %v2784_v6  ;;  %v2768_v12 = vadd.f32 %v5141_v46, %v2743_v39  ;;  %v2318_v15 = vld [vmem:[#allocation3 + $0x88] sm:$0xff] }
 0x2f9   : > { %v2528_v13 = vld [vmem:[#allocation3 + $0x48] sm:$0xff]  ;;  %v3880_v23 = vpop.f32.mrf.mxu1 }
 0x2fa   : > { %v2710_v38 = vadd.f32 %v5081_v3, %v2528_v13  ;;  %2512 = vst.msk [vmem:[#allocation3 + $0x58] sm:$0xff] %vm405_vm2, %v2494_v58  ;;  %3980 = vmatmul.mubr.msk.bf16.gmra.mxu0 %vm405_vm2, %v2800_v24  ;;  %v2786_v10 = vmax.f32 %v2768_v12, 0.0 }
 0x2fb   : > { %v2460_v43 = vpop.f32.mrf.mxu1  ;;  %3983 = vmatprep.mubr.msk.bf16.mxu0 %vm4097_vm1, %v4096_v1  ;;  %v2744_v19 = vld [vmem:[#allocation3 + $0x38] sm:$0xff] }
 0x2fc   : > { %2728 = vst.msk [vmem:[#allocation3 + $0x48] sm:$0xff] %vm405_vm2, %v2710_v38  ;;  %v2495_v20 = vadd.f32 %v2460_v43, %v2313_v25  ;;  %v2769_v26 = vadd.f32 %v5141_v46, %v2744_v19 }
 0x2fd   : > { %v2529_v49 = vld [vmem:[#allocation3 + $0x50] sm:$0xff]  ;;  %v3883_v48 = vpop.f32.mrf.mxu1 }
 0x2fe   : > { %v2711_v3 = vadd.f32 %v5086_v22, %v2529_v49  ;;  %2513 = vst.msk [vmem:[#allocation3 + $0x60] sm:$0xff] %vm405_vm2, %v2495_v20  ;;  %v2787_v45 = vmax.f32 %v2769_v26, 0.0 }
 0x2ff   : > { %v2463_v51 = vpop.f32.mrf.mxu1  ;;  %v2745_v54 = vld [vmem:[#allocation3 + $0x40] sm:$0xff] }
 0x300   : > { %2729 = vst.msk [vmem:[#allocation3 + $0x50] sm:$0xff] %vm405_vm2, %v2711_v3  ;;  %v2496_v52 = vadd.f32 %v2463_v51, %v2314_v44  ;;  %v2801_v56 = vpack.c.bf16 %v2787_v45, %v2786_v10  ;;  %v2770_v22 = vadd.f32 %v5141_v46, %v2745_v54 }
 0x301   : > { %v2530_v17 = vld [vmem:[#allocation3 + $0x58] sm:$0xff]  ;;  %v3884_v14 = vpop.f32.mrf.mxu1 }
 0x302   : > { %v2712_v55 = vadd.f32 %v5091_v4, %v2530_v17  ;;  %2514 = vst.msk [vmem:[#allocation3 + $0x68] sm:$0xff] %vm405_vm2, %v2496_v52  ;;  %3984 = vmatmul.mubr.msk.bf16.gmra.mxu0 %vm405_vm2, %v2801_v56  ;;  %v2788_v61 = vmax.f32 %v2770_v22, 0.0 }
 0x303   : > { %v2468_v57 = vpop.f32.mrf.mxu1  ;;  %3987 = vmatprep.mubr.msk.bf16.mxu0 %vm4097_vm1, %v4096_v1  ;;  %v2746_v11 = vld [vmem:[#allocation3 + $0x48] sm:$0xff] }
 0x304   : > { %2730 = vst.msk [vmem:[#allocation3 + $0x58] sm:$0xff] %vm405_vm2, %v2712_v55  ;;  %v2497_v21 = vadd.f32 %v2468_v57, %v2315_v35  ;;  %v2771_v29 = vadd.f32 %v5141_v46, %v2746_v11 }
 0x305   : > { %v2531_v47 = vld [vmem:[#allocation3 + $0x60] sm:$0xff]  ;;  %v3887_v63 = vpop.f32.mrf.mxu1 }
 0x306   : > { %v2713_v4 = vadd.f32 %v5096_v37, %v2531_v47  ;;  %2515 = vst.msk [vmem:[#allocation3 + $0x70] sm:$0xff] %vm405_vm2, %v2497_v21  ;;  %v2789_v16 = vmax.f32 %v2771_v29, 0.0 }
 0x307   : > { %v2471_v36 = vpop.f32.mrf.mxu1  ;;  %v2747_v2 = vld [vmem:[#allocation3 + $0x50] sm:$0xff] }
 0x308   : > { %2731 = vst.msk [vmem:[#allocation3 + $0x60] sm:$0xff] %vm405_vm2, %v2713_v4  ;;  %v2498_v27 = vadd.f32 %v2471_v36, %v2316_v28  ;;  %v2802_v0 = vpack.c.bf16 %v2789_v16, %v2788_v61  ;;  %v2772_v37 = vadd.f32 %v5141_v46, %v2747_v2 }
 0x309   : > { %v2532_v8 = vld [vmem:[#allocation3 + $0x68] sm:$0xff]  ;;  %v3888_v5 = vpop.f32.mrf.mxu1 }
 0x30a   : > { %v2714_v31 = vadd.f32 %v5101_v60, %v2532_v8  ;;  %2516 = vst.msk [vmem:[#allocation3 + $0x78] sm:$0xff] %vm405_vm2, %v2498_v27  ;;  %3988 = vmatmul.mubr.msk.bf16.gmra.mxu0 %vm405_vm2, %v2802_v0  ;;  %v2790_v33 = vmax.f32 %v2772_v37, 0.0 }
 0x30b   : > { %v2476_v18 = vpop.f32.mrf.mxu1  ;;  %3991 = vmatprep.mubr.msk.bf16.mxu0 %vm4097_vm1, %v4096_v1  ;;  %v2748_v59 = vld [vmem:[#allocation3 + $0x58] sm:$0xff] }
 0x30c   : > { %2732 = vst.msk [vmem:[#allocation3 + $0x68] sm:$0xff] %vm405_vm2, %v2714_v31  ;;  %v2499_v34 = vadd.f32 %v2476_v18, %v2317_v9  ;;  %v2773_v32 = vadd.f32 %v5141_v46, %v2748_v59 }
 0x30d   : > { %v2533_v62 = vld [vmem:[#allocation3 + $0x70] sm:$0xff]  ;;  %v3891_v30 = vpop.f32.mrf.mxu1 }
 0x30e   : > { %v2715_v60 = vadd.f32 %v5106_v53, %v2533_v62  ;;  %2517 = vst.msk [vmem:[#allocation3 + $0x80] sm:$0xff] %vm405_vm2, %v2499_v34  ;;  %v2791_v6 = vmax.f32 %v2773_v32, 0.0 }
 0x30f   : > { %v2479_v41 = vpop.f32.mrf.mxu1  ;;  %v2749_v7 = vld [vmem:[#allocation3 + $0x60] sm:$0xff] }
 0x310   : > { %2733 = vst.msk [vmem:[#allocation3 + $0x70] sm:$0xff] %vm405_vm2, %v2715_v60  ;;  %v2500_v39 = vadd.f32 %v2479_v41, %v2318_v15  ;;  %v2803_v58 = vpack.c.bf16 %v2791_v6, %v2790_v33  ;;  %v2774_v53 = vadd.f32 %v5141_v46, %v2749_v7 }
 0x311   : > { %v2534_v24 = vld [vmem:[#allocation3 + $0x78] sm:$0xff]  ;;  %v3892_v13 = vpop.f32.mrf.mxu1 }
 0x312   : > { %v2716_v23 = vadd.f32 %v5111_v42, %v2534_v24  ;;  %2518 = vst.msk [vmem:[#allocation3 + $0x88] sm:$0xff] %vm405_vm2, %v2500_v39  ;;  %3992 = vmatmul.mubr.msk.bf16.gmra.mxu0 %vm405_vm2, %v2803_v58  ;;  %v2792_v19 = vmax.f32 %v2774_v53, 0.0  ;;  %v5261_v24 = vld [vmem:[%s5358_s8] ss:$0 sm:$0xff] }
 0x313   : > { %3995 = vmatprep.mubr.msk.bf16.mxu0 %vm4097_vm1, %v4096_v1  ;;  %v2750_v38 = vld [vmem:[#allocation3 + $0x68] sm:$0xff] }
 0x314   : > { %2734 = vst.msk [vmem:[#allocation3 + $0x78] sm:$0xff] %vm405_vm2, %v2716_v23  ;;  %v2775_v12 = vadd.f32 %v5141_v46, %v2750_v38 }
 0x315   : > { %v2535_v25 = vld [vmem:[#allocation3 + $0x80] sm:$0xff] }
 0x316   : > { %v2717_v43 = vadd.f32 %v5116_v40, %v2535_v25  ;;  %v2793_v20 = vmax.f32 %v2775_v12, 0.0 }
 0x317   : > { %v2751_v42 = vld [vmem:[#allocation3 + $0x70] sm:$0xff] }
 0x318   : > { %2735 = vst.msk [vmem:[#allocation3 + $0x80] sm:$0xff] %vm405_vm2, %v2717_v43  ;;  %v2804_v26 = vpack.c.bf16 %v2793_v20, %v2792_v19  ;;  %v2776_v3 = vadd.f32 %v5141_v46, %v2751_v42 }
 0x319   : > { %v2536_v49 = vld [vmem:[#allocation3 + $0x88] sm:$0xff] }
 0x31a   : > { %v2718_v48 = vadd.f32 %v5121_v50, %v2536_v49  ;;  %3996 = vmatmul.mubr.msk.bf16.gmra.mxu0 %vm405_vm2, %v2804_v26  ;;  %v2794_v45 = vmax.f32 %v2776_v3, 0.0 }
 0x31b   : > { %3999 = vmatprep.mubr.msk.bf16.mxu0 %vm4097_vm1, %v4096_v1  ;;  %v2752_v10 = vld [vmem:[#allocation3 + $0x78] sm:$0xff] }
 0x31c   : > { %2736 = vst.msk [vmem:[#allocation3 + $0x88] sm:$0xff] %vm405_vm2, %v2718_v48  ;;  %v2777_v40 = vadd.f32 %v5141_v46, %v2752_v10 }
 0x31e   : > { %v2795_v44 = vmax.f32 %v2777_v40, 0.0 }
 0x31f   : > { %v2753_v51 = vld [vmem:[#allocation3 + $0x80] sm:$0xff] }
 0x320   : > { %v2805_v54 = vpack.c.bf16 %v2795_v44, %v2794_v45  ;;  %v2778_v50 = vadd.f32 %v5141_v46, %v2753_v51 }
 0x321   : > { %v2902_v55 = vpop.f32.mrf.mxu1 }
 0x322   : > { %4000 = vmatmul.mubr.msk.bf16.gmra.mxu0 %vm405_vm2, %v2805_v54  ;;  %v2796_v17 = vmax.f32 %v2778_v50, 0.0 }
 0x323   : > { %4003 = vmatprep.mubr.msk.bf16.mxu0 %vm4097_vm1, %v4096_v1  ;;  %v2754_v52 = vld [vmem:[#allocation3 + $0x88] sm:$0xff]  ;;  %v3935_v35 = vpop.f32.mrf.mxu1 }
 0x324   : > { %v2779_v56 = vadd.f32 %v5141_v46, %v2754_v52 }
 0x325   : > { %v2905_v57 = vpop.f32.mrf.mxu1 }
 0x326   : > { %v2797_v14 = vmax.f32 %v2779_v56, 0.0 }
 0x327   : > { %v3936_v11 = vpop.f32.mrf.mxu1 }
 0x328   : > { %v2806_v22 = vpack.c.bf16 %v2797_v14, %v2796_v17 }
 0x329   : > { %v2910_v21 = vpop.f32.mrf.mxu1 }
 0x32a   : > { %4004 = vmatmul.mubr.msk.bf16.gmra.mxu0 %vm405_vm2, %v2806_v22 }
 0x32b   : > { %v3939_v29 = vpop.f32.mrf.mxu1 }
 0x32d   : > { %v2913_v47 = vpop.f32.mrf.mxu1 }
 0x32f   : > { %v3940_v63 = vpop.f32.mrf.mxu1 }
 0x331   : > { %v2918_v4 = vpop.f32.mrf.mxu1 }
 0x333   : > { %v3943_v61 = vpop.f32.mrf.mxu1 }
 0x335   : > { %v5230_v16 = vpop.f32.mrf.mxu1 }
 0x337   : > { %v3944_v1 = vpop.f32.mrf.mxu1 }
 0x339   : > { %v5232_v28 = vpop.f32.mrf.mxu1 }
 0x33b   : > { %v3947_v46 = vpop.f32.mrf.mxu1 }
 0x33d   : > { %v5234_v36 = vpop.f32.mrf.mxu1 }
 0x33f   : > { %v3948_v2 = vpop.f32.mrf.mxu1 }
 0x341   : > { %v5236_v27 = vpop.f32.mrf.mxu1 }
 0x343   : > { %v3951_v0 = vpop.f32.mrf.mxu1 }
 0x345   : > { %v5238_v8 = vpop.f32.mrf.mxu1 }
 0x347   : > { %v3952_v5 = vpop.f32.mrf.mxu1 }
 0x349   : > { %v5240_v31 = vpop.f32.mrf.mxu1 }
 0x34b   : > { %v3955_v37 = vpop.f32.mrf.mxu1 }
 0x34d   : > { %v5242_v9 = vpop.f32.mrf.mxu1 }
 0x34f   : > { %v3956_v18 = vpop.f32.mrf.mxu1 }
 0x351   : > { %v5244_v59 = vpop.f32.mrf.mxu1 }
 0x353   : > { %v3959_v34 = vpop.f32.mrf.mxu1 }
 0x355   : > { %v5246_v32 = vpop.f32.mrf.mxu1 }
 0x357   : > { %v3960_v62 = vpop.f32.mrf.mxu1 }
 0x359   : > { %v5248_v30 = vpop.f32.mrf.mxu1 }
 0x35b   : > { %v3963_v60 = vpop.f32.mrf.mxu1 }
 0x35d   : > { %v5250_v33 = vpop.f32.mrf.mxu1 }
 0x35f   : > { %v3964_v6 = vpop.f32.mrf.mxu1 }
 0x361   : > { %v5252_v15 = vpop.f32.mrf.mxu1 }
 0x363   : > { %v3967_v41 = vpop.f32.mrf.mxu1 }
 0x365   : > { %v5254_v7 = vpop.f32.mrf.mxu1 }
 0x367   : > { %v3968_v39 = vpop.f32.mrf.mxu1 }
 0x3aa   : > { %v3037_v58 = vpop.f32.mrf.mxu0 }
 0x3ab   : > { %v3038_v13 = vadd.f32 %v3037_v58, %v2902_v55 }
 0x3ac   : > { %v3973_v23 = vpop.f32.mrf.mxu0 }
 0x3ad   : > { %v3115_v53 = vadd.f32 %v5261_v24, %v3038_v13 }
 0x3ae   : > { %v3040_v38 = vpop.f32.mrf.mxu0 }
 0x3af   : > { %v3133_v12 = vmax.f32 %v3115_v53, 0.0  ;;  %v3041_v25 = vadd.f32 %v3040_v38, %v2905_v57 }
 0x3b0   : > { %v3974_v43 = vpop.f32.mrf.mxu0 }
 0x3b1   : > { %3152 = vst.msk [vmem:[%s5267_s20] sm:$0xff] %vm3151_vm3, %v3133_v12  ;;  %v3116_v19 = vadd.f32 %v5261_v24, %v3041_v25 }
 0x3b2   : > { %v3045_v20 = vpop.f32.mrf.mxu0 }
 0x3b3   : > { %v3134_v42 = vmax.f32 %v3116_v19, 0.0  ;;  %v3046_v26 = vadd.f32 %v3045_v20, %v2910_v21 }
 0x3b4   : > { %v3977_v49 = vpop.f32.mrf.mxu0 }
 0x3b5   : > { %3153 = vst.msk [vmem:[%s5267_s20 + $0x8] sm:$0xff] %vm3151_vm3, %v3134_v42  ;;  %v3117_v48 = vadd.f32 %v5261_v24, %v3046_v26 }
 0x3b6   : > { %v3048_v3 = vpop.f32.mrf.mxu0 }
 0x3b7   : > { %v3135_v10 = vmax.f32 %v3117_v48, 0.0  ;;  %v3049_v40 = vadd.f32 %v3048_v3, %v2913_v47 }
 0x3b8   : > { %v3978_v45 = vpop.f32.mrf.mxu0 }
 0x3b9   : > { %3154 = vst.msk [vmem:[%s5267_s20 + $0x10] sm:$0xff] %vm3151_vm3, %v3135_v10  ;;  %v3118_v44 = vadd.f32 %v5261_v24, %v3049_v40 }
 0x3ba   : > { %v3053_v51 = vpop.f32.mrf.mxu0 }
 0x3bb   : > { %v3136_v54 = vmax.f32 %v3118_v44, 0.0  ;;  %v3054_v50 = vadd.f32 %v3053_v51, %v2918_v4 }
 0x3bc   : > { %v3981_v52 = vpop.f32.mrf.mxu0 }
 0x3bd   : > { %3155 = vst.msk [vmem:[%s5267_s20 + $0x18] sm:$0xff] %vm3151_vm3, %v3136_v54  ;;  %v3119_v56 = vadd.f32 %v5261_v24, %v3054_v50 }
 0x3be   : > { %v3056_v17 = vpop.f32.mrf.mxu0 }
 0x3bf   : > { %v3137_v14 = vmax.f32 %v3119_v56, 0.0  ;;  %v3057_v55 = vadd.f32 %v3056_v17, %v5230_v16 }
 0x3c0   : > { %v3982_v22 = vpop.f32.mrf.mxu0 }
 0x3c1   : > { %3156 = vst.msk [vmem:[%s5267_s20 + $0x20] sm:$0xff] %vm3151_vm3, %v3137_v14  ;;  %v3120_v35 = vadd.f32 %v5261_v24, %v3057_v55 }
 0x3c2   : > { %v3061_v57 = vpop.f32.mrf.mxu0 }
 0x3c3   : > { %v3138_v11 = vmax.f32 %v3120_v35, 0.0  ;;  %v3062_v21 = vadd.f32 %v3061_v57, %v5232_v28 }
 0x3c4   : > { %v3985_v29 = vpop.f32.mrf.mxu0 }
 0x3c5   : > { %3157 = vst.msk [vmem:[%s5267_s20 + $0x28] sm:$0xff] %vm3151_vm3, %v3138_v11  ;;  %v3121_v47 = vadd.f32 %v5261_v24, %v3062_v21 }
 0x3c6   : > { %v3064_v63 = vpop.f32.mrf.mxu0 }
 0x3c7   : > { %v3139_v4 = vmax.f32 %v3121_v47, 0.0  ;;  %v3065_v61 = vadd.f32 %v3064_v63, %v5234_v36 }
 0x3c8   : > { %v3986_v16 = vpop.f32.mrf.mxu0 }
 0x3c9   : > { %3158 = vst.msk [vmem:[%s5267_s20 + $0x30] sm:$0xff] %vm3151_vm3, %v3139_v4  ;;  %v3122_v1 = vadd.f32 %v5261_v24, %v3065_v61 }
 0x3ca   : > { %v3069_v46 = vpop.f32.mrf.mxu0 }
 0x3cb   : > { %v3140_v2 = vmax.f32 %v3122_v1, 0.0  ;;  %v3070_v28 = vadd.f32 %v3069_v46, %v5236_v27 }
 0x3cc   : > { %v3989_v0 = vpop.f32.mrf.mxu0 }
 0x3cd   : > { %3159 = vst.msk [vmem:[%s5267_s20 + $0x38] sm:$0xff] %vm3151_vm3, %v3140_v2  ;;  %v3123_v5 = vadd.f32 %v5261_v24, %v3070_v28 }
 0x3ce   : > { %v3072_v37 = vpop.f32.mrf.mxu0 }
 0x3cf   : > { %v3141_v18 = vmax.f32 %v3123_v5, 0.0  ;;  %v3073_v36 = vadd.f32 %v3072_v37, %v5238_v8 }
 0x3d0   : > { %v3990_v34 = vpop.f32.mrf.mxu0 }
 0x3d1   : > { %3160 = vst.msk [vmem:[%s5267_s20 + $0x40] sm:$0xff] %vm3151_vm3, %v3141_v18  ;;  %v3124_v62 = vadd.f32 %v5261_v24, %v3073_v36 }
 0x3d2   : > { %v3077_v60 = vpop.f32.mrf.mxu0 }
 0x3d3   : > { %v3142_v6 = vmax.f32 %v3124_v62, 0.0  ;;  %v3078_v27 = vadd.f32 %v3077_v60, %v5240_v31 }
 0x3d4   : > { %v3993_v41 = vpop.f32.mrf.mxu0 }
 0x3d5   : > { %3161 = vst.msk [vmem:[%s5267_s20 + $0x48] sm:$0xff] %vm3151_vm3, %v3142_v6  ;;  %v3125_v39 = vadd.f32 %v5261_v24, %v3078_v27 }
 0x3d6   : > { %v3080_v58 = vpop.f32.mrf.mxu0 }
 0x3d7   : > { %v3143_v13 = vmax.f32 %v3125_v39, 0.0  ;;  %v3081_v8 = vadd.f32 %v3080_v58, %v5242_v9 }
 0x3d8   : > { %v3994_v23 = vpop.f32.mrf.mxu0 }
 0x3d9   : > { %3162 = vst.msk [vmem:[%s5267_s20 + $0x50] sm:$0xff] %vm3151_vm3, %v3143_v13  ;;  %v3126_v53 = vadd.f32 %v5261_v24, %v3081_v8 }
 0x3da   : > { %v3085_v38 = vpop.f32.mrf.mxu0 }
 0x3db   : > { %v3144_v12 = vmax.f32 %v3126_v53, 0.0  ;;  %v3086_v31 = vadd.f32 %v3085_v38, %v5244_v59 }
 0x3dc   : > { %v3997_v25 = vpop.f32.mrf.mxu0 }
 0x3dd   : > { %3163 = vst.msk [vmem:[%s5267_s20 + $0x58] sm:$0xff] %vm3151_vm3, %v3144_v12  ;;  %v3127_v43 = vadd.f32 %v5261_v24, %v3086_v31 }
 0x3de   : > { %v3088_v19 = vpop.f32.mrf.mxu0 }
 0x3df   : > { %v3145_v20 = vmax.f32 %v3127_v43, 0.0  ;;  %v3089_v9 = vadd.f32 %v3088_v19, %v5246_v32 }
 0x3e0   : > { %v3998_v42 = vpop.f32.mrf.mxu0 }
 0x3e1   : > { %3164 = vst.msk [vmem:[%s5267_s20 + $0x60] sm:$0xff] %vm3151_vm3, %v3145_v20  ;;  %v3128_v26 = vadd.f32 %v5261_v24, %v3089_v9 }
 0x3e2   : > { %v3093_v49 = vpop.f32.mrf.mxu0 }
 0x3e3   : > { %v3146_v48 = vmax.f32 %v3128_v26, 0.0  ;;  %v3094_v59 = vadd.f32 %v3093_v49, %v5248_v30 }
 0x3e4   : > { %v4001_v3 = vpop.f32.mrf.mxu0 }
 0x3e5   : > { %3165 = vst.msk [vmem:[%s5267_s20 + $0x68] sm:$0xff] %vm3151_vm3, %v3146_v48  ;;  %v3129_v10 = vadd.f32 %v5261_v24, %v3094_v59 }
 0x3e6   : > { %v3096_v40 = vpop.f32.mrf.mxu0 }
 0x3e7   : > { %v3147_v45 = vmax.f32 %v3129_v10, 0.0  ;;  %v3097_v32 = vadd.f32 %v3096_v40, %v5250_v33 }
 0x3e8   : > { %v4002_v44 = vpop.f32.mrf.mxu0 }
 0x3e9   : > { %3166 = vst.msk [vmem:[%s5267_s20 + $0x70] sm:$0xff] %vm3151_vm3, %v3147_v45  ;;  %v3130_v51 = vadd.f32 %v5261_v24, %v3097_v32 }
 0x3ea   : > { %v3101_v54 = vpop.f32.mrf.mxu0 }
 0x3eb   : > { %v3148_v50 = vmax.f32 %v3130_v51, 0.0  ;;  %v3102_v30 = vadd.f32 %v3101_v54, %v5252_v15 }
 0x3ec   : > { %v4005_v52 = vpop.f32.mrf.mxu0 }
 0x3ed   : > { %3167 = vst.msk [vmem:[%s5267_s20 + $0x78] sm:$0xff] %vm3151_vm3, %v3148_v50  ;;  %v3131_v56 = vadd.f32 %v5261_v24, %v3102_v30 }
 0x3ee   : > { %v3104_v17 = vpop.f32.mrf.mxu0 }
 0x3ef   : > { %v3149_v14 = vmax.f32 %v3131_v56, 0.0  ;;  %v3105_v55 = vadd.f32 %v3104_v17, %v5254_v7 }
 0x3f0   : > { %v4006_v33 = vpop.f32.mrf.mxu0 }
 0x3f1   : > { %3168 = vst.msk [vmem:[%s5267_s20 + $0x80] sm:$0xff] %vm3151_vm3, %v3149_v14  ;;  %v3132_v22 = vadd.f32 %v5261_v24, %v3105_v55 }
 0x3f3   : > { %v3150_v35 = vmax.f32 %v3132_v22, 0.0 }
 0x3f5   : > { %3169 = vst.msk [vmem:[%s5267_s20 + $0x88] sm:$0xff] %vm3151_vm3, %v3150_v35 }
 0x3f6 PF: > { %s19_s13 = sadd.s32 1, %s4094_s13   ;;  %s5360_s30 = smov %s4086_s11 }
 0x3f7   : > { %p16_p7 = scmp.ge.s32.totalorder %s19_s13, 6   ;;  %s5361_s10 = smov %s4090_s12 }
 0x3f8   : > { %s5362_s11 = smov %s5365_s14  ;;  %s5363_s12 = smov %s5369_s15 }
 0x3f9   :  { %18 = sbr.rel (!%p16_p7) target bundleno = 3 (0x3), region = 97 }

</bundles_post_ra>
